<compile_context>
chip_gen: v7x
topology: tpu7x:2x2x1
jax: 0.10.0
libtpu: 0.0.40
codegen_flags: <defaults>
</compile_context>

<pallas_src>
import functools

import jax
import jax.numpy as jnp
from jax import lax
from jax.experimental import pallas as pl
from jax.experimental.pallas import tpu as pltpu


def _round_up(x, m):
    return ((x + m - 1) // m) * m


# ----------------------------------------------------------------------------
# Pallas kernel: linear projections + similarity scores (per batch tile)
# ----------------------------------------------------------------------------
def _rank_kernel(tweet_ref, pos_ref, neg_ref,
                 wt_ref, bt_ref, wg_ref, bg_ref,
                 ps_ref, ns_ref, *, sim):
    # f32 activations stream in; cast to bf16 on the VPU right before the MXU
    # dots (bf16 operands, f32 accumulate). Weights were pre-cast once in the
    # wrapper and stay VMEM-resident (constant index_map).
    wt = wt_ref[...]
    wg = wg_ref[...]
    th = jnp.dot(tweet_ref[...].astype(jnp.bfloat16), wt,
                 preferred_element_type=jnp.float32) + bt_ref[...]
    # Two back-to-back dots against the SAME resident W_group tile (no concat /
    # extra VMEM copy; the pushed MXU RHS is reused across consecutive matmuls).
    ph = jnp.dot(pos_ref[...].astype(jnp.bfloat16), wg,
                 preferred_element_type=jnp.float32) + bg_ref[...]
    nh = jnp.dot(neg_ref[...].astype(jnp.bfloat16), wg,
                 preferred_element_type=jnp.float32) + bg_ref[...]
    # TODO(synk): F.dropout omitted (eval-mode / p=0 identity).

    if sim == 'cos':
        # torch.nn.CosineSimilarity clamps the NORM PRODUCT by eps:
        #   num / max(||a||*||b||, eps) == num * min(rsqrt(a2*b2), 1/eps)
        # rsqrt runs on the EUP slot (free vs. the VALU).
        eps = 1e-8
        inv_cap = 1.0 / eps
        num_p = jnp.sum(th * ph, axis=-1, keepdims=True)
        num_n = jnp.sum(th * nh, axis=-1, keepdims=True)
        t2 = jnp.sum(th * th, axis=-1, keepdims=True)
        p2 = jnp.sum(ph * ph, axis=-1, keepdims=True)
        n2 = jnp.sum(nh * nh, axis=-1, keepdims=True)
        ps = num_p * jnp.minimum(lax.rsqrt(t2 * p2), inv_cap)      # (TB, 1)
        ns = num_n * jnp.minimum(lax.rsqrt(t2 * n2), inv_cap)      # (TB, 1)
    else:  # 'l2'
        # torch pairwise_distance adds eps ELEMENT-WISE to the difference
        # before the norm (slightly biases the distance) — kept on purpose to
        # match torch.nn.functional.pairwise_distance.
        eps = 1e-6
        pd = jnp.sqrt(jnp.sum((th - ph + eps) ** 2, axis=-1, keepdims=True))
        nd = jnp.sqrt(jnp.sum((th - nh + eps) ** 2, axis=-1, keepdims=True))
        ps = jnp.exp(-pd)
        ns = jnp.exp(-nd)

    # Tiny (TB, 1) outputs (8 B/row total) instead of a 128-lane slab. Padded
    # batch rows produce junk scores here (th == b_tweet etc.); they are sliced
    # off in the wrapper before the loss mean, never reduced in-kernel.
    ps_ref[...] = ps
    ns_ref[...] = ns


def bert_rank_forward(tweet_cls, pos_cls, neg_cls, params, *,
                      margin=1.0, sim='cos', block_b=512,
                      vmem_limit_bytes=None):
    """tweet_cls / pos_cls / neg_cls: (B, 768) detached CLS features (f32)."""
    B, D = tweet_cls.shape
    N = params['w_tweet'].shape[1]

    # Batch tile: multiple of 128 keeps every block (8,128)-aligned. Clamp to
    # the (padded) batch so tiny batches don't over-pad. Sweep block_b per
    # chip: ~512 on v5e (16 MiB scoped VMEM default), 512-1024 on v6e, and on
    # v7x size it so n_tiles >= 2 (megacore) while staying inside 64 MiB VMEM.
    TB = max(128, min(_round_up(block_b, 128), _round_up(B, 128)))
    n_tiles = pl.cdiv(B, TB)
    B_pad = n_tiles * TB
    pad = B_pad - B

    def pad_act(x):
        # f32 straight through — the bf16 cast happens on the VPU in-kernel.
        x = x.astype(jnp.float32)
        if pad:
            x = jnp.pad(x, ((0, pad), (0, 0)))
        return x

    tweet_p = pad_act(tweet_cls)
    pos_p = pad_act(pos_cls)
    neg_p = pad_act(neg_cls)
    # Weights cast to bf16 once (tiny, amortized); biases stay f32.
    wt = params['w_tweet'].astype(jnp.bfloat16)
    wg = params['w_group'].astype(jnp.bfloat16)
    bt = params['b_tweet'].reshape(1, N).astype(jnp.float32)
    bg = params['b_group'].reshape(1, N).astype(jnp.float32)

    kernel = functools.partial(_rank_kernel, sim=sim)

    act_spec = pl.BlockSpec((TB, D), lambda i: (i, 0))
    w_spec = pl.BlockSpec((D, N), lambda i: (0, 0))     # weight-resident
    b_spec = pl.BlockSpec((1, N), lambda i: (0, 0))     # bias-resident
    out_spec = pl.BlockSpec((TB, 1), lambda i: (i, 0))
    # TODO(synk): per-gen extras — v6e/v7x fused 256-wide RHS (concat wt|wg),
    # v7x single-buffered weight specs — omitted; marginal at these sizes.

    cp_kwargs = dict(dimension_semantics=("parallel",))
    if vmem_limit_bytes is not None:
        cp_kwargs["vmem_limit_bytes"] = int(vmem_limit_bytes)

    ps_pad, ns_pad = pl.pallas_call(
        kernel,
        out_shape=(jax.ShapeDtypeStruct((B_pad, 1), jnp.float32),
                   jax.ShapeDtypeStruct((B_pad, 1), jnp.float32)),
        grid_spec=pltpu.PrefetchScalarGridSpec(
            num_scalar_prefetch=0,
            grid=(n_tiles,),
            in_specs=[act_spec, act_spec, act_spec,
                      w_spec, b_spec, w_spec, b_spec],
            out_specs=(out_spec, out_spec),
        ),
        compiler_params=pltpu.CompilerParams(**cp_kwargs),
    )(tweet_p, pos_p, neg_p, wt, bt, wg, bg)

    pos_score = ps_pad[:B, 0]
    neg_score = ns_pad[:B, 0]
    # nn.MarginRankingLoss(margin), target y = 1: mean(max(0, neg - pos + m))
    # over the real (unpadded) batch.
    loss = jnp.mean(jnp.maximum(neg_score - pos_score + margin, 0.0))
    return pos_score, neg_score, loss


# ----------------------------------------------------------------------------
# Glue: deterministic "encoder" stand-in + parameter init
# ----------------------------------------------------------------------------
def fake_bert_cls(token_ids, emb_table):
    # TODO(synk): pretrained BertModel.from_pretrained() cannot be reproduced
    # in-script; its detached CLS output is replaced by a deterministic
    # embedding lookup at position 0 (== encoder(x)[0][:, 0, :] semantics).
    return emb_table[token_ids[:, 0]]


def init_params(key, bert_dim, hidden_size, num_layers, vocab_size):
    out_dim = hidden_size * num_layers * 2
    k = jax.random.split(key, 5)
    bound = 1.0 / jnp.sqrt(bert_dim)
    params = {
        'emb':      (0.02 * jax.random.normal(k[0], (vocab_size, bert_dim))
                     ).astype(jnp.float32),
        'w_tweet':  jax.random.uniform(k[1], (bert_dim, out_dim),
                                       minval=-bound, maxval=bound,
                                       dtype=jnp.float32),
        'b_tweet':  jax.random.uniform(k[2], (1, out_dim),
                                       minval=-bound, maxval=bound,
                                       dtype=jnp.float32),
        'w_group':  jax.random.uniform(k[3], (bert_dim, out_dim),
                                       minval=-bound, maxval=bound,
                                       dtype=jnp.float32),
        'b_group':  jax.random.uniform(k[4], (1, out_dim),
                                       minval=-bound, maxval=bound,
                                       dtype=jnp.float32),
    }
    return params


def reference_forward(tweet_cls, pos_cls, neg_cls, params, margin, sim,
                      bf16_operands=False):
    """Plain-JAX reference (torch-faithful eps handling).

    bf16_operands=True emulates the kernel's MXU operand precision (bf16 ops,
    f32 accumulate) for a tight kernel-math check; False is the f32 torch
    model, against which bf16 operands introduce a small documented drift.
    """
    cast = (lambda x: x.astype(jnp.bfloat16)) if bf16_operands else (lambda x: x)
    th = jnp.dot(cast(tweet_cls), cast(params['w_tweet']),
                 preferred_element_type=jnp.float32) + params['b_tweet']
    ph = jnp.dot(cast(pos_cls), cast(params['w_group']),
                 preferred_element_type=jnp.float32) + params['b_group']
    nh = jnp.dot(cast(neg_cls), cast(params['w_group']),
                 preferred_element_type=jnp.float32) + params['b_group']
    if sim == 'cos':
        eps = 1e-8
        def cos(a, b):
            denom = jnp.maximum(jnp.linalg.norm(a, axis=-1)
                                * jnp.linalg.norm(b, axis=-1), eps)
            return jnp.sum(a * b, axis=-1) / denom
        ps, ns = cos(th, ph), cos(th, nh)
    else:
        ps = jnp.exp(-jnp.linalg.norm(th - ph + 1e-6, axis=-1))
        ns = jnp.exp(-jnp.linalg.norm(th - nh + 1e-6, axis=-1))
    loss = jnp.mean(jnp.maximum(ns - ps + margin, 0.0))
    return ps, ns, loss


if __name__ == "__main__":
    # Small, deterministic config consistent with the module's __init__.
    BERT_DIM = 768            # fixed by nn.Linear(768, ...)
    HIDDEN_SIZE = 32
    NUM_LAYERS = 2            # out_dim = 32 * 2 * 2 = 128 (lane-aligned)
    VOCAB_SIZE = 64
    B, S = 8, 8
    MARGIN = 0.5

    key = jax.random.PRNGKey(0)
    kp, kt, kpos, kneg = jax.random.split(key, 4)
    params = init_params(kp, BERT_DIM, HIDDEN_SIZE, NUM_LAYERS, VOCAB_SIZE)

    tweet_tok = jax.random.randint(kt, (B, S), 0, VOCAB_SIZE)
    pos_tok = jax.random.randint(kpos, (B, S), 0, VOCAB_SIZE)
    neg_tok = jax.random.randint(kneg, (B, S), 0, VOCAB_SIZE)

    tweet_cls = fake_bert_cls(tweet_tok, params['emb'])
    pos_cls = fake_bert_cls(pos_tok, params['emb'])
    neg_cls = fake_bert_cls(neg_tok, params['emb'])

    for SIM in ('cos', 'l2'):
        pos_score, neg_score, loss = bert_rank_forward(
            tweet_cls, pos_cls, neg_cls, params, margin=MARGIN, sim=SIM)
        jax.block_until_ready((pos_score, neg_score, loss))

        # Tight check: kernel math vs. a bf16-operand / f32-accumulate reference.
        ps_k, ns_k, loss_k = reference_forward(
            tweet_cls, pos_cls, neg_cls, params, MARGIN, SIM, bf16_operands=True)
        assert jnp.allclose(pos_score, ps_k, atol=1e-3, rtol=1e-3), SIM
        assert jnp.allclose(neg_score, ns_k, atol=1e-3, rtol=1e-3), SIM
        assert jnp.allclose(loss, loss_k, atol=1e-3, rtol=1e-3), SIM

        # Loose check vs. the f32 torch model: bf16 MXU operands shift scores
        # slightly (documented drift; fine for ranking).
        ps_f, ns_f, loss_f = reference_forward(
            tweet_cls, pos_cls, neg_cls, params, MARGIN, SIM, bf16_operands=False)
        assert jnp.allclose(pos_score, ps_f, atol=5e-2, rtol=5e-2), SIM
        assert jnp.allclose(neg_score, ns_f, atol=5e-2, rtol=5e-2), SIM
        assert jnp.allclose(loss, loss_f, atol=5e-2, rtol=5e-2), SIM

    print("KERNEL_OK")
</pallas_src>

<mosaic_0001>
module attributes {stable_mosaic.version = 11 : i64} {
  func.func @_rank_kernel(%arg0: i32, %arg1: memref<128x768xf32, #tpu.memory_space<vmem>>, %arg2: memref<128x768xf32, #tpu.memory_space<vmem>>, %arg3: memref<128x768xf32, #tpu.memory_space<vmem>>, %arg4: memref<768x128xbf16, #tpu.memory_space<vmem>>, %arg5: memref<1x128xf32, #tpu.memory_space<vmem>>, %arg6: memref<768x128xbf16, #tpu.memory_space<vmem>>, %arg7: memref<1x128xf32, #tpu.memory_space<vmem>>, %arg8: memref<128x1xf32, #tpu.memory_space<vmem>>, %arg9: memref<128x1xf32, #tpu.memory_space<vmem>>) attributes {dimension_semantics = [#tpu.dimension_semantics<parallel>], iteration_bounds = array<i64: 1>, scalar_prefetch = 0 : i64, scratch_operands = 0 : i64, tpu.core_type = #tpu.core_type<tc>, window_params = [{transform_indices = @transform_0, window_bounds = array<i64: 128, 768>}, {transform_indices = @transform_1, window_bounds = array<i64: 128, 768>}, {transform_indices = @transform_2, window_bounds = array<i64: 128, 768>}, {pipeline_mode = #tpu.pipeline_mode<synchronous>, transform_indices = @transform_3, window_bounds = array<i64: 768, 128>}, {pipeline_mode = #tpu.pipeline_mode<synchronous>, transform_indices = @transform_4, window_bounds = array<i64: 1, 128>}, {pipeline_mode = #tpu.pipeline_mode<synchronous>, transform_indices = @transform_5, window_bounds = array<i64: 768, 128>}, {pipeline_mode = #tpu.pipeline_mode<synchronous>, transform_indices = @transform_6, window_bounds = array<i64: 1, 128>}, {transform_indices = @transform_7, window_bounds = array<i64: 128, 1>}, {transform_indices = @transform_8, window_bounds = array<i64: 128, 1>}]} {
    %c0 = arith.constant 0 : index
    %c0_0 = arith.constant 0 : index
    %0 = vector.load %arg4[%c0, %c0_0] : memref<768x128xbf16, #tpu.memory_space<vmem>>, vector<768x128xbf16>
    %c0_1 = arith.constant 0 : index
    %c0_2 = arith.constant 0 : index
    %1 = vector.load %arg6[%c0_1, %c0_2] : memref<768x128xbf16, #tpu.memory_space<vmem>>, vector<768x128xbf16>
    %c0_3 = arith.constant 0 : index
    %c0_4 = arith.constant 0 : index
    %2 = vector.load %arg1[%c0_3, %c0_4] : memref<128x768xf32, #tpu.memory_space<vmem>>, vector<128x768xf32>
    %3 = arith.truncf %2 : vector<128x768xf32> to vector<128x768xbf16>
    %cst = arith.constant dense<0.000000e+00> : vector<128x128xf32>
    %4 = tpu.matmul %3, %0, %cst {dimension_numbers = #tpu.dot_dimension_numbers<[1], [0], [0], [1], [0, 0, 1, 1], [], []>} : vector<128x768xbf16>, vector<768x128xbf16>, vector<128x128xf32> -> vector<128x128xf32>
    %c0_5 = arith.constant 0 : index
    %c0_6 = arith.constant 0 : index
    %5 = vector.load %arg5[%c0_5, %c0_6] : memref<1x128xf32, #tpu.memory_space<vmem>>, vector<1x128xf32>
    %6 = vector.broadcast %5 : vector<1x128xf32> to vector<128x128xf32>
    %7 = arith.addf %4, %6 : vector<128x128xf32>
    %c0_7 = arith.constant 0 : index
    %c0_8 = arith.constant 0 : index
    %8 = vector.load %arg2[%c0_7, %c0_8] : memref<128x768xf32, #tpu.memory_space<vmem>>, vector<128x768xf32>
    %9 = arith.truncf %8 : vector<128x768xf32> to vector<128x768xbf16>
    %cst_9 = arith.constant dense<0.000000e+00> : vector<128x128xf32>
    %10 = tpu.matmul %9, %1, %cst_9 {dimension_numbers = #tpu.dot_dimension_numbers<[1], [0], [0], [1], [0, 0, 1, 1], [], []>} : vector<128x768xbf16>, vector<768x128xbf16>, vector<128x128xf32> -> vector<128x128xf32>
    %c0_10 = arith.constant 0 : index
    %c0_11 = arith.constant 0 : index
    %11 = vector.load %arg7[%c0_10, %c0_11] : memref<1x128xf32, #tpu.memory_space<vmem>>, vector<1x128xf32>
    %12 = vector.broadcast %11 : vector<1x128xf32> to vector<128x128xf32>
    %13 = arith.addf %10, %12 : vector<128x128xf32>
    %c0_12 = arith.constant 0 : index
    %c0_13 = arith.constant 0 : index
    %14 = vector.load %arg3[%c0_12, %c0_13] : memref<128x768xf32, #tpu.memory_space<vmem>>, vector<128x768xf32>
    %15 = arith.truncf %14 : vector<128x768xf32> to vector<128x768xbf16>
    %cst_14 = arith.constant dense<0.000000e+00> : vector<128x128xf32>
    %16 = tpu.matmul %15, %1, %cst_14 {dimension_numbers = #tpu.dot_dimension_numbers<[1], [0], [0], [1], [0, 0, 1, 1], [], []>} : vector<128x768xbf16>, vector<768x128xbf16>, vector<128x128xf32> -> vector<128x128xf32>
    %c0_15 = arith.constant 0 : index
    %c0_16 = arith.constant 0 : index
    %17 = vector.load %arg7[%c0_15, %c0_16] : memref<1x128xf32, #tpu.memory_space<vmem>>, vector<1x128xf32>
    %18 = vector.broadcast %17 : vector<1x128xf32> to vector<128x128xf32>
    %19 = arith.addf %16, %18 : vector<128x128xf32>
    %20 = arith.mulf %7, %13 : vector<128x128xf32>
    %cst_17 = arith.constant dense<0.000000e+00> : vector<128xf32>
    %21 = vector.multi_reduction <add>, %20, %cst_17 [1] : vector<128x128xf32> to vector<128xf32>
    %22 = vector.shape_cast %21 : vector<128xf32> to vector<128x1xf32>
    %23 = arith.mulf %7, %19 : vector<128x128xf32>
    %cst_18 = arith.constant dense<0.000000e+00> : vector<128xf32>
    %24 = vector.multi_reduction <add>, %23, %cst_18 [1] : vector<128x128xf32> to vector<128xf32>
    %25 = vector.shape_cast %24 : vector<128xf32> to vector<128x1xf32>
    %26 = arith.mulf %7, %7 : vector<128x128xf32>
    %cst_19 = arith.constant dense<0.000000e+00> : vector<128xf32>
    %27 = vector.multi_reduction <add>, %26, %cst_19 [1] : vector<128x128xf32> to vector<128xf32>
    %28 = vector.shape_cast %27 : vector<128xf32> to vector<128x1xf32>
    %29 = arith.mulf %13, %13 : vector<128x128xf32>
    %cst_20 = arith.constant dense<0.000000e+00> : vector<128xf32>
    %30 = vector.multi_reduction <add>, %29, %cst_20 [1] : vector<128x128xf32> to vector<128xf32>
    %31 = vector.shape_cast %30 : vector<128xf32> to vector<128x1xf32>
    %32 = arith.mulf %19, %19 : vector<128x128xf32>
    %cst_21 = arith.constant dense<0.000000e+00> : vector<128xf32>
    %33 = vector.multi_reduction <add>, %32, %cst_21 [1] : vector<128x128xf32> to vector<128xf32>
    %34 = vector.shape_cast %33 : vector<128xf32> to vector<128x1xf32>
    %35 = arith.mulf %28, %31 : vector<128x1xf32>
    %36 = math.rsqrt %35 : vector<128x1xf32>
    %cst_22 = arith.constant 1.000000e+08 : f32
    %37 = vector.broadcast %cst_22 : f32 to vector<128x1xf32>
    %38 = arith.minimumf %36, %37 : vector<128x1xf32>
    %39 = arith.mulf %22, %38 : vector<128x1xf32>
    %40 = arith.mulf %28, %34 : vector<128x1xf32>
    %41 = math.rsqrt %40 : vector<128x1xf32>
    %cst_23 = arith.constant 1.000000e+08 : f32
    %42 = vector.broadcast %cst_23 : f32 to vector<128x1xf32>
    %43 = arith.minimumf %41, %42 : vector<128x1xf32>
    %44 = arith.mulf %25, %43 : vector<128x1xf32>
    %c0_24 = arith.constant 0 : index
    %c0_25 = arith.constant 0 : index
    %45 = vector.load %arg8[%c0_24, %c0_25] : memref<128x1xf32, #tpu.memory_space<vmem>>, vector<128x1xf32>
    tpu.vector_store %arg8[%c0_24, %c0_25], %39 {strides = array<i32>} : memref<128x1xf32, #tpu.memory_space<vmem>>, vector<128x1xf32>,
    %c0_26 = arith.constant 0 : index
    %c0_27 = arith.constant 0 : index
    %46 = vector.load %arg9[%c0_26, %c0_27] : memref<128x1xf32, #tpu.memory_space<vmem>>, vector<128x1xf32>
    tpu.vector_store %arg9[%c0_26, %c0_27], %44 {strides = array<i32>} : memref<128x1xf32, #tpu.memory_space<vmem>>, vector<128x1xf32>,
    return
  }
  func.func @transform_0(%arg0: i32) -> (i32, i32) {
    %c0_i32 = arith.constant 0 : i32
    %c0_i32_0 = arith.constant 0 : i32
    return %arg0, %c0_i32 : i32, i32
  }
  func.func @transform_1(%arg0: i32) -> (i32, i32) {
    %c0_i32 = arith.constant 0 : i32
    %c0_i32_0 = arith.constant 0 : i32
    return %arg0, %c0_i32 : i32, i32
  }
  func.func @transform_2(%arg0: i32) -> (i32, i32) {
    %c0_i32 = arith.constant 0 : i32
    %c0_i32_0 = arith.constant 0 : i32
    return %arg0, %c0_i32 : i32, i32
  }
  func.func @transform_3(%arg0: i32) -> (i32, i32) {
    %c0_i32 = arith.constant 0 : i32
    %c0_i32_0 = arith.constant 0 : i32
    %c0_i32_1 = arith.constant 0 : i32
    return %c0_i32, %c0_i32_0 : i32, i32
  }
  func.func @transform_4(%arg0: i32) -> (i32, i32) {
    %c0_i32 = arith.constant 0 : i32
    %c0_i32_0 = arith.constant 0 : i32
    %c0_i32_1 = arith.constant 0 : i32
    return %c0_i32, %c0_i32_0 : i32, i32
  }
  func.func @transform_5(%arg0: i32) -> (i32, i32) {
    %c0_i32 = arith.constant 0 : i32
    %c0_i32_0 = arith.constant 0 : i32
    %c0_i32_1 = arith.constant 0 : i32
    return %c0_i32, %c0_i32_0 : i32, i32
  }
  func.func @transform_6(%arg0: i32) -> (i32, i32) {
    %c0_i32 = arith.constant 0 : i32
    %c0_i32_0 = arith.constant 0 : i32
    %c0_i32_1 = arith.constant 0 : i32
    return %c0_i32, %c0_i32_0 : i32, i32
  }
  func.func @transform_7(%arg0: i32) -> (i32, i32) {
    %c0_i32 = arith.constant 0 : i32
    %c0_i32_0 = arith.constant 0 : i32
    return %arg0, %c0_i32 : i32, i32
  }
  func.func @transform_8(%arg0: i32) -> (i32, i32) {
    %c0_i32 = arith.constant 0 : i32
    %c0_i32_0 = arith.constant 0 : i32
    return %arg0, %c0_i32 : i32, i32
  }
}

</mosaic_0001>

<bundles_post_ra>
// kernel: tpu_custom_call.1
= control target key start
LH: loop header
LB: loop body
LE: loop exit
PB: predicated region body
PF: predicated region fallthrough
CT: control target
= control target key end

     0   :  { %14 = vsyncpa [#allocation3], 0  ;;  %s4396_s0 = inlined_call_operand.hbm [shape: f32[128,768], index: 0, kind: input, shape index: {}]   ;;  %s4397_s1 = inlined_call_operand.hbm [shape: f32[128,768], index: 1, kind: input, shape index: {}]   ;;  %s4398_s2 = inlined_call_operand.hbm [shape: f32[128,768], index: 2, kind: input, shape index: {}]   ;;  %s4399_s3 = inlined_call_operand.hbm [shape: bf16[768,128], index: 3, kind: input, shape index: {}]   ;;  %s4400_s4 = inlined_call_operand.vmem [shape: f32[1,128], index: 4, kind: input, shape index: {}]   ;;  %s4401_s5 = inlined_call_operand.hbm [shape: bf16[768,128], index: 5, kind: input, shape index: {}]   ;;  %s4402_s6 = inlined_call_operand.vmem [shape: f32[1,128], index: 6, kind: input, shape index: {}]   ;;  %s4403_s7 = inlined_call_operand.vmem [shape: f32[128,1], index: 7, kind: output, shape index: {0}]   ;;  %s4404_s8 = inlined_call_operand.vmem [shape: f32[128,1], index: 8, kind: output, shape index: {1}]  }
   0x1   :  { %15 = vsyncpa [#allocation5], 0 }
   0x2   :  { %16 = vsyncpa [#allocation8], 0  ;;  %s3571_s27 = smov [#allocation4]   ;;  %s3572_s29 = smov [#allocation7]  }
   0x3   :  { %s34_s28 = sshll.u32 %s3571_s27, 4  ;;  %s58_s30 = sshll.u32 %s3572_s29, 4  ;;  %s35_s28 = int_to_ptr.vmem [resolvable:$true] %s34_s28  ;;  %s3625_s30 = int_to_ptr.vmem [resolvable:$true] %s58_s30 }
   0x4   :  { %s3455_s11 = scalar_lea.hbm %s4397_s1, 12288 }
   0x5   :  { %p3456_p0 = scmp.ne.s32.totalorder %s4397_s1, %s3455_s11  ;;  %p3459_p1 = scmp.lt.u32.totalorder %s3455_s11, %s4397_s1 }
   0x7   :  { %p3461_p2 = pnand %p3459_p1, %p3456_p0 }
   0x9   :  { %3464 = shalt.err (!%p3461_p2)
}
   0xa   :  { %s3465_s16 = scalar_lea.vmem %s35_s28, 12288  ;;  %p3470_p4 = scmp.lt.s32.totalorder %s35_s28, %s35_s28 }
   0xb   :  { %p3466_p3 = scmp.ne.s32.totalorder %s35_s28, %s3465_s16  ;;  %p3471_p5 = scmp.lt.s32.totalorder %s3465_s16, %s3465_s16 }
   0xd   :  { %p3472_p6 = por %p3471_p5, %p3470_p4 }
   0xf   :  { %p3473_p7 = pnand %p3472_p6, %p3466_p3 }
  0x11   :  { %3476 = shalt.err (!%p3473_p7)
}
  0x12   :  { %s3573_s17 = smov 768   ;;  %s3574_s18 = smov 48  }
  0x13   :  { %40 = dma.hbm_to_vmem [thread:$0]  %s4397_s1, 12288, %s35_s28, [#allocation5], %s3573_s17, %s3573_s17, %s3574_s18  }
  0x14   :  { %s3477_s23 = scalar_lea.hbm %s4399_s3, 6144 }
  0x15   :  { %p3478_p8 = scmp.ne.s32.totalorder %s4399_s3, %s3477_s23  ;;  %p3481_p9 = scmp.lt.u32.totalorder %s3477_s23, %s4399_s3 }
  0x17   :  { %p3483_p10 = pnand %p3481_p9, %p3478_p8 }
  0x19   :  { %3486 = shalt.err (!%p3483_p10)
}
  0x1a   :  { %s3487_s29 = scalar_lea.vmem %s3625_s30, 6144  ;;  %p3492_p12 = scmp.lt.s32.totalorder %s3625_s30, %s3625_s30 }
  0x1b   :  { %p3488_p11 = scmp.ne.s32.totalorder %s3625_s30, %s3487_s29  ;;  %p3493_p13 = scmp.lt.s32.totalorder %s3487_s29, %s3487_s29 }
  0x1d   :  { %p3494_p0 = por %p3493_p13, %p3492_p12 }
  0x1f   :  { %p3495_p1 = pnand %p3494_p0, %p3488_p11 }
  0x21   :  { %3498 = shalt.err (!%p3495_p1)
}
  0x22   :  { %s3575_s1 = smov 64   ;;  %s3576_s28 = smov 4  }
  0x23   :  { %64 = dma.hbm_to_vmem [thread:$0]  %s4399_s3, 6144, %s3625_s30, [#allocation8], %s3575_s1, %s3575_s1, %s3576_s28  }
  0x24   :  { %s3577_s11 = smov [#allocation2]   ;;  %s3578_s13 = smov [#allocation6]  }
  0x25   :  { %s22_s12 = sshll.u32 %s3577_s11, 4  ;;  %s46_s14 = sshll.u32 %s3578_s13, 4  ;;  %s23_s12 = int_to_ptr.vmem [resolvable:$true] %s22_s12  ;;  %s3662_s14 = int_to_ptr.vmem [resolvable:$true] %s46_s14 }
  0x26   :  { %s3499_s19 = scalar_lea.hbm %s4396_s0, 12288 }
  0x27   :  { %p3500_p2 = scmp.ne.s32.totalorder %s4396_s0, %s3499_s19  ;;  %p3503_p3 = scmp.lt.u32.totalorder %s3499_s19, %s4396_s0 }
  0x29   :  { %p3505_p4 = pnand %p3503_p3, %p3500_p2 }
  0x2b   :  { %3508 = shalt.err (!%p3505_p4)
}
  0x2c   :  { %s3509_s3 = scalar_lea.vmem %s23_s12, 12288  ;;  %p3514_p6 = scmp.lt.s32.totalorder %s23_s12, %s23_s12 }
  0x2d   :  { %p3510_p5 = scmp.ne.s32.totalorder %s23_s12, %s3509_s3  ;;  %p3515_p7 = scmp.lt.s32.totalorder %s3509_s3, %s3509_s3 }
  0x2f   :  { %p3516_p8 = por %p3515_p7, %p3514_p6 }
  0x31   :  { %p3517_p9 = pnand %p3516_p8, %p3510_p5 }
  0x33   :  { %3520 = shalt.err (!%p3517_p9)
}
  0x34   :  { %28 = dma.hbm_to_vmem [thread:$0]  %s4396_s0, 12288, %s23_s12, [#allocation3], %s3573_s17, %s3573_s17, %s3574_s18  }
  0x35   :  { %s3521_s27 = scalar_lea.hbm %s4398_s2, 12288 }
  0x36   :  { %p3522_p10 = scmp.ne.s32.totalorder %s4398_s2, %s3521_s27  ;;  %p3525_p11 = scmp.lt.u32.totalorder %s3521_s27, %s4398_s2 }
  0x38   :  { %p3527_p12 = pnand %p3525_p11, %p3522_p10 }
  0x3a   :  { %3530 = shalt.err (!%p3527_p12)
}
  0x3b   :  { %s3531_s13 = scalar_lea.vmem %s3662_s14, 12288  ;;  %p3536_p0 = scmp.lt.s32.totalorder %s3662_s14, %s3662_s14 }
  0x3c   :  { %p3532_p13 = scmp.ne.s32.totalorder %s3662_s14, %s3531_s13  ;;  %p3537_p1 = scmp.lt.s32.totalorder %s3531_s13, %s3531_s13 }
  0x3e   :  { %p3538_p2 = por %p3537_p1, %p3536_p0 }
  0x40   :  { %p3539_p3 = pnand %p3538_p2, %p3532_p13 }
  0x42   :  { %3542 = shalt.err (!%p3539_p3)
}
  0x43   :  { %52 = dma.hbm_to_vmem [thread:$0]  %s4398_s2, 12288, %s3662_s14, [#allocation5], %s3573_s17, %s3573_s17, %s3574_s18  }
  0x44   :  { %s3579_s15 = smov [#allocation9]   ;;  %s3543_s21 = scalar_lea.hbm %s4401_s5, 6144 }
  0x45   :  { %s72_s16 = sshll.u32 %s3579_s15, 4  ;;  %p3544_p4 = scmp.ne.s32.totalorder %s4401_s5, %s3543_s21  ;;  %s73_s16 = int_to_ptr.vmem [resolvable:$true] %s72_s16 }
  0x46   :  { %p3547_p5 = scmp.lt.u32.totalorder %s3543_s21, %s4401_s5 }
  0x48   :  { %p3549_p6 = pnand %p3547_p5, %p3544_p4 }
  0x4a   :  { %3552 = shalt.err (!%p3549_p6)
}
  0x4b   :  { %s3553_s24 = scalar_lea.vmem %s73_s16, 6144  ;;  %p3558_p8 = scmp.lt.s32.totalorder %s73_s16, %s73_s16 }
  0x4c   :  { %p3554_p7 = scmp.ne.s32.totalorder %s73_s16, %s3553_s24  ;;  %p3559_p9 = scmp.lt.s32.totalorder %s3553_s24, %s3553_s24 }
  0x4e   :  { %p3560_p10 = por %p3559_p9, %p3558_p8 }
  0x50   :  { %p3561_p11 = pnand %p3560_p10, %p3554_p7 }
  0x52   :  { %3564 = shalt.err (!%p3561_p11)
}
  0x53   :  { %78 = dma.hbm_to_vmem [thread:$0]  %s4401_s5, 6144, %s73_s16, [#allocation8], %s3575_s1, %s3575_s1, %s3576_s28  }
  0x54   :  { %3565 = dma.done.wait [#allocation3], 12288  }
  0x55   :  { %3566 = vsyncadd [#allocation3], 4294955008 }
  0x56   :  { %3567 = dma.done.wait [#allocation5], 24576  }
  0x57   :  { %3568 = vsyncadd [#allocation5], 4294942720 }
  0x58   :  { %3569 = dma.done.wait [#allocation8], 12288  }
  0x59   :  { %3570 = vsyncadd [#allocation8], 4294955008  ;;  %v3295_v0 = vld [vmem:[#allocation7 + $0x40] sm:$0xff]   ;;  %v3297_v2 = vld [vmem:[#allocation7 + $0x48] sm:$0xff]   ;;  %vm2552_vm0 = vcmask 7168  }
  0x5a   :  { %v3296_v1 = vld [vmem:[#allocation7] sm:$0xff]   ;;  %2694 = vmatprep.subr.bf16.mxu0 %v3295_v0  ;;  %3270 = vmatprep.subr.bf16.mxu1 %v3295_v0  ;;  %v3298_v3 = vld [vmem:[#allocation7 + $0x8] sm:$0xff]   ;;  %v3299_v4 = vld [vmem:[#allocation7 + $0x50] sm:$0xff]  }
  0x5b   :  { %2695 = vmatpush3.bf16.msra.mxu0 %v3296_v1  ;;  %3278 = vmatpush3.bf16.msra.mxu1 %v3296_v1  ;;  %v3300_v5 = vld [vmem:[#allocation7 + $0x10] sm:$0xff]   ;;  %v3301_v6 = vld [vmem:[#allocation7 + $0x58] sm:$0xff]   ;;  %v3303_v8 = vld [vmem:[#allocation7 + $0x60] sm:$0xff]  }
  0x5c   :  { %2696 = vmatprep.subr.bf16.mxu0 %v3297_v2  ;;  %3271 = vmatprep.subr.bf16.mxu1 %v3297_v2  ;;  %v3302_v7 = vld [vmem:[#allocation7 + $0x18] sm:$0xff]   ;;  %v3304_v9 = vld [vmem:[#allocation7 + $0x20] sm:$0xff]   ;;  %v3305_v10 = vld [vmem:[#allocation7 + $0x68] sm:$0xff]  }
  0x5d   :  { %v290_v11 = vld [vmem:[#allocation2 + $0x8] sm:$0xff]  ;;  %v296_v12 = vld [vmem:[#allocation2 + $0x38] sm:$0xff]  ;;  %v3307_v18 = vld [vmem:[#allocation7 + $0x70] sm:$0xff]  }
  0x5e   :  { %v338_v13 = vld [vmem:[#allocation2 + $0x188] sm:$0xff]  ;;  %v386_v14 = vpack.c.bf16 %v296_v12, %v290_v11  ;;  %v344_v15 = vld [vmem:[#allocation2 + $0x1b8] sm:$0xff]  ;;  %v3308_v19 = vld [vmem:[#allocation7 + $0x30] sm:$0xff]  }
  0x5f   :  { %2697 = vmatpush3.bf16.msra.mxu0 %v3298_v3  ;;  %3279 = vmatpush3.bf16.msra.mxu1 %v3298_v3  ;;  %v410_v16 = vpack.c.bf16 %v344_v15, %v338_v13  ;;  %v3306_v17 = vld [vmem:[#allocation7 + $0x28] sm:$0xff]   ;;  %v3309_v20 = vld [vmem:[#allocation7 + $0x78] sm:$0xff]   ;;  %v289_v22 = vld [vmem:[#allocation2] sm:$0xff] }
  0x60   :  { %2698 = vmatprep.subr.bf16.mxu0 %v3299_v4  ;;  %3272 = vmatprep.subr.bf16.mxu1 %v3299_v4  ;;  %v3310_v21 = vld [vmem:[#allocation7 + $0x38] sm:$0xff]   ;;  %v295_v23 = vld [vmem:[#allocation2 + $0x30] sm:$0xff]  ;;  %v337_v24 = vld [vmem:[#allocation2 + $0x180] sm:$0xff] }
  0x61   :  { %760 = vmatprep.mubr.bf16.mxu0 %v386_v14  ;;  %792 = vmatprep.mubr.bf16.mxu1 %v410_v16  ;;  %v343_v25 = vld [vmem:[#allocation2 + $0x1b0] sm:$0xff]  ;;  %v3311_v26 = vld [vmem:[#allocation7 + $0xc0] sm:$0xff]   ;;  %v302_v28 = vld [vmem:[#allocation2 + $0x68] sm:$0xff]  ;;  %v385_v33 = vpack.c.bf16 %v295_v23, %v289_v22 }
  0x62   :  { %v3312_v27 = vld [vmem:[#allocation7 + $0x140] sm:$0xff]   ;;  %v308_v29 = vld [vmem:[#allocation2 + $0x98] sm:$0xff]  ;;  %v350_v32 = vld [vmem:[#allocation2 + $0x1e8] sm:$0xff]  ;;  %v409_v34 = vpack.c.bf16 %v343_v25, %v337_v24 }
  0x63   :  { %2699 = vmatpush3.bf16.msra.mxu0 %v3300_v5  ;;  %3280 = vmatpush3.bf16.msra.mxu1 %v3300_v5  ;;  %v3313_v30 = vld [vmem:[#allocation7 + $0x80] sm:$0xff]   ;;  %v356_v35 = vld [vmem:[#allocation2 + $0x218] sm:$0xff]  ;;  %v3315_v36 = vld [vmem:[#allocation7 + $0xc8] sm:$0xff]   ;;  %v392_v40 = vpack.c.bf16 %v308_v29, %v302_v28 }
  0x64   :  { %2700 = vmatprep.subr.bf16.mxu0 %v3301_v6  ;;  %3273 = vmatprep.subr.bf16.mxu1 %v3301_v6  ;;  %v3314_v31 = vld [vmem:[#allocation7 + $0x100] sm:$0xff]   ;;  %v3316_v37 = vld [vmem:[#allocation7 + $0x148] sm:$0xff]   ;;  %v416_v41 = vpack.c.bf16 %v356_v35, %v350_v32  ;;  %v307_v43 = vld [vmem:[#allocation2 + $0x90] sm:$0xff] }
  0x65   :  { %v3317_v38 = vld [vmem:[#allocation7 + $0x88] sm:$0xff]   ;;  %v301_v42 = vld [vmem:[#allocation2 + $0x60] sm:$0xff]  ;;  %v355_v45 = vld [vmem:[#allocation2 + $0x210] sm:$0xff] }
  0x66   :  { %v3318_v39 = vld [vmem:[#allocation7 + $0x108] sm:$0xff]   ;;  %v349_v44 = vld [vmem:[#allocation2 + $0x1e0] sm:$0xff]  ;;  %v3319_v46 = vld [vmem:[#allocation7 + $0xd0] sm:$0xff]   ;;  %v391_v49 = vpack.c.bf16 %v307_v43, %v301_v42 }
  0x67   :  { %2701 = vmatpush3.bf16.msra.mxu0 %v3302_v7  ;;  %3281 = vmatpush3.bf16.msra.mxu1 %v3302_v7  ;;  %v3320_v47 = vld [vmem:[#allocation7 + $0x150] sm:$0xff]   ;;  %v314_v48 = vld [vmem:[#allocation2 + $0xc8] sm:$0xff]  ;;  %v415_v50 = vpack.c.bf16 %v355_v45, %v349_v44  ;;  %v320_v51 = vld [vmem:[#allocation2 + $0xf8] sm:$0xff] }
  0x68   :  { %2702 = vmatprep.subr.bf16.mxu0 %v3303_v8  ;;  %3274 = vmatprep.subr.bf16.mxu1 %v3303_v8  ;;  %v362_v52 = vld [vmem:[#allocation2 + $0x248] sm:$0xff]  ;;  %v368_v53 = vld [vmem:[#allocation2 + $0x278] sm:$0xff]  ;;  %v3321_v54 = vld [vmem:[#allocation7 + $0x90] sm:$0xff]   ;;  %v398_v60 = vpack.c.bf16 %v320_v51, %v314_v48 }
  0x69   :  { %v3322_v55 = vld [vmem:[#allocation7 + $0x110] sm:$0xff]   ;;  %v3323_v56 = vld [vmem:[#allocation7 + $0xd8] sm:$0xff]   ;;  %v422_v61 = vpack.c.bf16 %v368_v53, %v362_v52  ;;  %v313_v62 = vld [vmem:[#allocation2 + $0xc0] sm:$0xff] }
  0x6a   :  { %v3324_v57 = vld [vmem:[#allocation7 + $0x158] sm:$0xff]   ;;  %v319_v63 = vld [vmem:[#allocation2 + $0xf0] sm:$0xff]  ;;  %v361_v0 = vld [vmem:[#allocation2 + $0x240] sm:$0xff] }
  0x6b   :  { %2703 = vmatpush3.bf16.msra.mxu0 %v3304_v9  ;;  %3282 = vmatpush3.bf16.msra.mxu1 %v3304_v9  ;;  %v3325_v58 = vld [vmem:[#allocation7 + $0x98] sm:$0xff]   ;;  %v367_v1 = vld [vmem:[#allocation2 + $0x270] sm:$0xff]  ;;  %v3327_v2 = vld [vmem:[#allocation7 + $0xe0] sm:$0xff]   ;;  %v397_v6 = vpack.c.bf16 %v319_v63, %v313_v62 }
  0x6c   :  { %2704 = vmatprep.subr.bf16.mxu0 %v3305_v10  ;;  %3275 = vmatprep.subr.bf16.mxu1 %v3305_v10  ;;  %v3326_v59 = vld [vmem:[#allocation7 + $0x118] sm:$0xff]   ;;  %v3328_v3 = vld [vmem:[#allocation7 + $0x160] sm:$0xff]   ;;  %v421_v7 = vpack.c.bf16 %v367_v1, %v361_v0  ;;  %v3331_v8 = vld [vmem:[#allocation7 + $0xe8] sm:$0xff]  }
  0x6d   :  { %v3329_v4 = vld [vmem:[#allocation7 + $0xa0] sm:$0xff]   ;;  %v3332_v9 = vld [vmem:[#allocation7 + $0x168] sm:$0xff]   ;;  %v332_v11 = vld [vmem:[#allocation2 + $0x158] sm:$0xff] }
  0x6e   :  { %v3330_v5 = vld [vmem:[#allocation7 + $0x120] sm:$0xff]   ;;  %v326_v10 = vld [vmem:[#allocation2 + $0x128] sm:$0xff]  ;;  %v380_v16 = vld [vmem:[#allocation2 + $0x2d8] sm:$0xff] }
  0x6f   :  { %2705 = vmatpush3.bf16.msra.mxu0 %v3306_v17  ;;  %3283 = vmatpush3.bf16.msra.mxu1 %v3306_v17  ;;  %v374_v12 = vld [vmem:[#allocation2 + $0x2a8] sm:$0xff]  ;;  %v404_v15 = vpack.c.bf16 %v332_v11, %v326_v10  ;;  %v325_v17 = vld [vmem:[#allocation2 + $0x120] sm:$0xff]  ;;  %v3335_v22 = vld [vmem:[#allocation7 + $0xf0] sm:$0xff]  }
  0x70   :  { %2706 = vmatprep.subr.bf16.mxu0 %v3307_v18  ;;  %3276 = vmatprep.subr.bf16.mxu1 %v3307_v18  ;;  %v3333_v13 = vld [vmem:[#allocation7 + $0xa8] sm:$0xff]   ;;  %v331_v18 = vld [vmem:[#allocation2 + $0x150] sm:$0xff]  ;;  %v3339_v28 = vld [vmem:[#allocation7 + $0xf8] sm:$0xff]  }
  0x71   :  { %v3334_v14 = vld [vmem:[#allocation7 + $0x128] sm:$0xff]   ;;  %v3336_v23 = vld [vmem:[#allocation7 + $0x170] sm:$0xff]   ;;  %v403_v25 = vpack.c.bf16 %v331_v18, %v325_v17  ;;  %v3340_v29 = vld [vmem:[#allocation7 + $0x178] sm:$0xff]  }
  0x72   :  { %v3337_v24 = vld [vmem:[#allocation7 + $0xb0] sm:$0xff]   ;;  %v292_v32 = vld [vmem:[#allocation2 + $0x18] sm:$0xff]  ;;  %v3714_v44 = vld [vmem:[#allocation9 + $0x40] sm:$0xff]  }
  0x73   :  { %2707 = vmatpush3.bf16.msra.mxu0 %v3308_v19  ;;  %3284 = vmatpush3.bf16.msra.mxu1 %v3308_v19  ;;  %v428_v19 = vpack.c.bf16 %v380_v16, %v374_v12  ;;  %v300_v35 = vld [vmem:[#allocation2 + $0x58] sm:$0xff]  ;;  %v3716_v45 = vld [vmem:[#allocation9] sm:$0xff]   ;;  %v306_v51 = vld [vmem:[#allocation2 + $0x88] sm:$0xff] }
  0x74   :  { %2708 = vmatprep.subr.bf16.mxu0 %v3309_v20  ;;  %3277 = vmatprep.subr.bf16.mxu1 %v3309_v20  ;;  %v373_v20 = vld [vmem:[#allocation2 + $0x2a0] sm:$0xff]  ;;  %v304_v48 = vld [vmem:[#allocation2 + $0x78] sm:$0xff]  ;;  %v303_v53 = vld [vmem:[#allocation2 + $0x70] sm:$0xff] }
  0x75   :  { %v312_v52 = vld [vmem:[#allocation2 + $0xb8] sm:$0xff]  ;;  %v3731_v62 = vld [vmem:[#allocation9 + $0xc8] sm:$0xff]   ;;  %v3738_v10 = vld [vmem:[#allocation9 + $0x50] sm:$0xff]  }
  0x76   :  { %v3734_v63 = vld [vmem:[#allocation9 + $0x88] sm:$0xff]   ;;  %v316_v0 = vld [vmem:[#allocation2 + $0xd8] sm:$0xff]  ;;  %v3740_v11 = vld [vmem:[#allocation9 + $0x10] sm:$0xff]  }
  0x77   :  { %2709 = vmatpush3.bf16.msra.mxu0 %v3310_v21  ;;  %3285 = vmatpush3.bf16.msra.mxu1 %v3310_v21  ;;  %v379_v21 = vld [vmem:[#allocation2 + $0x2d0] sm:$0xff]  ;;  %v322_v1 = vld [vmem:[#allocation2 + $0x108] sm:$0xff]  ;;  %v328_v16 = vld [vmem:[#allocation2 + $0x138] sm:$0xff] }
  0x78   :  { %2758 = vmatprep.subr.bf16.mxu1 %v3311_v26  ;;  %2822 = vmatprep.subr.bf16.mxu0 %v3312_v27  ;;  %v427_v26 = vpack.c.bf16 %v379_v21, %v373_v20  ;;  %v3338_v27 = vld [vmem:[#allocation7 + $0x130] sm:$0xff]   ;;  %v334_v17 = vld [vmem:[#allocation2 + $0x168] sm:$0xff] }
  0x79   :  { %v3743_v12 = vld [vmem:[#allocation9 + $0xd0] sm:$0xff]   ;;  %v330_v18 = vld [vmem:[#allocation2 + $0x148] sm:$0xff]  ;;  %v406_v20 = vpack.c.bf16 %v334_v17, %v328_v16 }
  0x7a   :  { %761 = vmatmul.mubr.bf16.vlgmr.msra.gmra.mrb[0].mxu0 %v385_v33  ;;  %793 = vmatmul.mubr.bf16.vlgmr.msra.gmra.mrb[0].mxu1 %v409_v34  ;;  %v298_v33 = vld [vmem:[#allocation2 + $0x48] sm:$0xff]  ;;  %v3786_v16 = vld [vmem:[#allocation9 + $0x70] sm:$0xff]  }
  0x7b   :  { %2759 = vmatpush3.bf16.msra.mxu1 %v3313_v30  ;;  %2823 = vmatpush3.bf16.msra.mxu0 %v3314_v31  ;;  %v3341_v30 = vld [vmem:[#allocation7 + $0xb8] sm:$0xff]   ;;  %v294_v34 = vld [vmem:[#allocation2 + $0x28] sm:$0xff] }
  0x7c   :  { %2760 = vmatprep.subr.bf16.mxu1 %v3315_v36  ;;  %2824 = vmatprep.subr.bf16.mxu0 %v3316_v37  ;;  %v3342_v31 = vld [vmem:[#allocation7 + $0x138] sm:$0xff]   ;;  %v388_v36 = vpack.c.bf16 %v298_v33, %v292_v32  ;;  %v390_v37 = vpack.c.bf16 %v300_v35, %v294_v34  ;;  %v342_v34 = vld [vmem:[#allocation2 + $0x1a8] sm:$0xff] }
  0x7d   :  { %768 = vmatprep.mubr.bf16.mxu0 %v392_v40  ;;  %800 = vmatprep.mubr.bf16.mxu1 %v416_v41  ;;  %v293_v40 = vld [vmem:[#allocation2 + $0x20] sm:$0xff]  ;;  %v299_v41 = vld [vmem:[#allocation2 + $0x50] sm:$0xff]  ;;  %v348_v35 = vld [vmem:[#allocation2 + $0x1d8] sm:$0xff] }
  0x7e   :  { %v389_v43 = vpack.c.bf16 %v299_v41, %v293_v40  ;;  %v345_v40 = vld [vmem:[#allocation2 + $0x1c0] sm:$0xff] }
  0x7f   :  { %2761 = vmatpush3.bf16.msra.mxu1 %v3317_v38  ;;  %2825 = vmatpush3.bf16.msra.mxu0 %v3318_v39  ;;  %v291_v38 = vld [vmem:[#allocation2 + $0x10] sm:$0xff]  ;;  %v297_v39 = vld [vmem:[#allocation2 + $0x40] sm:$0xff] }
  0x80   :  { %2762 = vmatprep.subr.bf16.mxu1 %v3319_v46  ;;  %2826 = vmatprep.subr.bf16.mxu0 %v3320_v47  ;;  %v387_v42 = vpack.c.bf16 %v297_v39, %v291_v38  ;;  %v3719_v46 = vld [vmem:[#allocation9 + $0xc0] sm:$0xff]   ;;  %v339_v39 = vld [vmem:[#allocation2 + $0x190] sm:$0xff] }
  0x81   :  { %v3721_v47 = vld [vmem:[#allocation9 + $0x80] sm:$0xff]  }
  0x82   :  { %769 = vmatmul.mubr.bf16.gmra.mrb[4].mxu0 %v391_v49  ;;  %801 = vmatmul.mubr.bf16.gmra.mrb[4].mxu1 %v415_v50  ;;  %v310_v49 = vld [vmem:[#allocation2 + $0xa8] sm:$0xff]  ;;  %v3762_v38 = vld [vmem:[#allocation9 + $0x60] sm:$0xff]  }
  0x83   :  { %2763 = vmatpush3.bf16.msra.mxu1 %v3321_v54  ;;  %2827 = vmatpush3.bf16.msra.mxu0 %v3322_v55  ;;  %v394_v50 = vpack.c.bf16 %v310_v49, %v304_v48  ;;  %v396_v54 = vpack.c.bf16 %v312_v52, %v306_v51  ;;  %v309_v55 = vld [vmem:[#allocation2 + $0xa0] sm:$0xff]  ;;  %v358_v51 = vld [vmem:[#allocation2 + $0x228] sm:$0xff] }
  0x84   :  { %2764 = vmatprep.subr.bf16.mxu1 %v3323_v56  ;;  %2828 = vmatprep.subr.bf16.mxu0 %v3324_v57  ;;  %v305_v56 = vld [vmem:[#allocation2 + $0x80] sm:$0xff]  ;;  %v311_v57 = vld [vmem:[#allocation2 + $0xb0] sm:$0xff]  ;;  %v354_v52 = vld [vmem:[#allocation2 + $0x208] sm:$0xff] }
  0x85   :  { %776 = vmatprep.mubr.bf16.mxu0 %v398_v60  ;;  %808 = vmatprep.mubr.bf16.mxu1 %v422_v61  ;;  %v393_v60 = vpack.c.bf16 %v309_v55, %v303_v53  ;;  %v395_v61 = vpack.c.bf16 %v311_v57, %v305_v56  ;;  %v341_v41 = vld [vmem:[#allocation2 + $0x1a0] sm:$0xff]  ;;  %v360_v53 = vld [vmem:[#allocation2 + $0x238] sm:$0xff] }
  0x86   :  { %v3766_v48 = vld [vmem:[#allocation9 + $0xe0] sm:$0xff]   ;;  %v420_v57 = vpack.c.bf16 %v360_v53, %v354_v52  ;;  %v383_v53 = vld [vmem:[#allocation2 + $0x2f0] sm:$0xff] }
  0x87   :  { %2765 = vmatpush3.bf16.msra.mxu1 %v3325_v58  ;;  %2829 = vmatpush3.bf16.msra.mxu0 %v3326_v59  ;;  %v3726_v58 = vld [vmem:[#allocation9 + $0x48] sm:$0xff]   ;;  %v3768_v49 = vld [vmem:[#allocation9 + $0xa0] sm:$0xff]  }
  0x88   :  { %2766 = vmatprep.subr.bf16.mxu1 %v3327_v2  ;;  %2830 = vmatprep.subr.bf16.mxu0 %v3328_v3  ;;  %v3728_v59 = vld [vmem:[#allocation9 + $0x8] sm:$0xff]   ;;  %v400_v3 = vpack.c.bf16 %v322_v1, %v316_v0  ;;  %v351_v0 = vld [vmem:[#allocation2 + $0x1f0] sm:$0xff]  ;;  %v377_v52 = vld [vmem:[#allocation2 + $0x2c0] sm:$0xff] }
  0x89   :  { %v318_v2 = vld [vmem:[#allocation2 + $0xe8] sm:$0xff] }
  0x8a   :  { %777 = vmatmul.mubr.bf16.gmra.mrb[8].mxu0 %v397_v6  ;;  %809 = vmatmul.mubr.bf16.gmra.mrb[8].mxu1 %v421_v7  ;;  %v321_v6 = vld [vmem:[#allocation2 + $0x100] sm:$0xff]  ;;  %v3779_v1 = vld [vmem:[#allocation9 + $0xe8] sm:$0xff]  }
  0x8b   :  { %2767 = vmatpush3.bf16.msra.mxu1 %v3329_v4  ;;  %2831 = vmatpush3.bf16.msra.mxu0 %v3330_v5  ;;  %v324_v4 = vld [vmem:[#allocation2 + $0x118] sm:$0xff]  ;;  %v315_v5 = vld [vmem:[#allocation2 + $0xd0] sm:$0xff] }
  0x8c   :  { %2768 = vmatprep.subr.bf16.mxu1 %v3331_v8  ;;  %2832 = vmatprep.subr.bf16.mxu0 %v3332_v9  ;;  %v402_v7 = vpack.c.bf16 %v324_v4, %v318_v2  ;;  %v317_v8 = vld [vmem:[#allocation2 + $0xe0] sm:$0xff]  ;;  %v323_v9 = vld [vmem:[#allocation2 + $0x110] sm:$0xff] }
  0x8d   :  { %784 = vmatprep.mubr.bf16.mxu0 %v404_v15  ;;  %816 = vmatprep.mubr.bf16.mxu1 %v428_v19  ;;  %v3746_v15 = vld [vmem:[#allocation9 + $0x90] sm:$0xff]   ;;  %v336_v19 = vld [vmem:[#allocation2 + $0x178] sm:$0xff]  ;;  %v357_v2 = vld [vmem:[#allocation2 + $0x220] sm:$0xff] }
  0x8e   :  { %v408_v21 = vpack.c.bf16 %v336_v19, %v330_v18  ;;  %v353_v4 = vld [vmem:[#allocation2 + $0x200] sm:$0xff]  ;;  %v3788_v19 = vld [vmem:[#allocation9 + $0x30] sm:$0xff]  }
  0x8f   :  { %2769 = vmatpush3.bf16.msra.mxu1 %v3333_v13  ;;  %2833 = vmatpush3.bf16.msra.mxu0 %v3334_v14  ;;  %v399_v13 = vpack.c.bf16 %v321_v6, %v315_v5  ;;  %v401_v14 = vpack.c.bf16 %v323_v9, %v317_v8  ;;  %v359_v5 = vld [vmem:[#allocation2 + $0x230] sm:$0xff]  ;;  %v364_v6 = vld [vmem:[#allocation2 + $0x258] sm:$0xff]  ;;  %v366_v8 = vld [vmem:[#allocation2 + $0x268] sm:$0xff] }
  0x90   :  { %2770 = vmatprep.subr.bf16.mxu1 %v3335_v22  ;;  %2834 = vmatprep.subr.bf16.mxu0 %v3336_v23  ;;  %v327_v22 = vld [vmem:[#allocation2 + $0x130] sm:$0xff]  ;;  %v333_v23 = vld [vmem:[#allocation2 + $0x160] sm:$0xff]  ;;  %v372_v9 = vld [vmem:[#allocation2 + $0x298] sm:$0xff] }
  0x91   :  { %v405_v32 = vpack.c.bf16 %v333_v23, %v327_v22  ;;  %v426_v18 = vpack.c.bf16 %v372_v9, %v366_v8  ;;  %v369_v22 = vld [vmem:[#allocation2 + $0x280] sm:$0xff]  ;;  %v3794_v23 = vld [vmem:[#allocation9 + $0xb0] sm:$0xff]  }
  0x92   :  { %785 = vmatmul.mubr.bf16.gmra.mrb[12].mxu0 %v403_v25  ;;  %817 = vmatmul.mubr.bf16.gmra.mrb[12].mxu1 %v427_v26  ;;  %v335_v25 = vld [vmem:[#allocation2 + $0x170] sm:$0xff]  ;;  %v3750_v26 = vld [vmem:[#allocation9 + $0x58] sm:$0xff]  }
  0x93   :  { %2771 = vmatpush3.bf16.msra.mxu1 %v3337_v24  ;;  %2835 = vmatpush3.bf16.msra.mxu0 %v3338_v27  ;;  %v329_v24 = vld [vmem:[#allocation2 + $0x140] sm:$0xff]  ;;  %v3752_v27 = vld [vmem:[#allocation9 + $0x18] sm:$0xff]   ;;  %v1025_v8 = vld [vmem:[#allocation4 + $0x30] sm:$0xff] }
  0x94   :  { %2772 = vmatprep.subr.bf16.mxu1 %v3339_v28  ;;  %2836 = vmatprep.subr.bf16.mxu0 %v3340_v29  ;;  %v3755_v28 = vld [vmem:[#allocation9 + $0xd8] sm:$0xff]   ;;  %v407_v33 = vpack.c.bf16 %v335_v25, %v329_v24  ;;  %v365_v24 = vld [vmem:[#allocation2 + $0x260] sm:$0xff]  ;;  %v371_v25 = vld [vmem:[#allocation2 + $0x290] sm:$0xff] }
  0x95   :  { %857 = vmatprep.mubr.bf16.mxu1 %v388_v36  ;;  %954 = vmatprep.mubr.bf16.mxu0 %v390_v37  ;;  %v3758_v29 = vld [vmem:[#allocation9 + $0x98] sm:$0xff]   ;;  %v414_v37 = vpack.c.bf16 %v348_v35, %v342_v34  ;;  %v1021_v9 = vld [vmem:[#allocation4 + $0x10] sm:$0xff] }
  0x96   :  { %v3797_v34 = vld [vmem:[#allocation9 + $0x78] sm:$0xff]  }
  0x97   :  { %2773 = vmatpush3.bf16.msra.mxu1 %v3341_v30  ;;  %2837 = vmatpush3.bf16.msra.mxu0 %v3342_v31  ;;  %v340_v30 = vld [vmem:[#allocation2 + $0x198] sm:$0xff]  ;;  %v346_v31 = vld [vmem:[#allocation2 + $0x1c8] sm:$0xff] }
  0x98   :  { %2886 = vmatprep.subr.bf16.mxu1 %v3714_v44  ;;  %2950 = vmatprep.subr.bf16.mxu0 %v3719_v46  ;;  %v412_v36 = vpack.c.bf16 %v346_v31, %v340_v30  ;;  %v376_v30 = vld [vmem:[#allocation2 + $0x2b8] sm:$0xff]  ;;  %v382_v31 = vld [vmem:[#allocation2 + $0x2e8] sm:$0xff] }
  0x99   :  { %v3800_v35 = vld [vmem:[#allocation9 + $0x38] sm:$0xff]  }
  0x9a   :  { %858 = vmatmul.mubr.bf16.vlgmr.msra.gmra.mrb[16].mxu1 %v387_v42  ;;  %955 = vmatmul.mubr.bf16.vlgmr.msra.gmra.mrb[16].mxu0 %v389_v43  ;;  %v347_v42 = vld [vmem:[#allocation2 + $0x1d0] sm:$0xff]  ;;  %v3764_v43 = vld [vmem:[#allocation9 + $0x20] sm:$0xff]  }
  0x9b   :  { %2887 = vmatpush3.bf16.msra.mxu1 %v3716_v45  ;;  %2951 = vmatpush3.bf16.msra.mxu0 %v3721_v47  ;;  %v413_v55 = vpack.c.bf16 %v347_v42, %v341_v41  ;;  %v3806_v42 = vld [vmem:[#allocation9 + $0xb8] sm:$0xff]  }
  0x9c   :  { %865 = vmatprep.mubr.bf16.mxu1 %v394_v50  ;;  %962 = vmatprep.mubr.bf16.mxu0 %v396_v54  ;;  %v352_v50 = vld [vmem:[#allocation2 + $0x1f8] sm:$0xff]  ;;  %v411_v54 = vpack.c.bf16 %v345_v40, %v339_v39  ;;  %v430_v40 = vpack.c.bf16 %v382_v31, %v376_v30  ;;  %v1031_v31 = vld [vmem:[#allocation4 + $0x60] sm:$0xff] }
  0x9d   :  { %2888 = vmatprep.subr.bf16.mxu1 %v3726_v58  ;;  %2952 = vmatprep.subr.bf16.mxu0 %v3731_v62  ;;  %v418_v56 = vpack.c.bf16 %v358_v51, %v352_v50  ;;  %v3803_v39 = vld [vmem:[#allocation9 + $0xf8] sm:$0xff]   ;;  %v375_v50 = vld [vmem:[#allocation2 + $0x2b0] sm:$0xff]  ;;  %v381_v51 = vld [vmem:[#allocation2 + $0x2e0] sm:$0xff] }
  0x9f   :  { %2889 = vmatpush3.bf16.msra.mxu1 %v3728_v59  ;;  %2953 = vmatpush3.bf16.msra.mxu0 %v3734_v63 }
  0xa0   :  { %2890 = vmatprep.subr.bf16.mxu1 %v3738_v10  ;;  %2954 = vmatprep.subr.bf16.mxu0 %v3743_v12 }
  0xa2   :  { %866 = vmatmul.mubr.bf16.gmra.mrb[20].mxu1 %v393_v60  ;;  %963 = vmatmul.mubr.bf16.gmra.mrb[20].mxu0 %v395_v61  ;;  %v3774_v60 = vld [vmem:[#allocation9 + $0x68] sm:$0xff]  }
  0xa3   :  { %873 = vmatprep.mubr.bf16.mxu1 %v400_v3  ;;  %970 = vmatprep.mubr.bf16.mxu0 %v402_v7  ;;  %v3776_v61 = vld [vmem:[#allocation9 + $0x28] sm:$0xff]  }
  0xa4   :  { %2891 = vmatpush3.bf16.msra.mxu1 %v3740_v11  ;;  %2955 = vmatpush3.bf16.msra.mxu0 %v3746_v15  ;;  %v3781_v3 = vld [vmem:[#allocation9 + $0xa8] sm:$0xff]  }
  0xa5   :  { %2892 = vmatprep.subr.bf16.mxu1 %v3750_v26  ;;  %2956 = vmatprep.subr.bf16.mxu0 %v3755_v28  ;;  %v370_v7 = vld [vmem:[#allocation2 + $0x288] sm:$0xff] }
  0xa6   :  { %v424_v17 = vpack.c.bf16 %v370_v7, %v364_v6  ;;  %v1019_v7 = vld [vmem:[#allocation4] sm:$0xff] }
  0xa8   :  { %2893 = vmatpush3.bf16.msra.mxu1 %v3752_v27  ;;  %2957 = vmatpush3.bf16.msra.mxu0 %v3758_v29 }
  0xa9   :  { %2894 = vmatprep.subr.bf16.mxu1 %v3762_v38  ;;  %2958 = vmatprep.subr.bf16.mxu0 %v3766_v48 }
  0xaa   :  { %874 = vmatmul.mubr.bf16.gmra.mrb[24].mxu1 %v399_v13  ;;  %971 = vmatmul.mubr.bf16.gmra.mrb[24].mxu0 %v401_v14  ;;  %v417_v13 = vpack.c.bf16 %v357_v2, %v351_v0  ;;  %v419_v14 = vpack.c.bf16 %v359_v5, %v353_v4  ;;  %v1028_v0 = vld [vmem:[#allocation4 + $0x48] sm:$0xff]  ;;  %v429_v2 = vpack.c.bf16 %v381_v51, %v375_v50  ;;  %v1050_v50 = vld [vmem:[#allocation4 + $0xf8] sm:$0xff] }
  0xab   :  { %881 = vmatprep.mubr.bf16.mxu1 %v406_v20  ;;  %978 = vmatprep.mubr.bf16.mxu0 %v408_v21  ;;  %v3791_v20 = vld [vmem:[#allocation9 + $0xf0] sm:$0xff]   ;;  %v431_v4 = vpack.c.bf16 %v383_v53, %v377_v52  ;;  %v1046_v51 = vld [vmem:[#allocation4 + $0xd8] sm:$0xff]  ;;  %v1052_v52 = vld [vmem:[#allocation4 + $0x108] sm:$0xff] }
  0xac   :  { %2895 = vmatpush3.bf16.msra.mxu1 %v3764_v43  ;;  %2959 = vmatpush3.bf16.msra.mxu0 %v3768_v49  ;;  %v363_v21 = vld [vmem:[#allocation2 + $0x250] sm:$0xff] }
  0xad   :  { %2896 = vmatprep.subr.bf16.mxu1 %v3774_v60  ;;  %2960 = vmatprep.subr.bf16.mxu0 %v3779_v1  ;;  %v3822_v53 = vld [vmem:[#allocation9 + $0x150] sm:$0xff]  }
  0xb0   :  { %2897 = vmatpush3.bf16.msra.mxu1 %v3776_v61  ;;  %2961 = vmatpush3.bf16.msra.mxu0 %v3781_v3 }
  0xb1   :  { %2898 = vmatprep.subr.bf16.mxu1 %v3786_v16  ;;  %2962 = vmatprep.subr.bf16.mxu0 %v3791_v20 }
  0xb2   :  { %882 = vmatmul.mubr.bf16.gmra.mrb[28].mxu1 %v405_v32  ;;  %979 = vmatmul.mubr.bf16.gmra.mrb[28].mxu0 %v407_v33  ;;  %v378_v32 = vld [vmem:[#allocation2 + $0x2c8] sm:$0xff]  ;;  %v384_v33 = vld [vmem:[#allocation2 + $0x2f8] sm:$0xff] }
  0xb3   :  { %889 = vmatprep.mubr.bf16.mxu1 %v412_v36  ;;  %986 = vmatprep.mubr.bf16.mxu0 %v414_v37  ;;  %v423_v36 = vpack.c.bf16 %v369_v22, %v363_v21  ;;  %v425_v37 = vpack.c.bf16 %v371_v25, %v365_v24  ;;  %v432_v41 = vpack.c.bf16 %v384_v33, %v378_v32  ;;  %v1040_v21 = vld [vmem:[#allocation4 + $0xa8] sm:$0xff]  ;;  %v3814_v24 = vld [vmem:[#allocation9 + $0x100] sm:$0xff]   ;;  %v1037_v32 = vld [vmem:[#allocation4 + $0x90] sm:$0xff] }
  0xb4   :  { %2899 = vmatpush3.bf16.msra.mxu1 %v3788_v19  ;;  %2963 = vmatpush3.bf16.msra.mxu0 %v3794_v23  ;;  %v1115_v22 = vpack.c.bf16 %v1025_v8, %v1019_v7  ;;  %v3816_v33 = vld [vmem:[#allocation9 + $0x148] sm:$0xff]   ;;  %v3832_v7 = vld [vmem:[#allocation9 + $0x158] sm:$0xff]  }
  0xb5   :  { %2900 = vmatprep.subr.bf16.mxu1 %v3797_v34  ;;  %2964 = vmatprep.subr.bf16.mxu0 %v3803_v39  ;;  %v1058_v8 = vld [vmem:[#allocation4 + $0x138] sm:$0xff] }
  0xb8   :  { %2901 = vmatpush3.bf16.msra.mxu1 %v3800_v35  ;;  %2965 = vmatpush3.bf16.msra.mxu0 %v3806_v42 }
  0xb9   :  { %3078 = vmatprep.subr.bf16.mxu0 %v3714_v44 }
  0xba   :  { %890 = vmatmul.mubr.bf16.gmra.mrb[32].mxu1 %v411_v54  ;;  %987 = vmatmul.mubr.bf16.gmra.mrb[32].mxu0 %v413_v55  ;;  %v1020_v54 = vld [vmem:[#allocation4 + $0x8] sm:$0xff]  ;;  %v1026_v55 = vld [vmem:[#allocation4 + $0x38] sm:$0xff] }
  0xbb   :  { %897 = vmatprep.mubr.bf16.mxu1 %v418_v56  ;;  %994 = vmatprep.mubr.bf16.mxu0 %v420_v57  ;;  %v3810_v56 = vld [vmem:[#allocation9 + $0x140] sm:$0xff]   ;;  %v1022_v57 = vld [vmem:[#allocation4 + $0x18] sm:$0xff]  ;;  %v1116_v5 = vpack.c.bf16 %v1026_v55, %v1020_v54  ;;  %v1121_v54 = vpack.c.bf16 %v1037_v32, %v1031_v31  ;;  %v1068_v31 = vld [vmem:[#allocation4 + $0x188] sm:$0xff] }
  0xbc   :  { %3014 = vmatprep.subr.bf16.mxu1 %v3810_v56  ;;  %v1118_v6 = vpack.c.bf16 %v1028_v0, %v1022_v57  ;;  %v1130_v57 = vpack.c.bf16 %v1052_v52, %v1046_v51  ;;  %v3829_v0 = vld [vmem:[#allocation9 + $0x110] sm:$0xff]   ;;  %v1074_v32 = vld [vmem:[#allocation4 + $0x1b8] sm:$0xff] }
  0xbd   :  { %v1140_v51 = vpack.c.bf16 %v1074_v32, %v1068_v31  ;;  %v1093_v31 = vld [vmem:[#allocation4 + $0x250] sm:$0xff]  ;;  %v1099_v32 = vld [vmem:[#allocation4 + $0x280] sm:$0xff] }
  0xc2   :  { %898 = vmatmul.mubr.bf16.gmra.mrb[36].mxu1 %v417_v13  ;;  %995 = vmatmul.mubr.bf16.gmra.mrb[36].mxu0 %v419_v14  ;;  %v1027_v13 = vld [vmem:[#allocation4 + $0x40] sm:$0xff]  ;;  %v1032_v14 = vld [vmem:[#allocation4 + $0x68] sm:$0xff] }
  0xc3   :  { %905 = vmatprep.mubr.bf16.mxu1 %v424_v17  ;;  %1002 = vmatprep.mubr.bf16.mxu0 %v426_v18  ;;  %v1038_v17 = vld [vmem:[#allocation4 + $0x98] sm:$0xff]  ;;  %v1117_v44 = vpack.c.bf16 %v1027_v13, %v1021_v9  ;;  %v1064_v9 = vld [vmem:[#allocation4 + $0x168] sm:$0xff] }
  0xc4   :  { %v1034_v18 = vld [vmem:[#allocation4 + $0x78] sm:$0xff]  ;;  %v1122_v25 = vpack.c.bf16 %v1038_v17, %v1032_v14 }
  0xc5   :  { %v1124_v30 = vpack.c.bf16 %v1040_v21, %v1034_v18  ;;  %v3836_v13 = vld [vmem:[#allocation9 + $0x118] sm:$0xff]   ;;  %v1136_v21 = vpack.c.bf16 %v1064_v9, %v1058_v8  ;;  %v1085_v9 = vld [vmem:[#allocation4 + $0x210] sm:$0xff] }
  0xca   :  { %906 = vmatmul.mubr.bf16.gmra.mrb[40].mxu1 %v423_v36  ;;  %1003 = vmatmul.mubr.bf16.gmra.mrb[40].mxu0 %v425_v37  ;;  %v1033_v36 = vld [vmem:[#allocation4 + $0x70] sm:$0xff]  ;;  %v1039_v37 = vld [vmem:[#allocation4 + $0xa0] sm:$0xff] }
  0xcb   :  { %913 = vmatprep.mubr.bf16.mxu1 %v430_v40  ;;  %1010 = vmatprep.mubr.bf16.mxu0 %v432_v41  ;;  %v3820_v40 = vld [vmem:[#allocation9 + $0x108] sm:$0xff]   ;;  %v1123_v55 = vpack.c.bf16 %v1039_v37, %v1033_v36  ;;  %v1070_v36 = vld [vmem:[#allocation4 + $0x198] sm:$0xff] }
  0xcc   :  { %v1044_v41 = vld [vmem:[#allocation4 + $0xc8] sm:$0xff] }
  0xcd   :  { %v3852_v37 = vld [vmem:[#allocation9 + $0x128] sm:$0xff]  }
  0xd2   :  { %914 = vmatmul.mubr.bf16.gmra.mrb[44].mxu1 %v429_v2  ;;  %1011 = vmatmul.mubr.bf16.gmra.mrb[44].mxu0 %v431_v4  ;;  %v1043_v2 = vld [vmem:[#allocation4 + $0xc0] sm:$0xff]  ;;  %v1049_v4 = vld [vmem:[#allocation4 + $0xf0] sm:$0xff] }
  0xd3   :  { %1490 = vmatprep.mubr.bf16.mxu1 %v1116_v5  ;;  %1587 = vmatprep.mubr.bf16.mxu0 %v1118_v6  ;;  %v1045_v5 = vld [vmem:[#allocation4 + $0xd0] sm:$0xff]  ;;  %v1051_v6 = vld [vmem:[#allocation4 + $0x100] sm:$0xff]  ;;  %v1127_v14 = vpack.c.bf16 %v1049_v4, %v1043_v2  ;;  %v1080_v2 = vld [vmem:[#allocation4 + $0x1e8] sm:$0xff] }
  0xd4   :  { %v1129_v17 = vpack.c.bf16 %v1051_v6, %v1045_v5  ;;  %v1086_v4 = vld [vmem:[#allocation4 + $0x218] sm:$0xff] }
  0xd5   :  { %v1082_v5 = vld [vmem:[#allocation4 + $0x1f8] sm:$0xff] }
  0xd6   :  { %v3868_v6 = vld [vmem:[#allocation9 + $0x138] sm:$0xff]  }
  0xda   :  { %1491 = vmatmul.mubr.bf16.vlgmr.msra.gmra.mrb[48].mxu1 %v1115_v22  ;;  %1588 = vmatmul.mubr.bf16.vlgmr.msra.gmra.mrb[48].mxu0 %v1117_v44  ;;  %v3844_v22 = vld [vmem:[#allocation9 + $0x120] sm:$0xff]   ;;  %v1061_v44 = vld [vmem:[#allocation4 + $0x150] sm:$0xff] }
  0xdb   :  { %3015 = vmatpush3.bf16.msra.mxu1 %v3814_v24  ;;  %3079 = vmatpush3.bf16.msra.mxu0 %v3716_v45  ;;  %v1128_v45 = vpack.c.bf16 %v1050_v50, %v1044_v41 }
  0xdc   :  { %1498 = vmatprep.mubr.bf16.mxu1 %v1122_v25  ;;  %1595 = vmatprep.mubr.bf16.mxu0 %v1124_v30  ;;  %v1057_v25 = vld [vmem:[#allocation4 + $0x130] sm:$0xff]  ;;  %v1063_v30 = vld [vmem:[#allocation4 + $0x160] sm:$0xff] }
  0xdd   :  { %3016 = vmatprep.subr.bf16.mxu1 %v3816_v33  ;;  %3080 = vmatprep.subr.bf16.mxu0 %v3726_v58  ;;  %v1056_v58 = vld [vmem:[#allocation4 + $0x128] sm:$0xff]  ;;  %v1135_v50 = vpack.c.bf16 %v1063_v30, %v1057_v25 }
  0xdf   :  { %3017 = vmatpush3.bf16.msra.mxu1 %v3820_v40  ;;  %3081 = vmatpush3.bf16.msra.mxu0 %v3728_v59  ;;  %v1062_v59 = vld [vmem:[#allocation4 + $0x158] sm:$0xff] }
  0xe0   :  { %3018 = vmatprep.subr.bf16.mxu1 %v3822_v53  ;;  %3082 = vmatprep.subr.bf16.mxu0 %v3738_v10  ;;  %v3840_v10 = vld [vmem:[#allocation9 + $0x160] sm:$0xff]   ;;  %v1134_v18 = vpack.c.bf16 %v1062_v59, %v1056_v58  ;;  %v1146_v59 = vpack.c.bf16 %v1086_v4, %v1080_v2  ;;  %v1105_v2 = vld [vmem:[#allocation4 + $0x2b0] sm:$0xff] }
  0xe1   :  { %v1111_v4 = vld [vmem:[#allocation4 + $0x2e0] sm:$0xff] }
  0xe2   :  { %1499 = vmatmul.mubr.bf16.gmra.mrb[52].mxu1 %v1121_v54  ;;  %1596 = vmatmul.mubr.bf16.gmra.mrb[52].mxu0 %v1123_v55  ;;  %v3860_v54 = vld [vmem:[#allocation9 + $0x130] sm:$0xff]  }
  0xe3   :  { %1506 = vmatprep.mubr.bf16.mxu1 %v1128_v45  ;;  %1603 = vmatprep.mubr.bf16.mxu0 %v1130_v57  ;;  %v1073_v55 = vld [vmem:[#allocation4 + $0x1b0] sm:$0xff]  ;;  %v1075_v57 = vld [vmem:[#allocation4 + $0x1c0] sm:$0xff] }
  0xe4   :  { %3019 = vmatpush3.bf16.msra.mxu1 %v3829_v0  ;;  %3083 = vmatpush3.bf16.msra.mxu0 %v3740_v11  ;;  %v1055_v11 = vld [vmem:[#allocation4 + $0x120] sm:$0xff]  ;;  %v1069_v45 = vld [vmem:[#allocation4 + $0x190] sm:$0xff] }
  0xe5   :  { %3020 = vmatprep.subr.bf16.mxu1 %v3832_v7  ;;  %3084 = vmatprep.subr.bf16.mxu0 %v3750_v26  ;;  %v3848_v26 = vld [vmem:[#allocation9 + $0x168] sm:$0xff]   ;;  %v1133_v41 = vpack.c.bf16 %v1061_v44, %v1055_v11  ;;  %v1141_v58 = vpack.c.bf16 %v1075_v57, %v1069_v45  ;;  %v1103_v45 = vld [vmem:[#allocation4 + $0x2a0] sm:$0xff]  ;;  %v1109_v57 = vld [vmem:[#allocation4 + $0x2d0] sm:$0xff] }
  0xe6   :  { %v1100_v11 = vld [vmem:[#allocation4 + $0x288] sm:$0xff] }
  0xe8   :  { %3021 = vmatpush3.bf16.msra.mxu1 %v3836_v13  ;;  %3085 = vmatpush3.bf16.msra.mxu0 %v3752_v27  ;;  %v1076_v27 = vld [vmem:[#allocation4 + $0x1c8] sm:$0xff] }
  0xe9   :  { %3022 = vmatprep.subr.bf16.mxu1 %v3840_v10  ;;  %3086 = vmatprep.subr.bf16.mxu0 %v3762_v38  ;;  %v3856_v38 = vld [vmem:[#allocation9 + $0x170] sm:$0xff]   ;;  %v1142_v52 = vpack.c.bf16 %v1076_v27, %v1070_v36  ;;  %v1104_v36 = vld [vmem:[#allocation4 + $0x2a8] sm:$0xff]  ;;  %v1110_v27 = vld [vmem:[#allocation4 + $0x2d8] sm:$0xff] }
  0xea   :  { %1507 = vmatmul.mubr.bf16.gmra.mrb[56].mxu1 %v1127_v14  ;;  %1604 = vmatmul.mubr.bf16.gmra.mrb[56].mxu0 %v1129_v17  ;;  %v1081_v14 = vld [vmem:[#allocation4 + $0x1f0] sm:$0xff]  ;;  %v1092_v17 = vld [vmem:[#allocation4 + $0x248] sm:$0xff] }
  0xeb   :  { %1514 = vmatprep.mubr.bf16.mxu1 %v1134_v18  ;;  %1611 = vmatprep.mubr.bf16.mxu0 %v1136_v21  ;;  %v1098_v18 = vld [vmem:[#allocation4 + $0x278] sm:$0xff] }
  0xec   :  { %3023 = vmatpush3.bf16.msra.mxu1 %v3844_v22  ;;  %3087 = vmatpush3.bf16.msra.mxu0 %v3764_v43  ;;  %v3864_v43 = vld [vmem:[#allocation9 + $0x178] sm:$0xff]   ;;  %v1152_v30 = vpack.c.bf16 %v1098_v18, %v1092_v17  ;;  %v1749_v17 = vld [vmem:[#allocation6] sm:$0xff]  ;;  %v1755_v18 = vld [vmem:[#allocation6 + $0x30] sm:$0xff] }
  0xed   :  { %3024 = vmatprep.subr.bf16.mxu1 %v3848_v26  ;;  %3088 = vmatprep.subr.bf16.mxu0 %v3774_v60  ;;  %v1067_v60 = vld [vmem:[#allocation4 + $0x180] sm:$0xff]  ;;  %v1094_v21 = vld [vmem:[#allocation4 + $0x258] sm:$0xff] }
  0xf0   :  { %3025 = vmatpush3.bf16.msra.mxu1 %v3852_v37  ;;  %3089 = vmatpush3.bf16.msra.mxu0 %v3776_v61  ;;  %v1088_v61 = vld [vmem:[#allocation4 + $0x228] sm:$0xff] }
  0xf1   :  { %3026 = vmatprep.subr.bf16.mxu1 %v3856_v38  ;;  %3090 = vmatprep.subr.bf16.mxu0 %v3786_v16  ;;  %v1139_v16 = vpack.c.bf16 %v1073_v55, %v1067_v60  ;;  %v1148_v8 = vpack.c.bf16 %v1088_v61, %v1082_v5  ;;  %v1158_v60 = vpack.c.bf16 %v1110_v27, %v1104_v36  ;;  %v1024_v5 = vld [vmem:[#allocation4 + $0x28] sm:$0xff]  ;;  %v1030_v61 = vld [vmem:[#allocation4 + $0x58] sm:$0xff]  ;;  %v1761_v36 = vld [vmem:[#allocation6 + $0x60] sm:$0xff] }
  0xf2   :  { %1515 = vmatmul.mubr.bf16.gmra.mrb[60].mxu1 %v1133_v41  ;;  %1612 = vmatmul.mubr.bf16.gmra.mrb[60].mxu0 %v1135_v50  ;;  %v1106_v41 = vld [vmem:[#allocation4 + $0x2b8] sm:$0xff]  ;;  %v1112_v50 = vld [vmem:[#allocation4 + $0x2e8] sm:$0xff]  ;;  %v1767_v27 = vld [vmem:[#allocation6 + $0x90] sm:$0xff] }
  0xf3   :  { %1522 = vmatprep.mubr.bf16.mxu1 %v1140_v51  ;;  %1619 = vmatprep.mubr.bf16.mxu0 %v1142_v52  ;;  %v1153_v52 = vpack.c.bf16 %v1099_v32, %v1093_v31  ;;  %v1160_v55 = vpack.c.bf16 %v1112_v50, %v1106_v41  ;;  %v1035_v31 = vld [vmem:[#allocation4 + $0x80] sm:$0xff]  ;;  %v1041_v32 = vld [vmem:[#allocation4 + $0xb0] sm:$0xff]  ;;  %v1048_v41 = vld [vmem:[#allocation4 + $0xe8] sm:$0xff] }
  0xf4   :  { %3027 = vmatpush3.bf16.msra.mxu1 %v3860_v54  ;;  %3091 = vmatpush3.bf16.msra.mxu0 %v3788_v19  ;;  %v1079_v19 = vld [vmem:[#allocation4 + $0x1e0] sm:$0xff]  ;;  %v1054_v50 = vld [vmem:[#allocation4 + $0x118] sm:$0xff] }
  0xf5   :  { %3028 = vmatprep.subr.bf16.mxu1 %v3864_v43  ;;  %3092 = vmatprep.subr.bf16.mxu0 %v3797_v34  ;;  %v1087_v34 = vld [vmem:[#allocation4 + $0x220] sm:$0xff]  ;;  %v1145_v44 = vpack.c.bf16 %v1085_v9, %v1079_v19  ;;  %v1120_v19 = vpack.c.bf16 %v1030_v61, %v1024_v5 }
  0xf6   :  { %v1147_v25 = vpack.c.bf16 %v1087_v34, %v1081_v14  ;;  %v1023_v14 = vld [vmem:[#allocation4 + $0x20] sm:$0xff]  ;;  %v1029_v34 = vld [vmem:[#allocation4 + $0x50] sm:$0xff] }
  0xf8   :  { %3029 = vmatpush3.bf16.msra.mxu1 %v3868_v6  ;;  %3093 = vmatpush3.bf16.msra.mxu0 %v3800_v35  ;;  %v1154_v35 = vpack.c.bf16 %v1100_v11, %v1094_v21  ;;  %v1036_v21 = vld [vmem:[#allocation4 + $0x88] sm:$0xff]  ;;  %v1042_v11 = vld [vmem:[#allocation4 + $0xb8] sm:$0xff] }
  0xf9   :  { %3142 = vmatprep.subr.bf16.mxu1 %v3719_v46  ;;  %3206 = vmatprep.subr.bf16.mxu0 %v3810_v56  ;;  %v1091_v46 = vld [vmem:[#allocation4 + $0x240] sm:$0xff]  ;;  %v1097_v56 = vld [vmem:[#allocation4 + $0x270] sm:$0xff] }
  0xfa   :  { %1523 = vmatmul.mubr.bf16.gmra.mrb[64].mxu1 %v1139_v16  ;;  %1620 = vmatmul.mubr.bf16.gmra.mrb[64].mxu0 %v1141_v58  ;;  %v1151_v51 = vpack.c.bf16 %v1097_v56, %v1091_v46  ;;  %v1750_v16 = vld [vmem:[#allocation6 + $0x8] sm:$0xff]  ;;  %v1756_v58 = vld [vmem:[#allocation6 + $0x38] sm:$0xff]  ;;  %v1126_v46 = vpack.c.bf16 %v1042_v11, %v1036_v21 }
  0xfb   :  { %1530 = vmatprep.mubr.bf16.mxu1 %v1146_v59  ;;  %1627 = vmatprep.mubr.bf16.mxu0 %v1148_v8  ;;  %v1157_v59 = vpack.c.bf16 %v1109_v57, %v1103_v45  ;;  %v1159_v8 = vpack.c.bf16 %v1111_v4, %v1105_v2  ;;  %v1846_v9 = vpack.c.bf16 %v1756_v58, %v1750_v16  ;;  %v1047_v45 = vld [vmem:[#allocation4 + $0xe0] sm:$0xff]  ;;  %v1053_v57 = vld [vmem:[#allocation4 + $0x110] sm:$0xff]  ;;  %v1060_v2 = vld [vmem:[#allocation4 + $0x148] sm:$0xff] }
  0xfc   :  { %v1792_v4 = vld [vmem:[#allocation6 + $0x158] sm:$0xff]  ;;  %v1072_v16 = vld [vmem:[#allocation4 + $0x1a8] sm:$0xff] }
  0xfd   :  { %v1078_v58 = vld [vmem:[#allocation4 + $0x1d8] sm:$0xff]  ;;  %v1096_v21 = vld [vmem:[#allocation4 + $0x268] sm:$0xff] }
  0xfe   :  { %v1822_v11 = vld [vmem:[#allocation6 + $0x248] sm:$0xff] }
 0x102   :  { %1531 = vmatmul.mubr.bf16.gmra.mrb[68].mxu1 %v1145_v44  ;;  %1628 = vmatmul.mubr.bf16.gmra.mrb[68].mxu0 %v1147_v25  ;;  %v1762_v44 = vld [vmem:[#allocation6 + $0x68] sm:$0xff]  ;;  %v1768_v25 = vld [vmem:[#allocation6 + $0x98] sm:$0xff] }
 0x103   :  { %1538 = vmatprep.mubr.bf16.mxu1 %v1152_v30  ;;  %1635 = vmatprep.mubr.bf16.mxu0 %v1154_v35  ;;  %v1119_v30 = vpack.c.bf16 %v1029_v34, %v1023_v14  ;;  %v1845_v35 = vpack.c.bf16 %v1755_v18, %v1749_v17  ;;  %v1852_v56 = vpack.c.bf16 %v1768_v25, %v1762_v44  ;;  %v1810_v14 = vld [vmem:[#allocation6 + $0x1e8] sm:$0xff]  ;;  %v1816_v34 = vld [vmem:[#allocation6 + $0x218] sm:$0xff]  ;;  %v1083_v17 = vld [vmem:[#allocation4 + $0x200] sm:$0xff] }
 0x104   :  { %v1089_v18 = vld [vmem:[#allocation4 + $0x230] sm:$0xff] }
 0x105   :  { %v1149_v44 = vpack.c.bf16 %v1089_v18, %v1083_v17 }
 0x10a   :  { %1539 = vmatmul.mubr.bf16.gmra.mrb[72].mxu1 %v1151_v51  ;;  %1636 = vmatmul.mubr.bf16.gmra.mrb[72].mxu0 %v1153_v52  ;;  %v1774_v51 = vld [vmem:[#allocation6 + $0xc8] sm:$0xff]  ;;  %v1780_v52 = vld [vmem:[#allocation6 + $0xf8] sm:$0xff] }
 0x10b   :  { %1546 = vmatprep.mubr.bf16.mxu1 %v1158_v60  ;;  %1643 = vmatprep.mubr.bf16.mxu0 %v1160_v55  ;;  %v1125_v60 = vpack.c.bf16 %v1041_v32, %v1035_v31  ;;  %v1851_v55 = vpack.c.bf16 %v1767_v27, %v1761_v36  ;;  %v1108_v31 = vld [vmem:[#allocation4 + $0x2c8] sm:$0xff]  ;;  %v1114_v32 = vld [vmem:[#allocation4 + $0x2f8] sm:$0xff] }
 0x10c   :  { %v1834_v36 = vld [vmem:[#allocation6 + $0x2a8] sm:$0xff]  ;;  %v1840_v27 = vld [vmem:[#allocation6 + $0x2d8] sm:$0xff] }
 0x112   :  { %1547 = vmatmul.mubr.bf16.gmra.mrb[76].mxu1 %v1157_v59  ;;  %1644 = vmatmul.mubr.bf16.gmra.mrb[76].mxu0 %v1159_v8  ;;  %v1798_v59 = vld [vmem:[#allocation6 + $0x188] sm:$0xff]  ;;  %v1804_v8 = vld [vmem:[#allocation6 + $0x1b8] sm:$0xff] }
 0x113   :  { %1684 = vmatprep.mubr.bf16.mxu1 %v1120_v19  ;;  %1925 = vmatprep.mubr.bf16.mxu0 %v1846_v9  ;;  %v1084_v19 = vld [vmem:[#allocation4 + $0x208] sm:$0xff]  ;;  %v1090_v9 = vld [vmem:[#allocation4 + $0x238] sm:$0xff] }
 0x11a   :  { %1685 = vmatmul.mubr.bf16.vlgmr.msra.gmra.mrb[80].mxu1 %v1119_v30  ;;  %1926 = vmatmul.mubr.bf16.vlgmr.msra.gmra.mrb[80].mxu0 %v1845_v35 }
 0x11b   :  { %3143 = vmatpush3.bf16.msra.mxu1 %v3721_v47  ;;  %3207 = vmatpush3.bf16.msra.mxu0 %v3814_v24  ;;  %v1132_v47 = vpack.c.bf16 %v1054_v50, %v1048_v41  ;;  %v1858_v24 = vpack.c.bf16 %v1780_v52, %v1774_v51  ;;  %v1162_v51 = vpack.c.bf16 %v1114_v32, %v1108_v31 }
 0x11c   :  { %1692 = vmatprep.mubr.bf16.mxu1 %v1126_v46  ;;  %1933 = vmatprep.mubr.bf16.mxu0 %v1852_v56  ;;  %v1821_v46 = vld [vmem:[#allocation6 + $0x240] sm:$0xff]  ;;  %v1827_v56 = vld [vmem:[#allocation6 + $0x270] sm:$0xff]  ;;  %v1888_v52 = vpack.c.bf16 %v1840_v27, %v1834_v36 }
 0x11d   :  { %3144 = vmatprep.subr.bf16.mxu1 %v3731_v62  ;;  %3208 = vmatprep.subr.bf16.mxu0 %v3816_v33  ;;  %v1773_v62 = vld [vmem:[#allocation6 + $0xc0] sm:$0xff]  ;;  %v1779_v33 = vld [vmem:[#allocation6 + $0xf0] sm:$0xff]  ;;  %v1881_v50 = vpack.c.bf16 %v1827_v56, %v1821_v46  ;;  %v1778_v46 = vld [vmem:[#allocation6 + $0xe8] sm:$0xff] }
 0x11e   :  { %v1784_v56 = vld [vmem:[#allocation6 + $0x118] sm:$0xff] }
 0x11f   :  { %3145 = vmatpush3.bf16.msra.mxu1 %v3734_v63  ;;  %3209 = vmatpush3.bf16.msra.mxu0 %v3820_v40  ;;  %v1066_v63 = vld [vmem:[#allocation4 + $0x178] sm:$0xff]  ;;  %v1786_v40 = vld [vmem:[#allocation6 + $0x128] sm:$0xff] }
 0x120   :  { %3146 = vmatprep.subr.bf16.mxu1 %v3743_v12  ;;  %3210 = vmatprep.subr.bf16.mxu0 %v3822_v53  ;;  %v1131_v12 = vpack.c.bf16 %v1053_v57, %v1047_v45  ;;  %v1857_v53 = vpack.c.bf16 %v1779_v33, %v1773_v62  ;;  %v1138_v5 = vpack.c.bf16 %v1066_v63, %v1060_v2  ;;  %v1752_v45 = vld [vmem:[#allocation6 + $0x18] sm:$0xff]  ;;  %v1758_v57 = vld [vmem:[#allocation6 + $0x48] sm:$0xff] }
 0x121   :  { %v1864_v61 = vpack.c.bf16 %v1792_v4, %v1786_v40  ;;  %v1754_v62 = vld [vmem:[#allocation6 + $0x28] sm:$0xff]  ;;  %v1760_v33 = vld [vmem:[#allocation6 + $0x58] sm:$0xff] }
 0x122   :  { %1693 = vmatmul.mubr.bf16.gmra.mrb[84].mxu1 %v1125_v60  ;;  %1934 = vmatmul.mubr.bf16.gmra.mrb[84].mxu0 %v1851_v55  ;;  %v1107_v60 = vld [vmem:[#allocation4 + $0x2c0] sm:$0xff]  ;;  %v1113_v55 = vld [vmem:[#allocation4 + $0x2f0] sm:$0xff] }
 0x123   :  { %1700 = vmatprep.mubr.bf16.mxu1 %v1132_v47  ;;  %1941 = vmatprep.mubr.bf16.mxu0 %v1858_v24  ;;  %v1833_v47 = vld [vmem:[#allocation6 + $0x2a0] sm:$0xff]  ;;  %v1839_v24 = vld [vmem:[#allocation6 + $0x2d0] sm:$0xff] }
 0x124   :  { %3147 = vmatpush3.bf16.msra.mxu1 %v3746_v15  ;;  %3211 = vmatpush3.bf16.msra.mxu0 %v3829_v0  ;;  %v1059_v15 = vld [vmem:[#allocation4 + $0x140] sm:$0xff]  ;;  %v1065_v0 = vld [vmem:[#allocation4 + $0x170] sm:$0xff] }
 0x125   :  { %3148 = vmatprep.subr.bf16.mxu1 %v3755_v28  ;;  %3212 = vmatprep.subr.bf16.mxu0 %v3832_v7  ;;  %v1785_v28 = vld [vmem:[#allocation6 + $0x120] sm:$0xff]  ;;  %v1791_v7 = vld [vmem:[#allocation6 + $0x150] sm:$0xff] }
 0x128   :  { %3149 = vmatpush3.bf16.msra.mxu1 %v3758_v29  ;;  %3213 = vmatpush3.bf16.msra.mxu0 %v3836_v13  ;;  %v1137_v29 = vpack.c.bf16 %v1065_v0, %v1059_v15  ;;  %v1144_v13 = vpack.c.bf16 %v1078_v58, %v1072_v16 }
 0x129   :  { %3150 = vmatprep.subr.bf16.mxu1 %v3766_v48  ;;  %3214 = vmatprep.subr.bf16.mxu0 %v3840_v10  ;;  %v1863_v48 = vpack.c.bf16 %v1791_v7, %v1785_v28  ;;  %v1870_v10 = vpack.c.bf16 %v1804_v8, %v1798_v59  ;;  %v1848_v28 = vpack.c.bf16 %v1758_v57, %v1752_v45 }
 0x12a   :  { %1701 = vmatmul.mubr.bf16.gmra.mrb[88].mxu1 %v1131_v12  ;;  %1942 = vmatmul.mubr.bf16.gmra.mrb[88].mxu0 %v1857_v53  ;;  %v1161_v12 = vpack.c.bf16 %v1113_v55, %v1107_v60  ;;  %v1887_v53 = vpack.c.bf16 %v1839_v24, %v1833_v47  ;;  %v1850_v7 = vpack.c.bf16 %v1760_v33, %v1754_v62 }
 0x12b   :  { %1708 = vmatprep.mubr.bf16.mxu1 %v1138_v5  ;;  %1949 = vmatprep.mubr.bf16.mxu0 %v1864_v61  ;;  %v1862_v24 = vpack.c.bf16 %v1784_v56, %v1778_v46 }
 0x12c   :  { %3151 = vmatpush3.bf16.msra.mxu1 %v3768_v49  ;;  %3215 = vmatpush3.bf16.msra.mxu0 %v3844_v22  ;;  %v1071_v49 = vld [vmem:[#allocation4 + $0x1a0] sm:$0xff]  ;;  %v1077_v22 = vld [vmem:[#allocation4 + $0x1d0] sm:$0xff] }
 0x12d   :  { %3152 = vmatprep.subr.bf16.mxu1 %v3779_v1  ;;  %3216 = vmatprep.subr.bf16.mxu0 %v3848_v26  ;;  %v1797_v1 = vld [vmem:[#allocation6 + $0x180] sm:$0xff]  ;;  %v1803_v26 = vld [vmem:[#allocation6 + $0x1b0] sm:$0xff] }
 0x130   :  { %3153 = vmatpush3.bf16.msra.mxu1 %v3781_v3  ;;  %3217 = vmatpush3.bf16.msra.mxu0 %v3852_v37  ;;  %v1143_v3 = vpack.c.bf16 %v1077_v22, %v1071_v49  ;;  %v1150_v37 = vpack.c.bf16 %v1090_v9, %v1084_v19  ;;  %v1764_v49 = vld [vmem:[#allocation6 + $0x78] sm:$0xff]  ;;  %v1770_v22 = vld [vmem:[#allocation6 + $0xa8] sm:$0xff] }
 0x131   :  { %3154 = vmatprep.subr.bf16.mxu1 %v3791_v20  ;;  %3218 = vmatprep.subr.bf16.mxu0 %v3856_v38  ;;  %v1869_v20 = vpack.c.bf16 %v1803_v26, %v1797_v1  ;;  %v1876_v38 = vpack.c.bf16 %v1816_v34, %v1810_v14  ;;  %v1766_v1 = vld [vmem:[#allocation6 + $0x88] sm:$0xff]  ;;  %v1772_v26 = vld [vmem:[#allocation6 + $0xb8] sm:$0xff] }
 0x132   :  { %1709 = vmatmul.mubr.bf16.gmra.mrb[92].mxu1 %v1137_v29  ;;  %1950 = vmatmul.mubr.bf16.gmra.mrb[92].mxu0 %v1863_v48  ;;  %v1751_v29 = vld [vmem:[#allocation6 + $0x10] sm:$0xff]  ;;  %v1757_v48 = vld [vmem:[#allocation6 + $0x40] sm:$0xff] }
 0x133   :  { %1716 = vmatprep.mubr.bf16.mxu1 %v1144_v13  ;;  %1957 = vmatprep.mubr.bf16.mxu0 %v1870_v10  ;;  %v1753_v13 = vld [vmem:[#allocation6 + $0x20] sm:$0xff]  ;;  %v1759_v10 = vld [vmem:[#allocation6 + $0x50] sm:$0xff] }
 0x134   :  { %3155 = vmatpush3.bf16.msra.mxu1 %v3794_v23  ;;  %3219 = vmatpush3.bf16.msra.mxu0 %v3860_v54  ;;  %v1809_v23 = vld [vmem:[#allocation6 + $0x1e0] sm:$0xff]  ;;  %v1815_v54 = vld [vmem:[#allocation6 + $0x210] sm:$0xff] }
 0x135   :  { %3156 = vmatprep.subr.bf16.mxu1 %v3803_v39  ;;  %3220 = vmatprep.subr.bf16.mxu0 %v3864_v43  ;;  %v1102_v39 = vld [vmem:[#allocation4 + $0x298] sm:$0xff]  ;;  %v1875_v25 = vpack.c.bf16 %v1815_v54, %v1809_v23  ;;  %v1854_v23 = vpack.c.bf16 %v1770_v22, %v1764_v49  ;;  %v1856_v54 = vpack.c.bf16 %v1772_v26, %v1766_v1 }
 0x136   :  { %v1828_v43 = vld [vmem:[#allocation6 + $0x278] sm:$0xff]  ;;  %v1156_v30 = vpack.c.bf16 %v1102_v39, %v1096_v21 }
 0x137   :  { %v1882_v35 = vpack.c.bf16 %v1828_v43, %v1822_v11 }
 0x138   :  { %3157 = vmatpush3.bf16.msra.mxu1 %v3806_v42  ;;  %3221 = vmatpush3.bf16.msra.mxu0 %v3868_v6  ;;  %v1095_v42 = vld [vmem:[#allocation4 + $0x260] sm:$0xff]  ;;  %v1101_v6 = vld [vmem:[#allocation4 + $0x290] sm:$0xff] }
 0x139   :  { %v1155_v41 = vpack.c.bf16 %v1101_v6, %v1095_v42  ;;  %v1776_v42 = vld [vmem:[#allocation6 + $0xd8] sm:$0xff]  ;;  %v1782_v6 = vld [vmem:[#allocation6 + $0x108] sm:$0xff] }
 0x13a   :  { %1717 = vmatmul.mubr.bf16.gmra.mrb[96].mxu1 %v1143_v3  ;;  %1958 = vmatmul.mubr.bf16.gmra.mrb[96].mxu0 %v1869_v20  ;;  %v1847_v3 = vpack.c.bf16 %v1757_v48, %v1751_v29  ;;  %v1849_v20 = vpack.c.bf16 %v1759_v10, %v1753_v13  ;;  %v1860_v47 = vpack.c.bf16 %v1782_v6, %v1776_v42 }
 0x13b   :  { %1724 = vmatprep.mubr.bf16.mxu1 %v1150_v37  ;;  %1965 = vmatprep.mubr.bf16.mxu0 %v1876_v38 }
 0x142   :  { %1725 = vmatmul.mubr.bf16.gmra.mrb[100].mxu1 %v1149_v44  ;;  %1966 = vmatmul.mubr.bf16.gmra.mrb[100].mxu0 %v1875_v25  ;;  %v1763_v44 = vld [vmem:[#allocation6 + $0x70] sm:$0xff]  ;;  %v1769_v25 = vld [vmem:[#allocation6 + $0xa0] sm:$0xff] }
 0x143   :  { %1732 = vmatprep.mubr.bf16.mxu1 %v1156_v30  ;;  %1973 = vmatprep.mubr.bf16.mxu0 %v1882_v35  ;;  %v1765_v30 = vld [vmem:[#allocation6 + $0x80] sm:$0xff]  ;;  %v1771_v35 = vld [vmem:[#allocation6 + $0xb0] sm:$0xff] }
 0x14a   :  { %1733 = vmatmul.mubr.bf16.gmra.mrb[104].mxu1 %v1155_v41  ;;  %1974 = vmatmul.mubr.bf16.gmra.mrb[104].mxu0 %v1881_v50  ;;  %v1853_v41 = vpack.c.bf16 %v1769_v25, %v1763_v44  ;;  %v1855_v50 = vpack.c.bf16 %v1771_v35, %v1765_v30  ;;  %v1808_v44 = vld [vmem:[#allocation6 + $0x1d8] sm:$0xff] }
 0x14b   :  { %1740 = vmatprep.mubr.bf16.mxu1 %v1162_v51  ;;  %1981 = vmatprep.mubr.bf16.mxu0 %v1888_v52 }
 0x14d   :  { %v2710_v2 = vpop.f32.mrb[0].mxu0  ;;  %v2734_v63 = vpop.f32.mrb[0].mxu1 }
 0x14e   :  { %v2711_v40 = vpop.f32.mrb[1].mxu0  ;;  %v2735_v4 = vpop.f32.mrb[1].mxu1 }
 0x14f   :  { %v3906_v5 = vadd.f32 %v2711_v40, %v2710_v2  ;;  %v3908_v61 = vadd.f32 %v2735_v4, %v2734_v63  ;;  %v2713_v15 = vpop.f32.mrb[2].mxu0  ;;  %v2737_v0 = vpop.f32.mrb[2].mxu1  ;;  %v1775_v2 = vld [vmem:[#allocation6 + $0xd0] sm:$0xff]  ;;  %v1781_v63 = vld [vmem:[#allocation6 + $0x100] sm:$0xff] }
 0x150   :  { %v2714_v16 = vpop.f32.mrb[3].mxu0  ;;  %v2738_v58 = vpop.f32.mrb[3].mxu1  ;;  %v1777_v40 = vld [vmem:[#allocation6 + $0xe0] sm:$0xff]  ;;  %v1783_v4 = vld [vmem:[#allocation6 + $0x110] sm:$0xff]  ;;  %v1859_v29 = vpack.c.bf16 %v1781_v63, %v1775_v2 }
 0x151   :  { %v3910_v59 = vadd.f32 %v2714_v16, %v2713_v15  ;;  %v3912_v8 = vadd.f32 %v2738_v58, %v2737_v0  ;;  %v1790_v15 = vld [vmem:[#allocation6 + $0x148] sm:$0xff]  ;;  %v1796_v0 = vld [vmem:[#allocation6 + $0x178] sm:$0xff]  ;;  %v1861_v48 = vpack.c.bf16 %v1783_v4, %v1777_v40  ;;  %v1799_v2 = vld [vmem:[#allocation6 + $0x190] sm:$0xff] }
 0x152   :  { %1741 = vmatmul.mubr.bf16.gmra.mrb[108].mxu1 %v1161_v12  ;;  %1982 = vmatmul.mubr.bf16.gmra.mrb[108].mxu0 %v1887_v53  ;;  %v1788_v12 = vld [vmem:[#allocation6 + $0x138] sm:$0xff]  ;;  %v1794_v53 = vld [vmem:[#allocation6 + $0x168] sm:$0xff]  ;;  %v1868_v26 = vpack.c.bf16 %v1796_v0, %v1790_v15  ;;  %v1805_v63 = vld [vmem:[#allocation6 + $0x1c0] sm:$0xff] }
 0x153   :  { %2022 = vmatprep.mubr.bf16.mxu1 %v1848_v28  ;;  %2119 = vmatprep.mubr.bf16.mxu0 %v1850_v7  ;;  %v1866_v1 = vpack.c.bf16 %v1794_v53, %v1788_v12  ;;  %v1801_v40 = vld [vmem:[#allocation6 + $0x1a0] sm:$0xff]  ;;  %v1807_v4 = vld [vmem:[#allocation6 + $0x1d0] sm:$0xff]  ;;  %v1818_v15 = vld [vmem:[#allocation6 + $0x228] sm:$0xff] }
 0x154   :  { %v1814_v0 = vld [vmem:[#allocation6 + $0x208] sm:$0xff] }
 0x155   :  { %v2716_v19 = vpop.f32.mrb[4].mxu0  ;;  %v2740_v9 = vpop.f32.mrb[4].mxu1 }
 0x156   :  { %v2717_v14 = vpop.f32.mrb[5].mxu0  ;;  %v2741_v34 = vpop.f32.mrb[5].mxu1 }
 0x157   :  { %v3914_v37 = vadd.f32 %v2717_v14, %v2716_v19  ;;  %v3916_v38 = vadd.f32 %v2741_v34, %v2740_v9  ;;  %v2719_v17 = vpop.f32.mrb[6].mxu0  ;;  %v2743_v18 = vpop.f32.mrb[6].mxu1 }
 0x158   :  { %v2720_v21 = vpop.f32.mrb[7].mxu0  ;;  %v2744_v39 = vpop.f32.mrb[7].mxu1 }
 0x159   :  { %v3918_v11 = vadd.f32 %v2720_v21, %v2719_v17  ;;  %v3920_v43 = vadd.f32 %v2744_v39, %v2743_v18  ;;  %v1789_v17 = vld [vmem:[#allocation6 + $0x140] sm:$0xff]  ;;  %v1795_v18 = vld [vmem:[#allocation6 + $0x170] sm:$0xff]  ;;  %v1802_v39 = vld [vmem:[#allocation6 + $0x1a8] sm:$0xff] }
 0x15a   :  { %2023 = vmatmul.mubr.bf16.vlgmr.msra.gmra.mrb[112].mxu1 %v1847_v3  ;;  %2120 = vmatmul.mubr.bf16.vlgmr.msra.gmra.mrb[112].mxu0 %v1849_v20  ;;  %v1787_v3 = vld [vmem:[#allocation6 + $0x130] sm:$0xff]  ;;  %v1793_v20 = vld [vmem:[#allocation6 + $0x160] sm:$0xff]  ;;  %v1867_v46 = vpack.c.bf16 %v1795_v18, %v1789_v17 }
 0x15b   :  { %2030 = vmatprep.mubr.bf16.mxu1 %v1854_v23  ;;  %2127 = vmatprep.mubr.bf16.mxu0 %v1856_v54  ;;  %v1800_v23 = vld [vmem:[#allocation6 + $0x198] sm:$0xff]  ;;  %v1806_v54 = vld [vmem:[#allocation6 + $0x1c8] sm:$0xff]  ;;  %v3941_v21 = vld [vmem:[%s4400_s4] ss:$0 sm:$0xff]  ;;  %v1865_v6 = vpack.c.bf16 %v1793_v20, %v1787_v3 }
 0x15c   :  { %v1872_v56 = vpack.c.bf16 %v1806_v54, %v1800_v23 }
 0x15d   :  { %v2722_v31 = vpop.f32.mrb[8].mxu0  ;;  %v2746_v32 = vpop.f32.mrb[8].mxu1 }
 0x15e   :  { %v2723_v36 = vpop.f32.mrb[9].mxu0  ;;  %v2747_v27 = vpop.f32.mrb[9].mxu1 }
 0x15f   :  { %v3922_v51 = vadd.f32 %v2723_v36, %v2722_v31  ;;  %v3924_v52 = vadd.f32 %v2747_v27, %v2746_v32  ;;  %v2725_v60 = vpop.f32.mrb[10].mxu0  ;;  %v2749_v55 = vpop.f32.mrb[10].mxu1  ;;  %v763_v31 = vadd.f32 %v3906_v5, %v3941_v21  ;;  %v1812_v5 = vld [vmem:[#allocation6 + $0x1f8] sm:$0xff] }
 0x160   :  { %v2726_v45 = vpop.f32.mrb[11].mxu0  ;;  %v2750_v57 = vpop.f32.mrb[11].mxu1 }
 0x161   :  { %v3926_v62 = vadd.f32 %v2726_v45, %v2725_v60  ;;  %v3928_v33 = vadd.f32 %v2750_v57, %v2749_v55 }
 0x162   :  { %2031 = vmatmul.mubr.bf16.gmra.mrb[116].mxu1 %v1853_v41  ;;  %2128 = vmatmul.mubr.bf16.gmra.mrb[116].mxu0 %v1855_v50  ;;  %v1874_v50 = vpack.c.bf16 %v1808_v44, %v1802_v39  ;;  %v774_v39 = vadd.f32 %v3918_v11, %v3941_v21 }
 0x163   :  { %2038 = vmatprep.mubr.bf16.mxu1 %v1860_v47  ;;  %2135 = vmatprep.mubr.bf16.mxu0 %v1862_v24  ;;  %v766_v47 = vadd.f32 %v3910_v59, %v3941_v21 }
 0x165   :  { %v2728_v28 = vpop.f32.mrb[12].mxu0  ;;  %v2752_v7 = vpop.f32.mrb[12].mxu1 }
 0x166   :  { %v2729_v16 = vpop.f32.mrb[13].mxu0  ;;  %v2753_v58 = vpop.f32.mrb[13].mxu1 }
 0x167   :  { %v3930_v13 = vadd.f32 %v2729_v16, %v2728_v28  ;;  %v3932_v10 = vadd.f32 %v2753_v58, %v2752_v7  ;;  %v2731_v49 = vpop.f32.mrb[14].mxu0  ;;  %v2755_v22 = vpop.f32.mrb[14].mxu1  ;;  %v1820_v28 = vld [vmem:[#allocation6 + $0x238] sm:$0xff] }
 0x168   :  { %v2732_v19 = vpop.f32.mrb[15].mxu0  ;;  %v2756_v9 = vpop.f32.mrb[15].mxu1 }
 0x169   :  { %v3934_v14 = vadd.f32 %v2732_v19, %v2731_v49  ;;  %v3936_v34 = vadd.f32 %v2756_v9, %v2755_v22  ;;  %v1871_v49 = vpack.c.bf16 %v1805_v63, %v1799_v2  ;;  %v1873_v22 = vpack.c.bf16 %v1807_v4, %v1801_v40 }
 0x16a   :  { %2039 = vmatmul.mubr.bf16.gmra.mrb[120].mxu1 %v1859_v29  ;;  %2136 = vmatmul.mubr.bf16.gmra.mrb[120].mxu0 %v1861_v48  ;;  %v771_v19 = vadd.f32 %v3914_v37, %v3941_v21  ;;  %v1813_v37 = vld [vmem:[#allocation6 + $0x200] sm:$0xff]  ;;  %v779_v63 = vadd.f32 %v3922_v51, %v3941_v21 }
 0x16b   :  { %2046 = vmatprep.mubr.bf16.mxu1 %v1866_v1  ;;  %2143 = vmatprep.mubr.bf16.mxu0 %v1868_v26  ;;  %v1878_v1 = vpack.c.bf16 %v1818_v15, %v1812_v5  ;;  %v1880_v26 = vpack.c.bf16 %v1820_v28, %v1814_v0  ;;  %v1825_v51 = vld [vmem:[#allocation6 + $0x260] sm:$0xff] }
 0x16d   :  { %v2774_v25 = vpop.f32.mrb[16].mxu1  ;;  %v2838_v30 = vpop.f32.mrb[16].mxu0 }
 0x16e   :  { %v2775_v35 = vpop.f32.mrb[17].mxu1  ;;  %v2839_v42 = vpop.f32.mrb[17].mxu0 }
 0x16f   :  { %v2776_v32 = vadd.f32 %v2775_v35, %v2774_v25  ;;  %v2840_v36 = vadd.f32 %v2839_v42, %v2838_v30  ;;  %v2777_v27 = vpop.f32.mrb[18].mxu1  ;;  %v2841_v41 = vpop.f32.mrb[18].mxu0  ;;  %v1811_v35 = vld [vmem:[#allocation6 + $0x1f0] sm:$0xff]  ;;  %v1817_v42 = vld [vmem:[#allocation6 + $0x220] sm:$0xff] }
 0x170   :  { %v2778_v60 = vpop.f32.mrb[19].mxu1  ;;  %v2842_v55 = vpop.f32.mrb[19].mxu0 }
 0x171   :  { %v860_v24 = vadd.f32 %v2776_v32, %v763_v31  ;;  %v2779_v45 = vadd.f32 %v2778_v60, %v2777_v27  ;;  %v2843_v57 = vadd.f32 %v2842_v55, %v2841_v41  ;;  %v1830_v32 = vld [vmem:[#allocation6 + $0x288] sm:$0xff]  ;;  %v1832_v27 = vld [vmem:[#allocation6 + $0x298] sm:$0xff] }
 0x172   :  { %2047 = vmatmul.mubr.bf16.gmra.mrb[124].mxu1 %v1865_v6  ;;  %2144 = vmatmul.mubr.bf16.gmra.mrb[124].mxu0 %v1867_v46  ;;  %v1819_v6 = vld [vmem:[#allocation6 + $0x230] sm:$0xff]  ;;  %v1824_v46 = vld [vmem:[#allocation6 + $0x258] sm:$0xff] }
 0x173   :  { %v3947_v12 = vadd.f32 %v2840_v36, %v860_v24  ;;  %v863_v53 = vadd.f32 %v2779_v45, %v766_v47  ;;  %2054 = vmatprep.mubr.bf16.mxu1 %v1872_v56  ;;  %2151 = vmatprep.mubr.bf16.mxu0 %v1874_v50  ;;  %v1826_v36 = vld [vmem:[#allocation6 + $0x268] sm:$0xff]  ;;  %v1877_v24 = vpack.c.bf16 %v1817_v42, %v1811_v35 }
 0x174   :  { %v1879_v45 = vpack.c.bf16 %v1819_v6, %v1813_v37  ;;  %v1886_v2 = vpack.c.bf16 %v1832_v27, %v1826_v36  ;;  %v787_v42 = vadd.f32 %v3930_v13, %v3941_v21  ;;  %v1835_v13 = vld [vmem:[#allocation6 + $0x2b0] sm:$0xff] }
 0x175   :  { %v3949_v7 = vadd.f32 %v2843_v57, %v863_v53  ;;  %v2780_v59 = vpop.f32.mrb[20].mxu1  ;;  %v2844_v16 = vpop.f32.mrb[20].mxu0  ;;  %v2280_v58 = vmul.f32 %v3947_v12, %v3947_v12  ;;  %v1884_v57 = vpack.c.bf16 %v1830_v32, %v1824_v46 }
 0x176   :  { %v2781_v29 = vpop.f32.mrb[21].mxu1  ;;  %v2845_v48 = vpop.f32.mrb[21].mxu0 }
 0x177   :  { %v2782_v9 = vadd.f32 %v2781_v29, %v2780_v59  ;;  %v2846_v3 = vadd.f32 %v2845_v48, %v2844_v16  ;;  %v2783_v20 = vpop.f32.mrb[22].mxu1  ;;  %v2847_v17 = vpop.f32.mrb[22].mxu0  ;;  %2296 = vadd.xlane.f32.xlu0 %v2280_v58  ;;  %v2281_v18 = vmul.f32 %v3949_v7, %v3949_v7  ;;  %v782_v59 = vadd.f32 %v3926_v62, %v3941_v21  ;;  %v1823_v48 = vld [vmem:[#allocation6 + $0x250] sm:$0xff] }
 0x178   :  { %v2784_v23 = vpop.f32.mrb[23].mxu1  ;;  %v2848_v54 = vpop.f32.mrb[23].mxu0 }
 0x179   :  { %v868_v44 = vadd.f32 %v2782_v9, %v771_v19  ;;  %v2785_v25 = vadd.f32 %v2784_v23, %v2783_v20  ;;  %v2849_v30 = vadd.f32 %v2848_v54, %v2847_v17  ;;  %2298 = vadd.xlane.f32.xlu1 %v2281_v18  ;;  %v1842_v9 = vld [vmem:[#allocation6 + $0x2e8] sm:$0xff]  ;;  %v1844_v20 = vld [vmem:[#allocation6 + $0x2f8] sm:$0xff] }
 0x17a   :  { %2055 = vmatmul.mubr.bf16.gmra.mrb[128].mxu1 %v1871_v49  ;;  %2152 = vmatmul.mubr.bf16.gmra.mrb[128].mxu0 %v1873_v22  ;;  %v1829_v49 = vld [vmem:[#allocation6 + $0x280] sm:$0xff]  ;;  %v1831_v22 = vld [vmem:[#allocation6 + $0x290] sm:$0xff] }
 0x17b   :  { %v3959_v56 = vadd.f32 %v2846_v3, %v868_v44  ;;  %v871_v31 = vadd.f32 %v2785_v25, %v774_v39  ;;  %2062 = vmatprep.mubr.bf16.mxu1 %v1878_v1  ;;  %2159 = vmatprep.mubr.bf16.mxu0 %v1880_v26  ;;  %v1836_v1 = vld [vmem:[#allocation6 + $0x2b8] sm:$0xff]  ;;  %v1838_v3 = vld [vmem:[#allocation6 + $0x2c8] sm:$0xff]  ;;  %v1883_v44 = vpack.c.bf16 %v1829_v49, %v1823_v48 }
 0x17c   :  { %v1885_v25 = vpack.c.bf16 %v1831_v22, %v1825_v51  ;;  %v1892_v35 = vpack.c.bf16 %v1844_v20, %v1838_v3  ;;  %v798_v22 = vadd.f32 %v3912_v8, %v3941_v21  ;;  %v803_v8 = vadd.f32 %v3916_v38, %v3941_v21 }
 0x17d   :  { %v3961_v11 = vadd.f32 %v2849_v30, %v871_v31  ;;  %v2786_v41 = vpop.f32.mrb[24].mxu1  ;;  %v2850_v50 = vpop.f32.mrb[24].mxu0  ;;  %v2282_v60 = vmul.f32 %v3959_v56, %v3959_v56  ;;  %v1890_v30 = vpack.c.bf16 %v1842_v9, %v1836_v1 }
 0x17e   :  { %v2787_v55 = vpop.f32.mrb[25].mxu1  ;;  %v2851_v47 = vpop.f32.mrb[25].mxu0 }
 0x17f   :  { %v2788_v40 = vadd.f32 %v2787_v55, %v2786_v41  ;;  %v2852_v4 = vadd.f32 %v2851_v47, %v2850_v50  ;;  %v2789_v5 = vpop.f32.mrb[26].mxu1  ;;  %v2853_v53 = vpop.f32.mrb[26].mxu0  ;;  %2300 = vadd.xlane.f32.xlu0 %v2282_v60  ;;  %v2283_v15 = vmul.f32 %v3961_v11, %v3961_v11  ;;  %v790_v41 = vadd.f32 %v3934_v14, %v3941_v21 }
 0x180   :  { %v2790_v0 = vpop.f32.mrb[27].mxu1  ;;  %v2854_v28 = vpop.f32.mrb[27].mxu0 }
 0x181   :  { %v876_v16 = vadd.f32 %v2788_v40, %v779_v63  ;;  %v2791_v58 = vadd.f32 %v2790_v0, %v2789_v5  ;;  %v2855_v29 = vadd.f32 %v2854_v28, %v2853_v53  ;;  %2302 = vadd.xlane.f32.xlu1 %v2283_v15  ;;  %v795_v28 = vadd.f32 %v3908_v61, %v3941_v21 }
 0x182   :  { %2063 = vmatmul.mubr.bf16.gmra.mrb[132].mxu1 %v1877_v24  ;;  %2160 = vmatmul.mubr.bf16.gmra.mrb[132].mxu0 %v1879_v45  ;;  %v1841_v45 = vld [vmem:[#allocation6 + $0x2e0] sm:$0xff] }
 0x183   :  { %v3971_v26 = vadd.f32 %v2852_v4, %v876_v16  ;;  %v879_v19 = vadd.f32 %v2791_v58, %v782_v59  ;;  %2070 = vmatprep.mubr.bf16.mxu1 %v1884_v57  ;;  %2167 = vmatprep.mubr.bf16.mxu0 %v1886_v2  ;;  %v1837_v57 = vld [vmem:[#allocation6 + $0x2c0] sm:$0xff]  ;;  %v1843_v2 = vld [vmem:[#allocation6 + $0x2f0] sm:$0xff]  ;;  %v1889_v15 = vpack.c.bf16 %v1841_v45, %v1835_v13 }
 0x184   :  { %v1891_v0 = vpack.c.bf16 %v1843_v2, %v1837_v57  ;;  %v811_v45 = vadd.f32 %v3924_v52, %v3941_v21 }
 0x185   :  { %v3973_v62 = vadd.f32 %v2855_v29, %v879_v19  ;;  %v2792_v17 = vpop.f32.mrb[28].mxu1  ;;  %v2856_v18 = vpop.f32.mrb[28].mxu0  ;;  %v2284_v23 = vmul.f32 %v3971_v26, %v3971_v26 }
 0x186   :  { %v2793_v54 = vpop.f32.mrb[29].mxu1  ;;  %v2857_v39 = vpop.f32.mrb[29].mxu0 }
 0x187   :  { %v2794_v37 = vadd.f32 %v2793_v54, %v2792_v17  ;;  %v2858_v6 = vadd.f32 %v2857_v39, %v2856_v18  ;;  %v2795_v46 = vpop.f32.mrb[30].mxu1  ;;  %v2859_v31 = vpop.f32.mrb[30].mxu0  ;;  %2304 = vadd.xlane.f32.xlu0 %v2284_v23  ;;  %v2285_v32 = vmul.f32 %v3973_v62, %v3973_v62 }
 0x188   :  { %v2796_v36 = vpop.f32.mrb[31].mxu1  ;;  %v2860_v27 = vpop.f32.mrb[31].mxu0 }
 0x189   :  { %v884_v50 = vadd.f32 %v2794_v37, %v787_v42  ;;  %v2797_v60 = vadd.f32 %v2796_v36, %v2795_v46  ;;  %v2861_v55 = vadd.f32 %v2860_v27, %v2859_v31  ;;  %2306 = vadd.xlane.f32.xlu1 %v2285_v32  ;;  %v806_v46 = vadd.f32 %v3920_v43, %v3941_v21 }
 0x18a   :  { %2071 = vmatmul.mubr.bf16.gmra.mrb[136].mxu1 %v1883_v44  ;;  %2168 = vmatmul.mubr.bf16.gmra.mrb[136].mxu0 %v1885_v25 }
 0x18b   :  { %v3983_v47 = vadd.f32 %v2858_v6, %v884_v50  ;;  %v887_v24 = vadd.f32 %v2797_v60, %v790_v41  ;;  %2078 = vmatprep.mubr.bf16.mxu1 %v1890_v30  ;;  %2175 = vmatprep.mubr.bf16.mxu0 %v1892_v35 }
 0x18d   :  { %v3985_v63 = vadd.f32 %v2861_v55, %v887_v24  ;;  %v2798_v40 = vpop.f32.mrb[32].mxu1  ;;  %v2862_v4 = vpop.f32.mrb[32].mxu0  ;;  %v2286_v14 = vmul.f32 %v3983_v47, %v3983_v47 }
 0x18e   :  { %v2799_v5 = vpop.f32.mrb[33].mxu1  ;;  %v2863_v53 = vpop.f32.mrb[33].mxu0 }
 0x18f   :  { %v2800_v59 = vadd.f32 %v2799_v5, %v2798_v40  ;;  %v2864_v16 = vadd.f32 %v2863_v53, %v2862_v4  ;;  %v2801_v58 = vpop.f32.mrb[34].mxu1  ;;  %v2865_v29 = vpop.f32.mrb[34].mxu0  ;;  %2308 = vadd.xlane.f32.xlu0 %v2286_v14  ;;  %v2287_v48 = vmul.f32 %v3985_v63, %v3985_v63  ;;  %v814_v53 = vadd.f32 %v3928_v33, %v3941_v21 }
 0x190   :  { %v2802_v49 = vpop.f32.mrb[35].mxu1  ;;  %v2866_v51 = vpop.f32.mrb[35].mxu0 }
 0x191   :  { %v892_v1 = vadd.f32 %v2800_v59, %v795_v28  ;;  %v2803_v19 = vadd.f32 %v2802_v49, %v2801_v58  ;;  %v2867_v9 = vadd.f32 %v2866_v51, %v2865_v29  ;;  %2310 = vadd.xlane.f32.xlu1 %v2287_v48 }
 0x192   :  { %2079 = vmatmul.mubr.bf16.gmra.mrb[140].mxu1 %v1889_v15  ;;  %2176 = vmatmul.mubr.bf16.gmra.mrb[140].mxu0 %v1891_v0 }
 0x193   :  { %v3995_v61 = vadd.f32 %v2864_v16, %v892_v1  ;;  %v895_v3 = vadd.f32 %v2803_v19, %v798_v22  ;;  %v819_v22 = vadd.f32 %v3932_v10, %v3941_v21 }
 0x195   :  { %v3997_v20 = vadd.f32 %v2867_v9, %v895_v3  ;;  %v2804_v17 = vpop.f32.mrb[36].mxu1  ;;  %v2868_v18 = vpop.f32.mrb[36].mxu0  ;;  %v2288_v23 = vmul.f32 %v3995_v61, %v3995_v61 }
 0x196   :  { %v2805_v54 = vpop.f32.mrb[37].mxu1  ;;  %v2869_v39 = vpop.f32.mrb[37].mxu0 }
 0x197   :  { %v2806_v44 = vadd.f32 %v2805_v54, %v2804_v17  ;;  %v2870_v25 = vadd.f32 %v2869_v39, %v2868_v18  ;;  %v2807_v30 = vpop.f32.mrb[38].mxu1  ;;  %v2871_v35 = vpop.f32.mrb[38].mxu0  ;;  %2312 = vadd.xlane.f32.xlu0 %v2288_v23  ;;  %v2289_v42 = vmul.f32 %v3997_v20, %v3997_v20  ;;  %v822_v23 = vadd.f32 %v3936_v34, %v3941_v21 }
 0x198   :  { %v2808_v37 = vpop.f32.mrb[39].mxu1  ;;  %v2872_v6 = vpop.f32.mrb[39].mxu0 }
 0x199   :  { %v900_v31 = vadd.f32 %v2806_v44, %v803_v8  ;;  %v2809_v32 = vadd.f32 %v2808_v37, %v2807_v30  ;;  %v2873_v36 = vadd.f32 %v2872_v6, %v2871_v35  ;;  %2314 = vadd.xlane.f32.xlu1 %v2289_v42  ;;  %v4040_v37 = vld [vmem:[%s4402_s6] ss:$0 sm:$0xff] }
 0x19b   :  { %v4007_v27 = vadd.f32 %v2870_v25, %v900_v31  ;;  %v903_v38 = vadd.f32 %v2809_v32, %v806_v46 }
 0x19d   :  { %v4009_v41 = vadd.f32 %v2873_v36, %v903_v38  ;;  %v2810_v50 = vpop.f32.mrb[40].mxu1  ;;  %v2874_v60 = vpop.f32.mrb[40].mxu0  ;;  %v2290_v55 = vmul.f32 %v4007_v27, %v4007_v27 }
 0x19e   :  { %v2811_v13 = vpop.f32.mrb[41].mxu1  ;;  %v2875_v24 = vpop.f32.mrb[41].mxu0 }
 0x19f   :  { %v2812_v43 = vadd.f32 %v2811_v13, %v2810_v50  ;;  %v2876_v57 = vadd.f32 %v2875_v24, %v2874_v60  ;;  %v2813_v2 = vpop.f32.mrb[42].mxu1  ;;  %v2877_v40 = vpop.f32.mrb[42].mxu0  ;;  %2316 = vadd.xlane.f32.xlu0 %v2290_v55  ;;  %v2291_v4 = vmul.f32 %v4009_v41, %v4009_v41 }
 0x1a0   :  { %v2814_v14 = vpop.f32.mrb[43].mxu1  ;;  %v2878_v5 = vpop.f32.mrb[43].mxu0 }
 0x1a1   :  { %v908_v15 = vadd.f32 %v2812_v43, %v811_v45  ;;  %v2815_v0 = vadd.f32 %v2814_v14, %v2813_v2  ;;  %v2879_v28 = vadd.f32 %v2878_v5, %v2877_v40  ;;  %2318 = vadd.xlane.f32.xlu1 %v2291_v4 }
 0x1a3   :  { %v4019_v59 = vadd.f32 %v2876_v57, %v908_v15  ;;  %v911_v52 = vadd.f32 %v2815_v0, %v814_v53 }
 0x1a5   :  { %v4021_v16 = vadd.f32 %v2879_v28, %v911_v52  ;;  %v2816_v58 = vpop.f32.mrb[44].mxu1  ;;  %v2880_v29 = vpop.f32.mrb[44].mxu0  ;;  %v2292_v48 = vmul.f32 %v4019_v59, %v4019_v59 }
 0x1a6   :  { %v2817_v49 = vpop.f32.mrb[45].mxu1  ;;  %v2881_v51 = vpop.f32.mrb[45].mxu0 }
 0x1a7   :  { %v2818_v33 = vadd.f32 %v2817_v49, %v2816_v58  ;;  %v2882_v1 = vadd.f32 %v2881_v51, %v2880_v29  ;;  %v2819_v19 = vpop.f32.mrb[46].mxu1  ;;  %v2883_v9 = vpop.f32.mrb[46].mxu0  ;;  %2320 = vadd.xlane.f32.xlu0 %v2292_v48  ;;  %v2293_v3 = vmul.f32 %v4021_v16, %v4021_v16 }
 0x1a8   :  { %v2820_v17 = vpop.f32.mrb[47].mxu1  ;;  %v2884_v18 = vpop.f32.mrb[47].mxu0 }
 0x1a9   :  { %v916_v54 = vadd.f32 %v2818_v33, %v819_v22  ;;  %v2821_v39 = vadd.f32 %v2820_v17, %v2819_v19  ;;  %v2885_v8 = vadd.f32 %v2884_v18, %v2883_v9  ;;  %2322 = vadd.xlane.f32.xlu1 %v2293_v3 }
 0x1ab   :  { %v4031_v44 = vadd.f32 %v2882_v1, %v916_v54  ;;  %v919_v10 = vadd.f32 %v2821_v39, %v822_v23 }
 0x1ad   :  { %v4033_v25 = vadd.f32 %v2885_v8, %v919_v10  ;;  %v2902_v30 = vpop.f32.mrb[48].mxu1  ;;  %v2966_v35 = vpop.f32.mrb[48].mxu0  ;;  %v2294_v42 = vmul.f32 %v4031_v44, %v4031_v44 }
 0x1ae   :  { %v2903_v34 = vpop.f32.mrb[49].mxu1  ;;  %v2967_v21 = vpop.f32.mrb[49].mxu0 }
 0x1af   :  { %v2904_v6 = vadd.f32 %v2903_v34, %v2902_v30  ;;  %v2968_v46 = vadd.f32 %v2967_v21, %v2966_v35  ;;  %v2905_v31 = vpop.f32.mrb[50].mxu1  ;;  %v2969_v32 = vpop.f32.mrb[50].mxu0  ;;  %2324 = vadd.xlane.f32.xlu0 %v2294_v42  ;;  %v2295_v36 = vmul.f32 %v4033_v25, %v4033_v25 }
 0x1b0   :  { %v2906_v38 = vpop.f32.mrb[51].mxu1  ;;  %v2970_v50 = vpop.f32.mrb[51].mxu0 }
 0x1b1   :  { %v1493_v60 = vadd.f32 %v2904_v6, %v4040_v37  ;;  %v2907_v55 = vadd.f32 %v2906_v38, %v2905_v31  ;;  %v2971_v13 = vadd.f32 %v2970_v50, %v2969_v32  ;;  %2326 = vadd.xlane.f32.xlu1 %v2295_v36 }
 0x1b3   :  { %v4045_v24 = vadd.f32 %v2968_v46, %v1493_v60  ;;  %v1496_v45 = vadd.f32 %v2907_v55, %v4040_v37 }
 0x1b5   :  { %v4048_v43 = vadd.f32 %v2971_v13, %v1496_v45  ;;  %v2908_v57 = vpop.f32.mrb[52].mxu1  ;;  %v2972_v2 = vpop.f32.mrb[52].mxu0 }
 0x1b6   :  { %v2909_v40 = vpop.f32.mrb[53].mxu1  ;;  %v2973_v4 = vpop.f32.mrb[53].mxu0 }
 0x1b7   :  { %v2910_v14 = vadd.f32 %v2909_v40, %v2908_v57  ;;  %v2974_v5 = vadd.f32 %v2973_v4, %v2972_v2  ;;  %v2911_v53 = vpop.f32.mrb[54].mxu1  ;;  %v2975_v15 = vpop.f32.mrb[54].mxu0 }
 0x1b8   :  { %v2912_v0 = vpop.f32.mrb[55].mxu1  ;;  %v2976_v28 = vpop.f32.mrb[55].mxu0 }
 0x1b9   :  { %v1501_v52 = vadd.f32 %v2910_v14, %v4040_v37  ;;  %v2913_v58 = vadd.f32 %v2912_v0, %v2911_v53  ;;  %v2977_v29 = vadd.f32 %v2976_v28, %v2975_v15 }
 0x1bb   :  { %v4051_v48 = vadd.f32 %v2974_v5, %v1501_v52  ;;  %v1504_v49 = vadd.f32 %v2913_v58, %v4040_v37 }
 0x1bd   :  { %v4054_v51 = vadd.f32 %v2977_v29, %v1504_v49  ;;  %v2914_v22 = vpop.f32.mrb[56].mxu1  ;;  %v2978_v33 = vpop.f32.mrb[56].mxu0 }
 0x1be   :  { %v2915_v1 = vpop.f32.mrb[57].mxu1  ;;  %v2979_v19 = vpop.f32.mrb[57].mxu0 }
 0x1bf   :  { %v2916_v9 = vadd.f32 %v2915_v1, %v2914_v22  ;;  %v2980_v3 = vadd.f32 %v2979_v19, %v2978_v33  ;;  %v2917_v17 = vpop.f32.mrb[58].mxu1  ;;  %v2981_v18 = vpop.f32.mrb[58].mxu0 }
 0x1c0   :  { %v2918_v23 = vpop.f32.mrb[59].mxu1  ;;  %v2982_v54 = vpop.f32.mrb[59].mxu0 }
 0x1c1   :  { %v1509_v39 = vadd.f32 %v2916_v9, %v4040_v37  ;;  %v2919_v8 = vadd.f32 %v2918_v23, %v2917_v17  ;;  %v2983_v10 = vadd.f32 %v2982_v54, %v2981_v18 }
 0x1c3   :  { %v4057_v30 = vadd.f32 %v2980_v3, %v1509_v39  ;;  %v1512_v35 = vadd.f32 %v2919_v8, %v4040_v37 }
 0x1c5   :  { %v4060_v42 = vadd.f32 %v2983_v10, %v1512_v35  ;;  %v2920_v34 = vpop.f32.mrb[60].mxu1  ;;  %v2984_v21 = vpop.f32.mrb[60].mxu0 }
 0x1c6   :  { %v2921_v6 = vpop.f32.mrb[61].mxu1  ;;  %v2985_v46 = vpop.f32.mrb[61].mxu0 }
 0x1c7   :  { %v2922_v31 = vadd.f32 %v2921_v6, %v2920_v34  ;;  %v2986_v32 = vadd.f32 %v2985_v46, %v2984_v21  ;;  %v2923_v36 = vpop.f32.mrb[62].mxu1  ;;  %v2987_v38 = vpop.f32.mrb[62].mxu0 }
 0x1c8   :  { %v2924_v50 = vpop.f32.mrb[63].mxu1  ;;  %v2988_v60 = vpop.f32.mrb[63].mxu0 }
 0x1c9   :  { %v1517_v55 = vadd.f32 %v2922_v31, %v4040_v37  ;;  %v2925_v13 = vadd.f32 %v2924_v50, %v2923_v36  ;;  %v2989_v45 = vadd.f32 %v2988_v60, %v2987_v38 }
 0x1cb   :  { %v4063_v57 = vadd.f32 %v2986_v32, %v1517_v55  ;;  %v1520_v2 = vadd.f32 %v2925_v13, %v4040_v37 }
 0x1cd   :  { %v4066_v40 = vadd.f32 %v2989_v45, %v1520_v2  ;;  %v2926_v4 = vpop.f32.mrb[64].mxu1  ;;  %v2990_v14 = vpop.f32.mrb[64].mxu0 }
 0x1ce   :  { %v2927_v5 = vpop.f32.mrb[65].mxu1  ;;  %v2991_v53 = vpop.f32.mrb[65].mxu0 }
 0x1cf   :  { %v2928_v15 = vadd.f32 %v2927_v5, %v2926_v4  ;;  %v2992_v0 = vadd.f32 %v2991_v53, %v2990_v14  ;;  %v2929_v28 = vpop.f32.mrb[66].mxu1  ;;  %v2993_v52 = vpop.f32.mrb[66].mxu0 }
 0x1d0   :  { %v2930_v58 = vpop.f32.mrb[67].mxu1  ;;  %v2994_v29 = vpop.f32.mrb[67].mxu0 }
 0x1d1   :  { %v1525_v49 = vadd.f32 %v2928_v15, %v4040_v37  ;;  %v2931_v22 = vadd.f32 %v2930_v58, %v2929_v28  ;;  %v2995_v33 = vadd.f32 %v2994_v29, %v2993_v52 }
 0x1d3   :  { %v4069_v1 = vadd.f32 %v2992_v0, %v1525_v49  ;;  %v1528_v19 = vadd.f32 %v2931_v22, %v4040_v37 }
 0x1d5   :  { %v4072_v9 = vadd.f32 %v2995_v33, %v1528_v19  ;;  %v2932_v3 = vpop.f32.mrb[68].mxu1  ;;  %v2996_v17 = vpop.f32.mrb[68].mxu0 }
 0x1d6   :  { %v2933_v18 = vpop.f32.mrb[69].mxu1  ;;  %v2997_v23 = vpop.f32.mrb[69].mxu0 }
 0x1d7   :  { %v2934_v54 = vadd.f32 %v2933_v18, %v2932_v3  ;;  %v2998_v39 = vadd.f32 %v2997_v23, %v2996_v17  ;;  %v2935_v8 = vpop.f32.mrb[70].mxu1  ;;  %v2999_v10 = vpop.f32.mrb[70].mxu0 }
 0x1d8   :  { %v2936_v35 = vpop.f32.mrb[71].mxu1  ;;  %v3000_v34 = vpop.f32.mrb[71].mxu0 }
 0x1d9   :  { %v1533_v21 = vadd.f32 %v2934_v54, %v4040_v37  ;;  %v2937_v6 = vadd.f32 %v2936_v35, %v2935_v8  ;;  %v3001_v46 = vadd.f32 %v3000_v34, %v2999_v10 }
 0x1db   :  { %v4075_v31 = vadd.f32 %v2998_v39, %v1533_v21  ;;  %v1536_v32 = vadd.f32 %v2937_v6, %v4040_v37 }
 0x1dd   :  { %v4078_v36 = vadd.f32 %v3001_v46, %v1536_v32  ;;  %v2938_v38 = vpop.f32.mrb[72].mxu1  ;;  %v3002_v50 = vpop.f32.mrb[72].mxu0 }
 0x1de   :  { %v2939_v60 = vpop.f32.mrb[73].mxu1  ;;  %v3003_v55 = vpop.f32.mrb[73].mxu0 }
 0x1df   :  { %v2940_v13 = vadd.f32 %v2939_v60, %v2938_v38  ;;  %v3004_v45 = vadd.f32 %v3003_v55, %v3002_v50  ;;  %v2941_v2 = vpop.f32.mrb[74].mxu1  ;;  %v3005_v4 = vpop.f32.mrb[74].mxu0 }
 0x1e0   :  { %v2942_v14 = vpop.f32.mrb[75].mxu1  ;;  %v3006_v5 = vpop.f32.mrb[75].mxu0 }
 0x1e1   :  { %v1541_v53 = vadd.f32 %v2940_v13, %v4040_v37  ;;  %v2943_v15 = vadd.f32 %v2942_v14, %v2941_v2  ;;  %v3007_v0 = vadd.f32 %v3006_v5, %v3005_v4 }
 0x1e3   :  { %v4081_v28 = vadd.f32 %v3004_v45, %v1541_v53  ;;  %v1544_v52 = vadd.f32 %v2943_v15, %v4040_v37 }
 0x1e5   :  { %v4084_v58 = vadd.f32 %v3007_v0, %v1544_v52  ;;  %v2944_v29 = vpop.f32.mrb[76].mxu1  ;;  %v3008_v49 = vpop.f32.mrb[76].mxu0 }
 0x1e6   :  { %v2945_v22 = vpop.f32.mrb[77].mxu1  ;;  %v3009_v33 = vpop.f32.mrb[77].mxu0 }
 0x1e7   :  { %v2946_v19 = vadd.f32 %v2945_v22, %v2944_v29  ;;  %v3010_v3 = vadd.f32 %v3009_v33, %v3008_v49  ;;  %v2947_v17 = vpop.f32.mrb[78].mxu1  ;;  %v3011_v18 = vpop.f32.mrb[78].mxu0 }
 0x1e8   :  { %v2948_v23 = vpop.f32.mrb[79].mxu1  ;;  %v3012_v54 = vpop.f32.mrb[79].mxu0 }
 0x1e9   :  { %v1549_v39 = vadd.f32 %v2946_v19, %v4040_v37  ;;  %v2949_v8 = vadd.f32 %v2948_v23, %v2947_v17  ;;  %v3013_v10 = vadd.f32 %v3012_v54, %v3011_v18 }
 0x1eb   :  { %v4087_v35 = vadd.f32 %v3010_v3, %v1549_v39  ;;  %v1552_v34 = vadd.f32 %v2949_v8, %v4040_v37 }
 0x1ed   :  { %v4090_v21 = vadd.f32 %v3013_v10, %v1552_v34  ;;  %v3030_v6 = vpop.f32.mrb[80].mxu1  ;;  %v3094_v46 = vpop.f32.mrb[80].mxu0 }
 0x1ee   :  { %v3031_v32 = vpop.f32.mrb[81].mxu1  ;;  %v3095_v38 = vpop.f32.mrb[81].mxu0 }
 0x1ef   :  { %v3032_v50 = vadd.f32 %v3031_v32, %v3030_v6  ;;  %v4092_v60 = vadd.f32 %v3095_v38, %v3094_v46  ;;  %v3033_v55 = vpop.f32.mrb[82].mxu1  ;;  %v3097_v13 = vpop.f32.mrb[82].mxu0 }
 0x1f0   :  { %v3034_v45 = vpop.f32.mrb[83].mxu1  ;;  %v3098_v2 = vpop.f32.mrb[83].mxu0 }
 0x1f1   :  { %v1687_v4 = vadd.f32 %v3032_v50, %v4045_v24  ;;  %v3035_v14 = vadd.f32 %v3034_v45, %v3033_v55  ;;  %v4095_v5 = vadd.f32 %v3098_v2, %v3097_v13 }
 0x1f3   :  { %v1690_v53 = vadd.f32 %v3035_v14, %v4048_v43  ;;  %v2184_v15 = vmul.f32 %v1687_v4, %v3947_v12  ;;  %v2328_v24 = vmul.f32 %v1687_v4, %v1687_v4 }
 0x1f5   :  { %v3036_v0 = vpop.f32.mrb[84].mxu1  ;;  %v3100_v52 = vpop.f32.mrb[84].mxu0  ;;  %2200 = vadd.xlane.f32.xlu0 %v2184_v15  ;;  %v2329_v29 = vmul.f32 %v1690_v53, %v1690_v53  ;;  %v2185_v34 = vmul.f32 %v1690_v53, %v3949_v7 }
 0x1f6   :  { %v3037_v49 = vpop.f32.mrb[85].mxu1  ;;  %v3101_v22 = vpop.f32.mrb[85].mxu0 }
 0x1f7   :  { %v3038_v33 = vadd.f32 %v3037_v49, %v3036_v0  ;;  %v4099_v19 = vadd.f32 %v3101_v22, %v3100_v52  ;;  %v3039_v3 = vpop.f32.mrb[86].mxu1  ;;  %v3103_v17 = vpop.f32.mrb[86].mxu0  ;;  %2346 = vadd.xlane.f32.xlu1 %v2329_v29 }
 0x1f8   :  { %v3040_v18 = vpop.f32.mrb[87].mxu1  ;;  %v3104_v23 = vpop.f32.mrb[87].mxu0 }
 0x1f9   :  { %v1695_v54 = vadd.f32 %v3038_v33, %v4051_v48  ;;  %v3041_v43 = vadd.f32 %v3040_v18, %v3039_v3  ;;  %v4102_v39 = vadd.f32 %v3104_v23, %v3103_v17  ;;  %2344 = vadd.xlane.f32.xlu0 %v2328_v24 }
 0x1fb   :  { %v1698_v8 = vadd.f32 %v3041_v43, %v4054_v51  ;;  %v2186_v10 = vmul.f32 %v1695_v54, %v3959_v56  ;;  %v2330_v51 = vmul.f32 %v1695_v54, %v1695_v54 }
 0x1fd   :  { %v3042_v6 = vpop.f32.mrb[88].mxu1  ;;  %v3106_v46 = vpop.f32.mrb[88].mxu0  ;;  %2204 = vadd.xlane.f32.xlu1 %v2186_v10  ;;  %2202 = vadd.xlane.f32.xlu0 %v2185_v34  ;;  %v2187_v45 = vmul.f32 %v1698_v8, %v3961_v11  ;;  %v2331_v52 = vmul.f32 %v1698_v8, %v1698_v8 }
 0x1fe   :  { %v3043_v32 = vpop.f32.mrb[89].mxu1  ;;  %v3107_v38 = vpop.f32.mrb[89].mxu0 }
 0x1ff   :  { %v3044_v50 = vadd.f32 %v3043_v32, %v3042_v6  ;;  %v4107_v55 = vadd.f32 %v3107_v38, %v3106_v46  ;;  %v3045_v48 = vpop.f32.mrb[90].mxu1  ;;  %v3109_v13 = vpop.f32.mrb[90].mxu0 }
 0x200   :  { %v3046_v2 = vpop.f32.mrb[91].mxu1  ;;  %v3110_v4 = vpop.f32.mrb[91].mxu0 }
 0x201   :  { %v1703_v14 = vadd.f32 %v3044_v50, %v4057_v30  ;;  %v3047_v15 = vadd.f32 %v3046_v2, %v3045_v48  ;;  %v4111_v53 = vadd.f32 %v3110_v4, %v3109_v13  ;;  %2206 = vadd.xlane.f32.xlu1 %v2187_v45  ;;  %2348 = vadd.xlane.f32.xlu0 %v2330_v51 }
 0x203   :  { %v1706_v0 = vadd.f32 %v3047_v15, %v4060_v42  ;;  %v2188_v29 = vmul.f32 %v1703_v14, %v3971_v26  ;;  %v2332_v43 = vmul.f32 %v1703_v14, %v1703_v14 }
 0x205   :  { %v3048_v49 = vpop.f32.mrb[92].mxu1  ;;  %v3112_v22 = vpop.f32.mrb[92].mxu0  ;;  %2350 = vadd.xlane.f32.xlu1 %v2331_v52  ;;  %2208 = vadd.xlane.f32.xlu0 %v2188_v29  ;;  %v2189_v18 = vmul.f32 %v1706_v0, %v3973_v62  ;;  %v2333_v46 = vmul.f32 %v1706_v0, %v1706_v0 }
 0x206   :  { %v3049_v33 = vpop.f32.mrb[93].mxu1  ;;  %v3113_v3 = vpop.f32.mrb[93].mxu0 }
 0x207   :  { %v3050_v17 = vadd.f32 %v3049_v33, %v3048_v49  ;;  %v4115_v24 = vadd.f32 %v3113_v3, %v3112_v22  ;;  %v3051_v30 = vpop.f32.mrb[94].mxu1  ;;  %v3115_v23 = vpop.f32.mrb[94].mxu0 }
 0x208   :  { %v3052_v54 = vpop.f32.mrb[95].mxu1  ;;  %v3116_v10 = vpop.f32.mrb[95].mxu0 }
 0x209   :  { %v1711_v42 = vadd.f32 %v3050_v17, %v4063_v57  ;;  %v3053_v8 = vadd.f32 %v3052_v54, %v3051_v30  ;;  %2210 = vadd.xlane.f32.xlu1 %v2189_v18  ;;  %v4119_v34 = vadd.f32 %v3116_v10, %v3115_v23  ;;  %2352 = vadd.xlane.f32.xlu0 %v2332_v43 }
 0x20b   :  { %v1714_v6 = vadd.f32 %v3053_v8, %v4066_v40  ;;  %v2190_v32 = vmul.f32 %v1711_v42, %v3983_v47  ;;  %v2334_v15 = vmul.f32 %v1711_v42, %v1711_v42 }
 0x20d   :  { %v3054_v38 = vpop.f32.mrb[96].mxu1  ;;  %v3118_v50 = vpop.f32.mrb[96].mxu0  ;;  %2354 = vadd.xlane.f32.xlu1 %v2333_v46  ;;  %2212 = vadd.xlane.f32.xlu0 %v2190_v32  ;;  %v2191_v4 = vmul.f32 %v1714_v6, %v3985_v63  ;;  %v2335_v22 = vmul.f32 %v1714_v6, %v1714_v6 }
 0x20e   :  { %v3055_v48 = vpop.f32.mrb[97].mxu1  ;;  %v3119_v13 = vpop.f32.mrb[97].mxu0 }
 0x20f   :  { %v3056_v45 = vadd.f32 %v3055_v48, %v3054_v38  ;;  %v4123_v2 = vadd.f32 %v3119_v13, %v3118_v50  ;;  %v3057_v57 = vpop.f32.mrb[98].mxu1  ;;  %v3121_v51 = vpop.f32.mrb[98].mxu0 }
 0x210   :  { %v3058_v14 = vpop.f32.mrb[99].mxu1  ;;  %v3122_v52 = vpop.f32.mrb[99].mxu0 }
 0x211   :  { %v1719_v40 = vadd.f32 %v3056_v45, %v4069_v1  ;;  %v3059_v0 = vadd.f32 %v3058_v14, %v3057_v57  ;;  %2214 = vadd.xlane.f32.xlu1 %v2191_v4  ;;  %v4127_v29 = vadd.f32 %v3122_v52, %v3121_v51  ;;  %2356 = vadd.xlane.f32.xlu0 %v2334_v15 }
 0x213   :  { %v1722_v49 = vadd.f32 %v3059_v0, %v4072_v9  ;;  %v2192_v33 = vmul.f32 %v1719_v40, %v3995_v61  ;;  %v2336_v10 = vmul.f32 %v1719_v40, %v1719_v40 }
 0x215   :  { %v3060_v3 = vpop.f32.mrb[100].mxu1  ;;  %v3124_v17 = vpop.f32.mrb[100].mxu0  ;;  %2358 = vadd.xlane.f32.xlu1 %v2335_v22  ;;  %2216 = vadd.xlane.f32.xlu0 %v2192_v33  ;;  %v2193_v43 = vmul.f32 %v1722_v49, %v3997_v20  ;;  %v2337_v50 = vmul.f32 %v1722_v49, %v1722_v49 }
 0x216   :  { %v3061_v30 = vpop.f32.mrb[101].mxu1  ;;  %v3125_v18 = vpop.f32.mrb[101].mxu0 }
 0x217   :  { %v3062_v23 = vadd.f32 %v3061_v30, %v3060_v3  ;;  %v4131_v54 = vadd.f32 %v3125_v18, %v3124_v17  ;;  %v3063_v1 = vpop.f32.mrb[102].mxu1  ;;  %v3127_v42 = vpop.f32.mrb[102].mxu0 }
 0x218   :  { %v3064_v8 = vpop.f32.mrb[103].mxu1  ;;  %v3128_v46 = vpop.f32.mrb[103].mxu0 }
 0x219   :  { %v1727_v9 = vadd.f32 %v3062_v23, %v4075_v31  ;;  %v3065_v6 = vadd.f32 %v3064_v8, %v3063_v1  ;;  %2218 = vadd.xlane.f32.xlu1 %v2193_v43  ;;  %v4135_v32 = vadd.f32 %v3128_v46, %v3127_v42  ;;  %2360 = vadd.xlane.f32.xlu0 %v2336_v10 }
 0x21b   :  { %v1730_v38 = vadd.f32 %v3065_v6, %v4078_v36  ;;  %v2194_v48 = vmul.f32 %v1727_v9, %v4007_v27  ;;  %v2338_v52 = vmul.f32 %v1727_v9, %v1727_v9 }
 0x21d   :  { %v3066_v13 = vpop.f32.mrb[104].mxu1  ;;  %v3130_v45 = vpop.f32.mrb[104].mxu0  ;;  %2362 = vadd.xlane.f32.xlu1 %v2337_v50  ;;  %2220 = vadd.xlane.f32.xlu0 %v2194_v48  ;;  %v2195_v15 = vmul.f32 %v1730_v38, %v4009_v41  ;;  %v2339_v17 = vmul.f32 %v1730_v38, %v1730_v38 }
 0x21e   :  { %v3067_v57 = vpop.f32.mrb[105].mxu1  ;;  %v3131_v4 = vpop.f32.mrb[105].mxu0 }
 0x21f   :  { %v3068_v51 = vadd.f32 %v3067_v57, %v3066_v13  ;;  %v4139_v14 = vadd.f32 %v3131_v4, %v3130_v45  ;;  %v3069_v31 = vpop.f32.mrb[106].mxu1  ;;  %v3133_v40 = vpop.f32.mrb[106].mxu0 }
 0x220   :  { %v3070_v0 = vpop.f32.mrb[107].mxu1  ;;  %v3134_v22 = vpop.f32.mrb[107].mxu0 }
 0x221   :  { %v1735_v36 = vadd.f32 %v3068_v51, %v4081_v28  ;;  %v3071_v49 = vadd.f32 %v3070_v0, %v3069_v31  ;;  %2222 = vadd.xlane.f32.xlu1 %v2195_v15  ;;  %v4143_v33 = vadd.f32 %v3134_v22, %v3133_v40  ;;  %2364 = vadd.xlane.f32.xlu0 %v2338_v52 }
 0x223   :  { %v1738_v3 = vadd.f32 %v3071_v49, %v4084_v58  ;;  %v2196_v30 = vmul.f32 %v1735_v36, %v4019_v59  ;;  %v2340_v46 = vmul.f32 %v1735_v36, %v1735_v36 }
 0x225   :  { %v3072_v18 = vpop.f32.mrb[108].mxu1  ;;  %v3136_v23 = vpop.f32.mrb[108].mxu0  ;;  %2366 = vadd.xlane.f32.xlu1 %v2339_v17  ;;  %2224 = vadd.xlane.f32.xlu0 %v2196_v30  ;;  %v2197_v10 = vmul.f32 %v1738_v3, %v4021_v16  ;;  %v2341_v45 = vmul.f32 %v1738_v3, %v1738_v3  ;;  %v1931_v3 = vadd.f32 %v4095_v5, %v4040_v37 }
 0x226   :  { %v3073_v1 = vpop.f32.mrb[109].mxu1  ;;  %v3137_v43 = vpop.f32.mrb[109].mxu0  ;;  %v1936_v5 = vadd.f32 %v4099_v19, %v4040_v37 }
 0x227   :  { %v3074_v42 = vadd.f32 %v3073_v1, %v3072_v18  ;;  %v4147_v8 = vadd.f32 %v3137_v43, %v3136_v23  ;;  %v3075_v28 = vpop.f32.mrb[110].mxu1  ;;  %v3139_v9 = vpop.f32.mrb[110].mxu0 }
 0x228   :  { %v3076_v6 = vpop.f32.mrb[111].mxu1  ;;  %v3140_v50 = vpop.f32.mrb[111].mxu0 }
 0x229   :  { %v1743_v58 = vadd.f32 %v3074_v42, %v4087_v35  ;;  %v3077_v38 = vadd.f32 %v3076_v6, %v3075_v28  ;;  %2226 = vadd.xlane.f32.xlu1 %v2197_v10  ;;  %v4151_v48 = vadd.f32 %v3140_v50, %v3139_v9  ;;  %2368 = vadd.xlane.f32.xlu0 %v2340_v46 }
 0x22a   :  { %v1928_v35 = vadd.f32 %v4092_v60, %v4040_v37 }
 0x22b   :  { %v1746_v13 = vadd.f32 %v3077_v38, %v4090_v21  ;;  %v2198_v57 = vmul.f32 %v1743_v58, %v4031_v44  ;;  %v2342_v21 = vmul.f32 %v1743_v58, %v1743_v58 }
 0x22d   :  { %v3158_v4 = vpop.f32.mrb[112].mxu1  ;;  %v3222_v51 = vpop.f32.mrb[112].mxu0  ;;  %2370 = vadd.xlane.f32.xlu1 %v2341_v45  ;;  %2228 = vadd.xlane.f32.xlu0 %v2198_v57  ;;  %v2199_v36 = vmul.f32 %v1746_v13, %v4033_v25  ;;  %v2343_v60 = vmul.f32 %v1746_v13, %v1746_v13  ;;  %v1939_v13 = vadd.f32 %v4102_v39, %v4040_v37 }
 0x22e   :  { %v3159_v31 = vpop.f32.mrb[113].mxu1  ;;  %v3223_v15 = vpop.f32.mrb[113].mxu0  ;;  %v1944_v39 = vadd.f32 %v4107_v55, %v4040_v37 }
 0x22f   :  { %v3160_v40 = vadd.f32 %v3159_v31, %v3158_v4  ;;  %v3224_v0 = vadd.f32 %v3223_v15, %v3222_v51  ;;  %v3161_v52 = vpop.f32.mrb[114].mxu1  ;;  %v3225_v49 = vpop.f32.mrb[114].mxu0 }
 0x230   :  { %v3162_v22 = vpop.f32.mrb[115].mxu1  ;;  %v3226_v18 = vpop.f32.mrb[115].mxu0 }
 0x231   :  { %v2025_v17 = vadd.f32 %v3160_v40, %v1928_v35  ;;  %v3163_v30 = vadd.f32 %v3162_v22, %v3161_v52  ;;  %2230 = vadd.xlane.f32.xlu1 %v2199_v36  ;;  %v3227_v23 = vadd.f32 %v3226_v18, %v3225_v49  ;;  %2372 = vadd.xlane.f32.xlu0 %v2342_v21 }
 0x233   :  { %v2122_v1 = vadd.f32 %v3224_v0, %v2025_v17  ;;  %v2028_v43 = vadd.f32 %v3163_v30, %v1931_v3 }
 0x235   :  { %v2125_v42 = vadd.f32 %v3227_v23, %v2028_v43  ;;  %v3164_v28 = vpop.f32.mrb[116].mxu1  ;;  %v3228_v10 = vpop.f32.mrb[116].mxu0  ;;  %2374 = vadd.xlane.f32.xlu1 %v2343_v60  ;;  %v2232_v9 = vmul.f32 %v2122_v1, %v3947_v12  ;;  %v2376_v12 = vmul.f32 %v2122_v1, %v2122_v1  ;;  %v1947_v43 = vadd.f32 %v4111_v53, %v4040_v37 }
 0x236   :  { %v3165_v6 = vpop.f32.mrb[117].mxu1  ;;  %v3229_v46 = vpop.f32.mrb[117].mxu0  ;;  %v1952_v53 = vadd.f32 %v4115_v24, %v4040_v37 }
 0x237   :  { %v3166_v58 = vadd.f32 %v3165_v6, %v3164_v28  ;;  %v3230_v38 = vadd.f32 %v3229_v46, %v3228_v10  ;;  %v3167_v50 = vpop.f32.mrb[118].mxu1  ;;  %2248 = vadd.xlane.f32.xlu0 %v2232_v9  ;;  %v2233_v45 = vmul.f32 %v2125_v42, %v3949_v7  ;;  %v3231_v57 = vpop.f32.mrb[118].mxu0  ;;  %v2377_v19 = vmul.f32 %v2125_v42, %v2125_v42 }
 0x238   :  { %v3168_v4 = vpop.f32.mrb[119].mxu1  ;;  %v3232_v15 = vpop.f32.mrb[119].mxu0 }
 0x239   :  { %v2033_v51 = vadd.f32 %v3166_v58, %v1936_v5  ;;  %v3169_v31 = vadd.f32 %v3168_v4, %v3167_v50  ;;  %2250 = vadd.xlane.f32.xlu1 %v2233_v45  ;;  %v3233_v35 = vadd.f32 %v3232_v15, %v3231_v57 }
 0x23b   :  { %v2130_v40 = vadd.f32 %v3230_v38, %v2033_v51  ;;  %v2036_v0 = vadd.f32 %v3169_v31, %v1939_v13  ;;  %2392 = vadd.xlane.f32.xlu0 %v2376_v12  ;;  %v1955_v31 = vadd.f32 %v4119_v34, %v4040_v37  ;;  %v1960_v34 = vadd.f32 %v4123_v2, %v4040_v37 }
 0x23d   :  { %v2133_v52 = vadd.f32 %v3233_v35, %v2036_v0  ;;  %v3170_v36 = vpop.f32.mrb[120].mxu1  ;;  %v3234_v49 = vpop.f32.mrb[120].mxu0  ;;  %2394 = vadd.xlane.f32.xlu1 %v2377_v19  ;;  %v2234_v7 = vmul.f32 %v2130_v40, %v3959_v56  ;;  %v2378_v56 = vmul.f32 %v2130_v40, %v2130_v40 }
 0x23e   :  { %v3171_v22 = vpop.f32.mrb[121].mxu1  ;;  %v3235_v21 = vpop.f32.mrb[121].mxu0 }
 0x23f   :  { %v3172_v3 = vadd.f32 %v3171_v22, %v3170_v36  ;;  %v3236_v17 = vadd.f32 %v3235_v21, %v3234_v49  ;;  %v3173_v30 = vpop.f32.mrb[122].mxu1  ;;  %2252 = vadd.xlane.f32.xlu0 %v2234_v7  ;;  %v2235_v18 = vmul.f32 %v2133_v52, %v3961_v11  ;;  %v3237_v23 = vpop.f32.mrb[122].mxu0  ;;  %v2379_v55 = vmul.f32 %v2133_v52, %v2133_v52 }
 0x240   :  { %v3174_v1 = vpop.f32.mrb[123].mxu1  ;;  %v3238_v28 = vpop.f32.mrb[123].mxu0 }
 0x241   :  { %v2041_v60 = vadd.f32 %v3172_v3, %v1944_v39  ;;  %v3175_v42 = vadd.f32 %v3174_v1, %v3173_v30  ;;  %2254 = vadd.xlane.f32.xlu1 %v2235_v18  ;;  %v3239_v10 = vadd.f32 %v3238_v28, %v3237_v23  ;;  %v1963_v23 = vadd.f32 %v4127_v29, %v4040_v37 }
 0x242   :  { %v1968_v29 = vadd.f32 %v4131_v54, %v4040_v37 }
 0x243   :  { %v2138_v9 = vadd.f32 %v3236_v17, %v2041_v60  ;;  %v2044_v6 = vadd.f32 %v3175_v42, %v1947_v43  ;;  %2396 = vadd.xlane.f32.xlu0 %v2378_v56 }
 0x245   :  { %v2141_v46 = vadd.f32 %v3239_v10, %v2044_v6  ;;  %v3176_v5 = vpop.f32.mrb[124].mxu1  ;;  %v3240_v58 = vpop.f32.mrb[124].mxu0  ;;  %2398 = vadd.xlane.f32.xlu1 %v2379_v55  ;;  %v2236_v11 = vmul.f32 %v2138_v9, %v3971_v26  ;;  %v2380_v0 = vmul.f32 %v2138_v9, %v2138_v9 }
 0x246   :  { %v3177_v38 = vpop.f32.mrb[125].mxu1  ;;  %v3241_v50 = vpop.f32.mrb[125].mxu0 }
 0x247   :  { %v3178_v45 = vadd.f32 %v3177_v38, %v3176_v5  ;;  %v3242_v57 = vadd.f32 %v3241_v50, %v3240_v58  ;;  %v3179_v4 = vpop.f32.mrb[126].mxu1  ;;  %v3243_v13 = vpop.f32.mrb[126].mxu0  ;;  %2256 = vadd.xlane.f32.xlu0 %v2236_v11  ;;  %v2237_v51 = vmul.f32 %v2141_v46, %v3973_v62  ;;  %v2381_v24 = vmul.f32 %v2141_v46, %v2141_v46 }
 0x248   :  { %v3180_v15 = vpop.f32.mrb[127].mxu1  ;;  %v3244_v12 = vpop.f32.mrb[127].mxu0 }
 0x249   :  { %v2049_v35 = vadd.f32 %v3178_v45, %v1952_v53  ;;  %v3181_v40 = vadd.f32 %v3180_v15, %v3179_v4  ;;  %v3245_v26 = vadd.f32 %v3244_v12, %v3243_v13  ;;  %2258 = vadd.xlane.f32.xlu1 %v2237_v51  ;;  %v1971_v45 = vadd.f32 %v4135_v32, %v4040_v37 }
 0x24b   :  { %v2146_v19 = vadd.f32 %v3242_v57, %v2049_v35  ;;  %v2052_v52 = vadd.f32 %v3181_v40, %v1955_v31  ;;  %2400 = vadd.xlane.f32.xlu0 %v2380_v0  ;;  %v4190_v35 = vpop.xlane.xlu0 %2296  ;;  %v4192_v40 = vpop.xlane.xlu1 %2298 }
 0x24d   :  { %v2149_v36 = vadd.f32 %v3245_v26, %v2052_v52  ;;  %v3182_v49 = vpop.f32.mrb[128].mxu1  ;;  %v3246_v7 = vpop.f32.mrb[128].mxu0  ;;  %2402 = vadd.xlane.f32.xlu1 %v2381_v24  ;;  %v2238_v62 = vmul.f32 %v2146_v19, %v3983_v47  ;;  %v2382_v28 = vmul.f32 %v2146_v19, %v2146_v19  ;;  %v1976_v24 = vadd.f32 %v4139_v14, %v4040_v37 }
 0x24e   :  { %v3183_v22 = vpop.f32.mrb[129].mxu1  ;;  %v3247_v21 = vpop.f32.mrb[129].mxu0 }
 0x24f   :  { %v3184_v39 = vadd.f32 %v3183_v22, %v3182_v49  ;;  %v3248_v3 = vadd.f32 %v3247_v21, %v3246_v7  ;;  %v3185_v17 = vpop.f32.mrb[130].mxu1  ;;  %v3249_v30 = vpop.f32.mrb[130].mxu0  ;;  %2260 = vadd.xlane.f32.xlu0 %v2238_v62  ;;  %v2239_v18 = vmul.f32 %v2149_v36, %v3985_v63  ;;  %v2383_v2 = vmul.f32 %v2149_v36, %v2149_v36 }
 0x250   :  { %v3186_v1 = vpop.f32.mrb[131].mxu1  ;;  %v3250_v43 = vpop.f32.mrb[131].mxu0  ;;  %v1979_v21 = vadd.f32 %v4143_v33, %v4040_v37 }
 0x251   :  { %v2057_v60 = vadd.f32 %v3184_v39, %v1960_v34  ;;  %v3187_v42 = vadd.f32 %v3186_v1, %v3185_v17  ;;  %v3251_v47 = vadd.f32 %v3250_v43, %v3249_v30  ;;  %2262 = vadd.xlane.f32.xlu1 %v2239_v18  ;;  %v4200_v1 = vpop.xlane.xlu0 %2300  ;;  %v4202_v43 = vpop.xlane.xlu1 %2302 }
 0x253   :  { %v2154_v56 = vadd.f32 %v3248_v3, %v2057_v60  ;;  %v2060_v10 = vadd.f32 %v3187_v42, %v1963_v23  ;;  %2404 = vadd.xlane.f32.xlu0 %v2382_v28 }
 0x255   :  { %v2157_v9 = vadd.f32 %v3251_v47, %v2060_v10  ;;  %v3188_v6 = vpop.f32.mrb[132].mxu1  ;;  %v3252_v55 = vpop.f32.mrb[132].mxu0  ;;  %2406 = vadd.xlane.f32.xlu1 %v2383_v2  ;;  %v2240_v63 = vmul.f32 %v2154_v56, %v3995_v61  ;;  %v2384_v31 = vmul.f32 %v2154_v56, %v2154_v56  ;;  %v1984_v56 = vadd.f32 %v4147_v8, %v4040_v37 }
 0x256   :  { %v3189_v46 = vpop.f32.mrb[133].mxu1  ;;  %v3253_v5 = vpop.f32.mrb[133].mxu0 }
 0x257   :  { %v3190_v58 = vadd.f32 %v3189_v46, %v3188_v6  ;;  %v3254_v11 = vadd.f32 %v3253_v5, %v3252_v55  ;;  %v3191_v38 = vpop.f32.mrb[134].mxu1  ;;  %v3255_v50 = vpop.f32.mrb[134].mxu0  ;;  %2264 = vadd.xlane.f32.xlu0 %v2240_v63  ;;  %v2241_v53 = vmul.f32 %v2157_v9, %v3997_v20  ;;  %v2385_v54 = vmul.f32 %v2157_v9, %v2157_v9 }
 0x258   :  { %v3192_v57 = vpop.f32.mrb[135].mxu1  ;;  %v3256_v4 = vpop.f32.mrb[135].mxu0  ;;  %v1987_v63 = vadd.f32 %v4151_v48, %v4040_v37 }
 0x259   :  { %v2065_v13 = vadd.f32 %v3190_v58, %v1968_v29  ;;  %v3193_v51 = vadd.f32 %v3192_v57, %v3191_v38  ;;  %v3257_v61 = vadd.f32 %v3256_v4, %v3255_v50  ;;  %2266 = vadd.xlane.f32.xlu1 %v2241_v53  ;;  %v4210_v38 = vpop.xlane.xlu0 %2304 }
 0x25b   :  { %v2162_v15 = vadd.f32 %v3254_v11, %v2065_v13  ;;  %v2068_v12 = vadd.f32 %v3193_v51, %v1971_v45  ;;  %2408 = vadd.xlane.f32.xlu0 %v2384_v31  ;;  %v4212_v45 = vpop.xlane.xlu1 %2306 }
 0x25d   :  { %v2165_v26 = vadd.f32 %v3257_v61, %v2068_v12  ;;  %v3194_v20 = vpop.f32.mrb[136].mxu1  ;;  %v3258_v0 = vpop.f32.mrb[136].mxu0  ;;  %2410 = vadd.xlane.f32.xlu1 %v2385_v54  ;;  %v2242_v32 = vmul.f32 %v2162_v15, %v4007_v27  ;;  %v2386_v30 = vmul.f32 %v2162_v15, %v2162_v15 }
 0x25e   :  { %v3195_v19 = vpop.f32.mrb[137].mxu1  ;;  %v3259_v52 = vpop.f32.mrb[137].mxu0 }
 0x25f   :  { %v3196_v36 = vadd.f32 %v3195_v19, %v3194_v20  ;;  %v3260_v49 = vadd.f32 %v3259_v52, %v3258_v0  ;;  %v3197_v7 = vpop.f32.mrb[138].mxu1  ;;  %v3261_v62 = vpop.f32.mrb[138].mxu0  ;;  %2268 = vadd.xlane.f32.xlu0 %v2242_v32  ;;  %v2243_v22 = vmul.f32 %v2165_v26, %v4009_v41  ;;  %v2387_v14 = vmul.f32 %v2165_v26, %v2165_v26 }
 0x260   :  { %v3198_v34 = vpop.f32.mrb[139].mxu1  ;;  %v3262_v39 = vpop.f32.mrb[139].mxu0 }
 0x261   :  { %v2073_v3 = vadd.f32 %v3196_v36, %v1976_v24  ;;  %v3199_v17 = vadd.f32 %v3198_v34, %v3197_v7  ;;  %v3263_v27 = vadd.f32 %v3262_v39, %v3261_v62  ;;  %2270 = vadd.xlane.f32.xlu1 %v2243_v22  ;;  %v4215_v37 = vpop.xlane.xlu0 %2308  ;;  %v4218_v4 = vpop.xlane.xlu1 %2310 }
 0x263   :  { %v2170_v18 = vadd.f32 %v3260_v49, %v2073_v3  ;;  %v2076_v23 = vadd.f32 %v3199_v17, %v1979_v21  ;;  %2412 = vadd.xlane.f32.xlu0 %v2386_v30 }
 0x265   :  { %v2173_v60 = vadd.f32 %v3263_v27, %v2076_v23  ;;  %v3200_v41 = vpop.f32.mrb[140].mxu1  ;;  %v3264_v42 = vpop.f32.mrb[140].mxu0  ;;  %2414 = vadd.xlane.f32.xlu1 %v2387_v14  ;;  %v2244_v33 = vmul.f32 %v2170_v18, %v4019_v59  ;;  %v2388_v11 = vmul.f32 %v2170_v18, %v2170_v18 }
 0x266   :  { %v3201_v47 = vpop.f32.mrb[141].mxu1  ;;  %v3265_v28 = vpop.f32.mrb[141].mxu0 }
 0x267   :  { %v3202_v10 = vadd.f32 %v3201_v47, %v3200_v41  ;;  %v3266_v2 = vadd.f32 %v3265_v28, %v3264_v42  ;;  %v3203_v9 = vpop.f32.mrb[142].mxu1  ;;  %v3267_v6 = vpop.f32.mrb[142].mxu0  ;;  %2272 = vadd.xlane.f32.xlu0 %v2244_v33  ;;  %v2245_v55 = vmul.f32 %v2173_v60, %v4021_v16  ;;  %v2389_v53 = vmul.f32 %v2173_v60, %v2173_v60 }
 0x268   :  { %v3204_v46 = vpop.f32.mrb[143].mxu1  ;;  %v3268_v5 = vpop.f32.mrb[143].mxu0 }
 0x269   :  { %v2081_v29 = vadd.f32 %v3202_v10, %v1984_v56  ;;  %v3205_v58 = vadd.f32 %v3204_v46, %v3203_v9  ;;  %v3269_v59 = vadd.f32 %v3268_v5, %v3267_v6  ;;  %2274 = vadd.xlane.f32.xlu1 %v2245_v55  ;;  %v4220_v51 = vpop.xlane.xlu0 %2312  ;;  %v4222_v31 = vpop.xlane.xlu1 %2314 }
 0x26b   :  { %v2178_v8 = vadd.f32 %v3266_v2, %v2081_v29  ;;  %v2084_v50 = vadd.f32 %v3205_v58, %v1987_v63  ;;  %2416 = vadd.xlane.f32.xlu0 %v2388_v11 }
 0x26d   :  { %v2181_v57 = vadd.f32 %v3269_v59, %v2084_v50  ;;  %2418 = vadd.xlane.f32.xlu1 %v2389_v53  ;;  %v2246_v16 = vmul.f32 %v2178_v8, %v4031_v44  ;;  %v2390_v13 = vmul.f32 %v2178_v8, %v2178_v8  ;;  %v4224_v15 = vpop.xlane.xlu0 %2316  ;;  %v4226_v12 = vpop.xlane.xlu1 %2318 }
 0x26f   :  { %2276 = vadd.xlane.f32.xlu0 %v2246_v16  ;;  %v2247_v48 = vmul.f32 %v2181_v57, %v4033_v25  ;;  %v2391_v61 = vmul.f32 %v2181_v57, %v2181_v57 }
 0x271   :  { %2278 = vadd.xlane.f32.xlu1 %v2247_v48  ;;  %v4228_v44 = vpop.xlane.xlu0 %2320  ;;  %v4230_v54 = vpop.xlane.xlu1 %2322 }
 0x273   :  { %2420 = vadd.xlane.f32.xlu0 %v2390_v13 }
 0x275   :  { %2422 = vadd.xlane.f32.xlu1 %v2391_v61  ;;  %v4232_v25 = vpop.xlane.xlu0 %2324  ;;  %v4234_v26 = vpop.xlane.xlu1 %2326 }
 0x282   :  { %v2201_v20 = vpop.xlane.xlu0 %2200 }
 0x284   :  { %v2347_v0 = vpop.xlane.xlu1 %2346 }
 0x285   :  { %v2425_v32 = vmul.f32 %v2347_v0, %v4192_v40 }
 0x286   :  { %v2345_v19 = vpop.xlane.xlu0 %2344 }
 0x287   :  { %3391 = vrsqrt.f32 %v2425_v32  ;;  %v2424_v52 = vmul.f32 %v2345_v19, %v4190_v35 }
 0x289   :  { %3393 = vrsqrt.f32 %v2424_v52 }
 0x28a   :  { %v2205_v24 = vpop.xlane.xlu1 %2204  ;;  %v2203_v36 = vpop.xlane.xlu0 %2202 }
 0x28e   :  { %v2207_v49 = vpop.xlane.xlu1 %2206  ;;  %v2349_v7 = vpop.xlane.xlu0 %2348 }
 0x28f   :  { %v2426_v62 = vmul.f32 %v2349_v7, %v4200_v1 }
 0x291   :  { %v3392_v22 = vpop.eup %3391  ;;  %3395 = vrsqrt.f32 %v2426_v62 }
 0x292   :  { %v2457_v21 = vmin.f32 %v3392_v22, 1e+08  ;;  %v2351_v34 = vpop.xlane.xlu1 %2350  ;;  %v2209_v17 = vpop.xlane.xlu0 %2208 }
 0x293   :  { %v3394_v39 = vpop.eup %3393  ;;  %v2427_v3 = vmul.f32 %v2351_v34, %v4202_v43 }
 0x294   :  { %v2456_v27 = vmin.f32 %v3394_v39, 1e+08  ;;  %v2473_v30 = vmul.f32 %v2457_v21, %v2203_v36 }
 0x295   :  { %3397 = vrsqrt.f32 %v2427_v3 }
 0x296   :  { %v2472_v18 = vmul.f32 %v2456_v27, %v2201_v20  ;;  %2554 = vst.msk [vmem:[%s4403_s7 + $0x8] sm:$0xff] %vm2552_vm0, %v2473_v30  ;;  %v2211_v23 = vpop.xlane.xlu1 %2210  ;;  %v2353_v14 = vpop.xlane.xlu0 %2352 }
 0x297   :  { %v2428_v60 = vmul.f32 %v2353_v14, %v4210_v38 }
 0x298   :  { %2553 = vst.msk [vmem:[%s4403_s7] sm:$0xff] %vm2552_vm0, %v2472_v18 }
 0x299   :  { %3399 = vrsqrt.f32 %v2428_v60 }
 0x29a   :  { %v2355_v41 = vpop.xlane.xlu1 %2354  ;;  %v2213_v33 = vpop.xlane.xlu0 %2212 }
 0x29b   :  { %v2429_v42 = vmul.f32 %v2355_v41, %v4212_v45  ;;  %v3396_v47 = vpop.eup %3395 }
 0x29c   :  { %v2458_v28 = vmin.f32 %v3396_v47, 1e+08 }
 0x29d   :  { %3401 = vrsqrt.f32 %v2429_v42 }
 0x29e   :  { %v2215_v56 = vpop.xlane.xlu1 %2214  ;;  %v2474_v2 = vmul.f32 %v2458_v28, %v2205_v24  ;;  %v2357_v9 = vpop.xlane.xlu0 %2356 }
 0x29f   :  { %v3398_v10 = vpop.eup %3397  ;;  %v2430_v55 = vmul.f32 %v2357_v9, %v4215_v37 }
 0x2a0   :  { %v2459_v6 = vmin.f32 %v3398_v10, 1e+08  ;;  %2555 = vst.msk [vmem:[%s4403_s7 + $0x10] sm:$0xff] %vm2552_vm0, %v2474_v2 }
 0x2a1   :  { %3403 = vrsqrt.f32 %v2430_v55 }
 0x2a2   :  { %v2475_v63 = vmul.f32 %v2459_v6, %v2207_v49  ;;  %v2359_v46 = vpop.xlane.xlu1 %2358  ;;  %v2217_v29 = vpop.xlane.xlu0 %2216 }
 0x2a3   :  { %v2431_v5 = vmul.f32 %v2359_v46, %v4218_v4  ;;  %v3400_v58 = vpop.eup %3399 }
 0x2a4   :  { %2556 = vst.msk [vmem:[%s4403_s7 + $0x18] sm:$0xff] %vm2552_vm0, %v2475_v63  ;;  %v2460_v59 = vmin.f32 %v3400_v58, 1e+08 }
 0x2a5   :  { %3405 = vrsqrt.f32 %v2431_v5 }
 0x2a6   :  { %v2219_v11 = vpop.xlane.xlu1 %2218  ;;  %v2476_v50 = vmul.f32 %v2460_v59, %v2209_v17  ;;  %v2361_v53 = vpop.xlane.xlu0 %2360 }
 0x2a7   :  { %v3402_v8 = vpop.eup %3401  ;;  %v2432_v16 = vmul.f32 %v2361_v53, %v4220_v51 }
 0x2a8   :  { %v2461_v57 = vmin.f32 %v3402_v8, 1e+08  ;;  %2557 = vst.msk [vmem:[%s4403_s7 + $0x20] sm:$0xff] %vm2552_vm0, %v2476_v50 }
 0x2a9   :  { %3407 = vrsqrt.f32 %v2432_v16 }
 0x2aa   :  { %v2477_v48 = vmul.f32 %v2461_v57, %v2211_v23  ;;  %v2363_v13 = vpop.xlane.xlu1 %2362  ;;  %v2221_v20 = vpop.xlane.xlu0 %2220 }
 0x2ab   :  { %v2433_v61 = vmul.f32 %v2363_v13, %v4222_v31  ;;  %v3404_v0 = vpop.eup %3403 }
 0x2ac   :  { %2558 = vst.msk [vmem:[%s4403_s7 + $0x28] sm:$0xff] %vm2552_vm0, %v2477_v48  ;;  %v2462_v32 = vmin.f32 %v3404_v0, 1e+08 }
 0x2ad   :  { %3409 = vrsqrt.f32 %v2433_v61 }
 0x2ae   :  { %v2223_v19 = vpop.xlane.xlu1 %2222  ;;  %v2478_v24 = vmul.f32 %v2462_v32, %v2213_v33  ;;  %v2365_v36 = vpop.xlane.xlu0 %2364 }
 0x2af   :  { %v3406_v52 = vpop.eup %3405  ;;  %v2434_v7 = vmul.f32 %v2365_v36, %v4224_v15 }
 0x2b0   :  { %v2463_v49 = vmin.f32 %v3406_v52, 1e+08  ;;  %2559 = vst.msk [vmem:[%s4403_s7 + $0x30] sm:$0xff] %vm2552_vm0, %v2478_v24 }
 0x2b1   :  { %3411 = vrsqrt.f32 %v2434_v7 }
 0x2b2   :  { %v2479_v62 = vmul.f32 %v2463_v49, %v2215_v56  ;;  %v2367_v22 = vpop.xlane.xlu1 %2366  ;;  %v2225_v34 = vpop.xlane.xlu0 %2224 }
 0x2b3   :  { %v2435_v21 = vmul.f32 %v2367_v22, %v4226_v12  ;;  %v3408_v39 = vpop.eup %3407 }
 0x2b4   :  { %2560 = vst.msk [vmem:[%s4403_s7 + $0x38] sm:$0xff] %vm2552_vm0, %v2479_v62  ;;  %v2464_v3 = vmin.f32 %v3408_v39, 1e+08 }
 0x2b5   :  { %3413 = vrsqrt.f32 %v2435_v21 }
 0x2b6   :  { %v2227_v17 = vpop.xlane.xlu1 %2226  ;;  %v2480_v30 = vmul.f32 %v2464_v3, %v2217_v29  ;;  %v2369_v18 = vpop.xlane.xlu0 %2368 }
 0x2b7   :  { %v3410_v27 = vpop.eup %3409  ;;  %v2436_v14 = vmul.f32 %v2369_v18, %v4228_v44 }
 0x2b8   :  { %v2465_v23 = vmin.f32 %v3410_v27, 1e+08  ;;  %2561 = vst.msk [vmem:[%s4403_s7 + $0x40] sm:$0xff] %vm2552_vm0, %v2480_v30 }
 0x2b9   :  { %3415 = vrsqrt.f32 %v2436_v14 }
 0x2ba   :  { %v2481_v60 = vmul.f32 %v2465_v23, %v2219_v11  ;;  %v2371_v41 = vpop.xlane.xlu1 %2370  ;;  %v2229_v33 = vpop.xlane.xlu0 %2228 }
 0x2bb   :  { %v2437_v42 = vmul.f32 %v2371_v41, %v4230_v54  ;;  %v3412_v47 = vpop.eup %3411 }
 0x2bc   :  { %2562 = vst.msk [vmem:[%s4403_s7 + $0x48] sm:$0xff] %vm2552_vm0, %v2481_v60  ;;  %v2466_v28 = vmin.f32 %v3412_v47, 1e+08 }
 0x2bd   :  { %3417 = vrsqrt.f32 %v2437_v42 }
 0x2be   :  { %v2231_v56 = vpop.xlane.xlu1 %2230  ;;  %v2482_v2 = vmul.f32 %v2466_v28, %v2221_v20  ;;  %v2373_v9 = vpop.xlane.xlu0 %2372 }
 0x2bf   :  { %v3414_v10 = vpop.eup %3413  ;;  %v2438_v55 = vmul.f32 %v2373_v9, %v4232_v25 }
 0x2c0   :  { %v2467_v6 = vmin.f32 %v3414_v10, 1e+08  ;;  %2563 = vst.msk [vmem:[%s4403_s7 + $0x50] sm:$0xff] %vm2552_vm0, %v2482_v2 }
 0x2c1   :  { %3419 = vrsqrt.f32 %v2438_v55 }
 0x2c2   :  { %v2483_v63 = vmul.f32 %v2467_v6, %v2223_v19  ;;  %v2375_v46 = vpop.xlane.xlu1 %2374 }
 0x2c3   :  { %v2439_v5 = vmul.f32 %v2375_v46, %v4234_v26  ;;  %v3416_v29 = vpop.eup %3415 }
 0x2c4   :  { %2564 = vst.msk [vmem:[%s4403_s7 + $0x58] sm:$0xff] %vm2552_vm0, %v2483_v63  ;;  %v2249_v58 = vpop.xlane.xlu0 %2248  ;;  %v2468_v59 = vmin.f32 %v3416_v29, 1e+08 }
 0x2c5   :  { %3421 = vrsqrt.f32 %v2439_v5 }
 0x2c6   :  { %v2251_v11 = vpop.xlane.xlu1 %2250  ;;  %v2484_v50 = vmul.f32 %v2468_v59, %v2225_v34 }
 0x2c7   :  { %v3418_v8 = vpop.eup %3417 }
 0x2c8   :  { %v2469_v53 = vmin.f32 %v3418_v8, 1e+08  ;;  %v2393_v57 = vpop.xlane.xlu0 %2392  ;;  %2565 = vst.msk [vmem:[%s4403_s7 + $0x60] sm:$0xff] %vm2552_vm0, %v2484_v50 }
 0x2c9   :  { %v2488_v16 = vmul.f32 %v2393_v57, %v4190_v35 }
 0x2ca   :  { %v2485_v48 = vmul.f32 %v2469_v53, %v2227_v17  ;;  %v2395_v13 = vpop.xlane.xlu1 %2394 }
 0x2cb   :  { %3423 = vrsqrt.f32 %v2488_v16  ;;  %v2489_v61 = vmul.f32 %v2395_v13, %v4192_v40  ;;  %v3420_v20 = vpop.eup %3419 }
 0x2cc   :  { %2566 = vst.msk [vmem:[%s4403_s7 + $0x68] sm:$0xff] %vm2552_vm0, %v2485_v48  ;;  %v2253_v0 = vpop.xlane.xlu0 %2252  ;;  %v2470_v32 = vmin.f32 %v3420_v20, 1e+08 }
 0x2cd   :  { %3425 = vrsqrt.f32 %v2489_v61 }
 0x2ce   :  { %v2255_v19 = vpop.xlane.xlu1 %2254  ;;  %v2486_v24 = vmul.f32 %v2470_v32, %v2229_v33 }
 0x2cf   :  { %v3422_v52 = vpop.eup %3421 }
 0x2d0   :  { %v2471_v36 = vmin.f32 %v3422_v52, 1e+08  ;;  %v2397_v49 = vpop.xlane.xlu0 %2396  ;;  %2567 = vst.msk [vmem:[%s4403_s7 + $0x70] sm:$0xff] %vm2552_vm0, %v2486_v24 }
 0x2d1   :  { %v2490_v35 = vmul.f32 %v2397_v49, %v4200_v1 }
 0x2d2   :  { %v2487_v40 = vmul.f32 %v2471_v36, %v2231_v56  ;;  %v2399_v7 = vpop.xlane.xlu1 %2398 }
 0x2d3   :  { %3427 = vrsqrt.f32 %v2490_v35  ;;  %v2491_v62 = vmul.f32 %v2399_v7, %v4202_v43 }
 0x2d4   :  { %2568 = vst.msk [vmem:[%s4403_s7 + $0x78] sm:$0xff] %vm2552_vm0, %v2487_v40  ;;  %v2257_v22 = vpop.xlane.xlu0 %2256 }
 0x2d5   :  { %v3424_v21 = vpop.eup %3423  ;;  %3429 = vrsqrt.f32 %v2491_v62 }
 0x2d6   :  { %v2520_v34 = vmin.f32 %v3424_v21, 1e+08  ;;  %v2259_v39 = vpop.xlane.xlu1 %2258 }
 0x2d7   :  { %v3426_v3 = vpop.eup %3425 }
 0x2d8   :  { %v2536_v17 = vmul.f32 %v2520_v34, %v2249_v58  ;;  %v2521_v27 = vmin.f32 %v3426_v3, 1e+08  ;;  %v2401_v30 = vpop.xlane.xlu0 %2400 }
 0x2d9   :  { %v2492_v1 = vmul.f32 %v2401_v30, %v4210_v38 }
 0x2da   :  { %2569 = vst.msk [vmem:[%s4404_s8] sm:$0xff] %vm2552_vm0, %v2536_v17  ;;  %v2537_v43 = vmul.f32 %v2521_v27, %v2251_v11  ;;  %v2403_v18 = vpop.xlane.xlu1 %2402 }
 0x2db   :  { %3431 = vrsqrt.f32 %v2492_v1  ;;  %v2493_v23 = vmul.f32 %v2403_v18, %v4212_v45 }
 0x2dc   :  { %2570 = vst.msk [vmem:[%s4404_s8 + $0x8] sm:$0xff] %vm2552_vm0, %v2537_v43  ;;  %v2261_v14 = vpop.xlane.xlu0 %2260 }
 0x2dd   :  { %v3428_v60 = vpop.eup %3427  ;;  %3433 = vrsqrt.f32 %v2493_v23 }
 0x2de   :  { %v2522_v41 = vmin.f32 %v3428_v60, 1e+08  ;;  %v2263_v38 = vpop.xlane.xlu1 %2262 }
 0x2df   :  { %v3430_v42 = vpop.eup %3429 }
 0x2e0   :  { %v2538_v33 = vmul.f32 %v2522_v41, %v2253_v0  ;;  %v2523_v47 = vmin.f32 %v3430_v42, 1e+08  ;;  %v2405_v28 = vpop.xlane.xlu0 %2404 }
 0x2e1   :  { %v2494_v56 = vmul.f32 %v2405_v28, %v4215_v37 }
 0x2e2   :  { %2571 = vst.msk [vmem:[%s4404_s8 + $0x10] sm:$0xff] %vm2552_vm0, %v2538_v33  ;;  %v2539_v45 = vmul.f32 %v2523_v47, %v2255_v19  ;;  %v2407_v10 = vpop.xlane.xlu1 %2406 }
 0x2e3   :  { %3435 = vrsqrt.f32 %v2494_v56  ;;  %v2495_v2 = vmul.f32 %v2407_v10, %v4218_v4 }
 0x2e4   :  { %2572 = vst.msk [vmem:[%s4404_s8 + $0x18] sm:$0xff] %vm2552_vm0, %v2539_v45  ;;  %v2265_v9 = vpop.xlane.xlu0 %2264 }
 0x2e5   :  { %v3432_v6 = vpop.eup %3431  ;;  %3437 = vrsqrt.f32 %v2495_v2 }
 0x2e6   :  { %v2524_v55 = vmin.f32 %v3432_v6, 1e+08  ;;  %v2267_v37 = vpop.xlane.xlu1 %2266 }
 0x2e7   :  { %v3434_v63 = vpop.eup %3433 }
 0x2e8   :  { %v2540_v46 = vmul.f32 %v2524_v55, %v2257_v22  ;;  %v2525_v5 = vmin.f32 %v3434_v63, 1e+08  ;;  %v2409_v29 = vpop.xlane.xlu0 %2408 }
 0x2e9   :  { %v2496_v58 = vmul.f32 %v2409_v29, %v4220_v51 }
 0x2ea   :  { %2573 = vst.msk [vmem:[%s4404_s8 + $0x20] sm:$0xff] %vm2552_vm0, %v2540_v46  ;;  %v2541_v4 = vmul.f32 %v2525_v5, %v2259_v39  ;;  %v2411_v59 = vpop.xlane.xlu1 %2410 }
 0x2eb   :  { %3439 = vrsqrt.f32 %v2496_v58  ;;  %v2497_v11 = vmul.f32 %v2411_v59, %v4222_v31 }
 0x2ec   :  { %2574 = vst.msk [vmem:[%s4404_s8 + $0x28] sm:$0xff] %vm2552_vm0, %v2541_v4  ;;  %v2269_v8 = vpop.xlane.xlu0 %2268 }
 0x2ed   :  { %v3436_v50 = vpop.eup %3435  ;;  %3441 = vrsqrt.f32 %v2497_v11 }
 0x2ee   :  { %v2526_v53 = vmin.f32 %v3436_v50, 1e+08  ;;  %v2271_v51 = vpop.xlane.xlu1 %2270 }
 0x2ef   :  { %v3438_v57 = vpop.eup %3437 }
 0x2f0   :  { %v2542_v16 = vmul.f32 %v2526_v53, %v2261_v14  ;;  %v2527_v48 = vmin.f32 %v3438_v57, 1e+08  ;;  %v2413_v13 = vpop.xlane.xlu0 %2412 }
 0x2f1   :  { %v2498_v61 = vmul.f32 %v2413_v13, %v4224_v15 }
 0x2f2   :  { %2575 = vst.msk [vmem:[%s4404_s8 + $0x30] sm:$0xff] %vm2552_vm0, %v2542_v16  ;;  %v2543_v31 = vmul.f32 %v2527_v48, %v2263_v38  ;;  %v2415_v20 = vpop.xlane.xlu1 %2414 }
 0x2f3   :  { %3443 = vrsqrt.f32 %v2498_v61  ;;  %v2499_v0 = vmul.f32 %v2415_v20, %v4226_v12 }
 0x2f4   :  { %2576 = vst.msk [vmem:[%s4404_s8 + $0x38] sm:$0xff] %vm2552_vm0, %v2543_v31  ;;  %v2273_v32 = vpop.xlane.xlu0 %2272 }
 0x2f5   :  { %v3440_v19 = vpop.eup %3439  ;;  %3445 = vrsqrt.f32 %v2499_v0 }
 0x2f6   :  { %v2528_v52 = vmin.f32 %v3440_v19, 1e+08  ;;  %v2275_v15 = vpop.xlane.xlu1 %2274 }
 0x2f7   :  { %v3442_v24 = vpop.eup %3441 }
 0x2f8   :  { %v2544_v36 = vmul.f32 %v2528_v52, %v2265_v9  ;;  %v2529_v49 = vmin.f32 %v3442_v24, 1e+08  ;;  %v2417_v35 = vpop.xlane.xlu0 %2416 }
 0x2f9   :  { %v2500_v40 = vmul.f32 %v2417_v35, %v4228_v44 }
 0x2fa   :  { %2577 = vst.msk [vmem:[%s4404_s8 + $0x40] sm:$0xff] %vm2552_vm0, %v2544_v36  ;;  %v2545_v12 = vmul.f32 %v2529_v49, %v2267_v37  ;;  %v2419_v7 = vpop.xlane.xlu1 %2418 }
 0x2fb   :  { %3447 = vrsqrt.f32 %v2500_v40  ;;  %v2501_v62 = vmul.f32 %v2419_v7, %v4230_v54 }
 0x2fc   :  { %2578 = vst.msk [vmem:[%s4404_s8 + $0x48] sm:$0xff] %vm2552_vm0, %v2545_v12  ;;  %v2277_v22 = vpop.xlane.xlu0 %2276 }
 0x2fd   :  { %v3444_v21 = vpop.eup %3443  ;;  %3449 = vrsqrt.f32 %v2501_v62 }
 0x2fe   :  { %v2530_v34 = vmin.f32 %v3444_v21, 1e+08  ;;  %v2279_v44 = vpop.xlane.xlu1 %2278 }
 0x2ff   :  { %v3446_v39 = vpop.eup %3445 }
 0x300   :  { %v2546_v3 = vmul.f32 %v2530_v34, %v2269_v8  ;;  %v2531_v17 = vmin.f32 %v3446_v39, 1e+08  ;;  %v2421_v27 = vpop.xlane.xlu0 %2420 }
 0x301   :  { %v2502_v30 = vmul.f32 %v2421_v27, %v4232_v25 }
 0x302   :  { %2579 = vst.msk [vmem:[%s4404_s8 + $0x50] sm:$0xff] %vm2552_vm0, %v2546_v3  ;;  %v2547_v54 = vmul.f32 %v2531_v17, %v2271_v51  ;;  %v2423_v1 = vpop.xlane.xlu1 %2422 }
 0x303   :  { %3451 = vrsqrt.f32 %v2502_v30  ;;  %v2503_v43 = vmul.f32 %v2423_v1, %v4234_v26 }
 0x304   :  { %2580 = vst.msk [vmem:[%s4404_s8 + $0x58] sm:$0xff] %vm2552_vm0, %v2547_v54 }
 0x305   :  { %v3448_v18 = vpop.eup %3447  ;;  %3453 = vrsqrt.f32 %v2503_v43 }
 0x306   :  { %v2532_v23 = vmin.f32 %v3448_v18, 1e+08 }
 0x307   :  { %v3450_v14 = vpop.eup %3449 }
 0x308   :  { %v2548_v25 = vmul.f32 %v2532_v23, %v2273_v32  ;;  %v2533_v60 = vmin.f32 %v3450_v14, 1e+08 }
 0x30a   :  { %2581 = vst.msk [vmem:[%s4404_s8 + $0x60] sm:$0xff] %vm2552_vm0, %v2548_v25  ;;  %v2549_v41 = vmul.f32 %v2533_v60, %v2275_v15 }
 0x30c   :  { %2582 = vst.msk [vmem:[%s4404_s8 + $0x68] sm:$0xff] %vm2552_vm0, %v2549_v41 }
 0x30d   :  { %v3452_v26 = vpop.eup %3451 }
 0x30e   :  { %v2534_v38 = vmin.f32 %v3452_v26, 1e+08 }
 0x30f   :  { %v3454_v42 = vpop.eup %3453 }
 0x310   :  { %v2550_v33 = vmul.f32 %v2534_v38, %v2277_v22  ;;  %v2535_v47 = vmin.f32 %v3454_v42, 1e+08 }
 0x312   :  { %2583 = vst.msk [vmem:[%s4404_s8 + $0x70] sm:$0xff] %vm2552_vm0, %v2550_v33  ;;  %v2551_v28 = vmul.f32 %v2535_v47, %v2279_v44 }
 0x314   :  { %2584 = vst.msk [vmem:[%s4404_s8 + $0x78] sm:$0xff] %vm2552_vm0, %v2551_v28 }
 0x315   :  { %2593 = vsyncpa [#allocation3], 1 }
 0x316   :  { %2594 = vsyncpa [#allocation5], 1 }
 0x317   :  { %2595 = vsyncpa [#allocation8], 1 }

</bundles_post_ra>
